<compile_context>
chip_gen: v6e
topology: v6e:2x2x1
jax: 0.10.0
libtpu: 0.0.40
codegen_flags: <defaults>
</compile_context>

<pallas_src>
import jax
import jax.numpy as jnp
from jax.experimental import pallas as pl
from jax.experimental.pallas import tpu as pltpu

IN_CH = 3
PATCH = 4
D1 = 16            # stage-1 embed dim
D2 = 32            # stage-2 embed dim == encoder.embed_dim[-1] == feat_dim
MLP_HIDDEN = 4 * D1
NUM_CLASSES = 10
BLANK_ID = 0       # only used by the (not implemented) CTC loss
LANE = 128         # lane-dense padded classifier width
K1 = IN_CH * PATCH * PATCH            # im2col columns (c, ph, pw) = 48


def _rup(n, m):
    return ((n + m - 1) // m) * m


# Row offsets of each weight inside the packed bf16 weight slab (all offsets
# are multiples of 16 -> aligned to the bf16 (16,128) sublane tile).
O_PE = 0
O_FC1 = _rup(O_PE + K1, 16)           # 48
O_FC2 = _rup(O_FC1 + D1, 16)          # 64
O_PM = _rup(O_FC2 + MLP_HIDDEN, 16)   # 128
O_CLS = _rup(O_PM + 4 * D1, 16)       # 192
W_ROWS = _rup(O_CLS + D2, 16)         # 224
V_ROWS = 16                           # packed bias / LN-vector slab rows


# ---------------------------------------------------------------------------
# Parameter init (matches trunc_normal_(std=0.02) / zero-bias of the module)
# ---------------------------------------------------------------------------
def _trunc_normal(key, shape, std=0.02):
    return jax.random.truncated_normal(key, -2.0, 2.0, shape, jnp.float32) * std


def init_params(key):
    ks = jax.random.split(key, 8)
    p = {}
    # patch-embed conv: PyTorch weight [D1, C, 4, 4] -> stored as [C*4*4, D1]
    p["pe_w"] = _trunc_normal(ks[0], (K1, D1))
    p["pe_b"] = jnp.zeros((D1,), jnp.float32)
    p["ln0_g"] = jnp.ones((D1,), jnp.float32)
    p["ln0_b"] = jnp.zeros((D1,), jnp.float32)
    # residual MLP block
    p["ln1_g"] = jnp.ones((D1,), jnp.float32)
    p["ln1_b"] = jnp.zeros((D1,), jnp.float32)
    p["fc1_w"] = _trunc_normal(ks[1], (D1, MLP_HIDDEN))   # Linear stored [in, out]
    p["fc1_b"] = jnp.zeros((MLP_HIDDEN,), jnp.float32)
    p["fc2_w"] = _trunc_normal(ks[2], (MLP_HIDDEN, D1))
    p["fc2_b"] = jnp.zeros((D1,), jnp.float32)
    # patch merge 2x2 -> D2.
    # TODO(synk): rows assumed (dh, dw, channel)-major; verify against the
    # reference FocalNet merge ordering (Swin-style merges may differ).
    p["pm_w"] = _trunc_normal(ks[3], (4 * D1, D2))
    p["pm_b"] = jnp.zeros((D2,), jnp.float32)
    p["ln2_g"] = jnp.ones((D2,), jnp.float32)
    p["ln2_b"] = jnp.zeros((D2,), jnp.float32)
    # CTC decoder classifier
    p["cls_w"] = _trunc_normal(ks[4], (D2, NUM_CLASSES))
    p["cls_b"] = jnp.zeros((NUM_CLASSES,), jnp.float32)
    return p


# ---------------------------------------------------------------------------
# Packing helpers (wrapper side)
# ---------------------------------------------------------------------------
def _pack_weights(p):
    """One bf16 [W_ROWS, 128] slab holding all 5 matmul weights."""
    w = jnp.zeros((W_ROWS, LANE), jnp.float32)
    w = w.at[O_PE:O_PE + K1, 0:D1].set(p["pe_w"])
    w = w.at[O_FC1:O_FC1 + D1, 0:MLP_HIDDEN].set(p["fc1_w"])
    w = w.at[O_FC2:O_FC2 + MLP_HIDDEN, 0:D1].set(p["fc2_w"])
    w = w.at[O_PM:O_PM + 4 * D1, 0:D2].set(p["pm_w"])
    w = w.at[O_CLS:O_CLS + D2, 0:NUM_CLASSES].set(p["cls_w"])
    return w.astype(jnp.bfloat16)


def _pack_vectors(p):
    """One f32 [16, 128] slab holding every bias / LayerNorm vector."""
    v = jnp.zeros((V_ROWS, LANE), jnp.float32)
    v = v.at[0, :D1].set(p["pe_b"])
    v = v.at[1, :D1].set(p["ln0_g"])
    v = v.at[2, :D1].set(p["ln0_b"])
    v = v.at[3, :D1].set(p["ln1_g"])
    v = v.at[4, :D1].set(p["ln1_b"])
    v = v.at[5, :MLP_HIDDEN].set(p["fc1_b"])
    v = v.at[6, :D1].set(p["fc2_b"])
    v = v.at[7, :D2].set(p["pm_b"])
    v = v.at[8, :D2].set(p["ln2_g"])
    v = v.at[9, :D2].set(p["ln2_b"])
    v = v.at[10, :NUM_CLASSES].set(p["cls_b"])
    return v


def _pick_tb(B, W2, R1):
    """Largest batch block with >=2 programs and (16,128)-aligned row blocks."""
    for tb in range(B // 2, 0, -1):
        if B % tb == 0 and (tb * W2) % 16 == 0 and (tb * R1) % 16 == 0:
            return tb, jnp.bfloat16
    for tb in range(B // 2, 0, -1):
        if B % tb == 0 and (tb * W2) % 8 == 0 and (tb * R1) % 16 == 0:
            return tb, jnp.float32
    return B, jnp.bfloat16   # single program: blocks == full arrays (always legal)


# ---------------------------------------------------------------------------
# Model forward
# ---------------------------------------------------------------------------
def ctc_model_forward(params, x, mask):
    """x: [B, C, H, W] f32 (NCHW), mask: [B, H, W] f32.  Returns dict like the
    PyTorch module: {'logits': [B, T, num_classes], 'char_masks': [B, T]}."""
    B, C, H, W = x.shape
    assert C == IN_CH and H % (2 * PATCH) == 0 and W % (2 * PATCH) == 0
    H1, W1 = H // PATCH, W // PATCH
    H2, W2 = H1 // 2, W1 // 2
    R1, R2 = H1 * W1, H2 * W2
    TB, out_dtype = _pick_tb(B, W2, R1)
    T = B // TB

    # im2col for the patch-embed conv, with rows ordered (tile, quadrant,
    # height, batch-in-tile, width) so that the 2x2 merge and the height
    # pooling become contiguous static slices inside the kernel.
    # TODO(synk): for large images fold this im2col into the kernel (reads
    # raw NCHW per tile); here it is a single wrapper transpose in bf16.
    p = x.reshape(B, C, H1, PATCH, W1, PATCH)
    p = jnp.transpose(p, (0, 2, 4, 1, 3, 5)).reshape(B, H1, W1, K1)  # (c,ph,pw) cols
    p = p.reshape(T, TB, H2, 2, W2, 2, K1)
    p = jnp.transpose(p, (0, 3, 5, 2, 1, 4, 6))       # [T, dh, dw, H2, TB, W2, K1]
    patches = p.reshape(B * R1, K1).astype(jnp.bfloat16)

    w_pack = _pack_weights(params)                    # bf16 [224, 128]
    v_pack = _pack_vectors(params)                    # f32  [16, 128]

    m_rows = TB * R1                                  # matmul M per program
    q_rows = TB * R2                                  # rows per merge quadrant
    p_rows = TB * W2                                  # rows after height pooling

    def kernel(x_ref, w_ref, v_ref, o_ref):
        def mm(a, w):
            # bf16 MXU operands (weights pre-cast in the wrapper), f32 accumulate.
            return jnp.dot(a.astype(jnp.bfloat16), w,
                           preferred_element_type=jnp.float32)

        def ln(t, g, b):
            mu = jnp.mean(t, axis=-1, keepdims=True)
            var = jnp.mean((t - mu) ** 2, axis=-1, keepdims=True)
            return (t - mu) * jax.lax.rsqrt(var + 1e-5) * g + b

        x_blk = x_ref[...]                                        # [TB*R1, K1] bf16

        # patch embed (4x4 / stride-4 conv as matmul) + LN
        h = mm(x_blk, w_ref[O_PE:O_PE + K1, 0:D1]) + v_ref[0:1, 0:D1]
        h = ln(h, v_ref[1:2, 0:D1], v_ref[2:3, 0:D1])             # [TB*R1, D1]

        # residual MLP block (LN -> fc1 -> GELU -> fc2 -> add)
        y = ln(h, v_ref[3:4, 0:D1], v_ref[4:5, 0:D1])
        y = mm(y, w_ref[O_FC1:O_FC1 + D1, 0:MLP_HIDDEN]) + v_ref[5:6, 0:MLP_HIDDEN]
        # TODO(synk): torch nn.GELU defaults to exact erf; tanh approximation here.
        y = jax.nn.gelu(y)
        y = mm(y, w_ref[O_FC2:O_FC2 + MLP_HIDDEN, 0:D1]) + v_ref[6:7, 0:D1]
        h = h + y                                                 # [TB*R1, D1]

        # 2x2 / stride-2 patch merge: quadrant q occupies the contiguous row
        # slice [q*q_rows, (q+1)*q_rows) (no selection matrices, no gather).
        h2 = mm(h[0 * q_rows:1 * q_rows], w_ref[O_PM + 0 * D1:O_PM + 1 * D1, 0:D2])
        h2 = h2 + mm(h[1 * q_rows:2 * q_rows], w_ref[O_PM + 1 * D1:O_PM + 2 * D1, 0:D2])
        h2 = h2 + mm(h[2 * q_rows:3 * q_rows], w_ref[O_PM + 2 * D1:O_PM + 3 * D1, 0:D2])
        h2 = h2 + mm(h[3 * q_rows:4 * q_rows], w_ref[O_PM + 3 * D1:O_PM + 4 * D1, 0:D2])
        h2 = h2 + v_ref[7:8, 0:D2]
        h2 = ln(h2, v_ref[8:9, 0:D2], v_ref[9:10, 0:D2])          # [TB*R2, D2]

        # collapse height (mean) via static-slice VPU adds; h2 rows are
        # ordered (height, batch, width) so each height is one contiguous slice.
        # TODO(synk): unmasked mean over height (reference may use masked pooling).
        feat = h2[0:p_rows]
        for hh in range(1, H2):
            feat = feat + h2[hh * p_rows:(hh + 1) * p_rows]
        feat = feat * (1.0 / H2)                                  # [TB*W2, D2]

        # classifier, lane-padded to 128 output columns (unmasked store).
        logits = mm(feat, w_ref[O_CLS:O_CLS + D2, 0:LANE]) + v_ref[10:11, 0:LANE]
        o_ref[...] = logits.astype(o_ref.dtype)

    logits_flat = pl.pallas_call(
        kernel,
        out_shape=jax.ShapeDtypeStruct((B * W2, LANE), out_dtype),
        grid_spec=pltpu.PrefetchScalarGridSpec(
            num_scalar_prefetch=0,
            grid=(T,),
            in_specs=[
                pl.BlockSpec((m_rows, K1), lambda t: (t, 0)),     # patches
                pl.BlockSpec((W_ROWS, LANE), lambda t: (0, 0)),   # packed weights
                pl.BlockSpec((V_ROWS, LANE), lambda t: (0, 0)),   # packed vectors
            ],
            out_specs=pl.BlockSpec((p_rows, LANE), lambda t: (t, 0)),
        ),
        compiler_params=pltpu.CompilerParams(
            dimension_semantics=("parallel",)),   # batch tiles shard across v7x TCs
    )(patches, w_pack, v_pack)

    logits = logits_flat.reshape(B, W2, LANE)[:, :, :NUM_CLASSES].astype(jnp.float32)

    # mask downsampling (/4 then /2 spatial reduction), top-left sampling.
    # TODO(synk): if the reference encoder pools the mask over each patch
    # window instead of sampling, char_masks can differ on partial patches.
    m = mask[:, ::PATCH, ::PATCH][:, ::2, ::2]                    # [B, H2, W2]
    char_masks = jnp.max(m, axis=1)                               # [B, T]

    # update_with_loss(labels=None) -> returns ret unchanged
    return {"logits": logits, "char_masks": char_masks}


# ---------------------------------------------------------------------------
if __name__ == "__main__":
    key = jax.random.PRNGKey(0)
    pkey, xkey = jax.random.split(key)
    params = init_params(pkey)

    B, H, W = 4, 32, 64
    x = jax.random.normal(xkey, (B, IN_CH, H, W), jnp.float32)
    mask = jnp.ones((B, H, W), jnp.float32)

    fwd = jax.jit(ctc_model_forward)
    out = fwd(params, x, mask)
    jax.block_until_ready(out)

    T = W // PATCH // 2
    assert out["logits"].shape == (B, T, NUM_CLASSES)
    assert out["char_masks"].shape == (B, T)
    assert bool(jnp.all(jnp.isfinite(out["logits"])))
    print("KERNEL_OK")
</pallas_src>

<mosaic_0001>
module attributes {stable_mosaic.version = 11 : i64} {
  func.func @kernel(%arg0: i32, %arg1: memref<256x48xbf16, #tpu.memory_space<vmem>>, %arg2: memref<224x128xbf16, #tpu.memory_space<vmem>>, %arg3: memref<16x128xf32, #tpu.memory_space<vmem>>, %arg4: memref<16x128xbf16, #tpu.memory_space<vmem>>) attributes {dimension_semantics = [#tpu.dimension_semantics<parallel>], iteration_bounds = array<i64: 2>, scalar_prefetch = 0 : i64, scratch_operands = 0 : i64, tpu.core_type = #tpu.core_type<tc>, window_params = [{transform_indices = @transform_0, window_bounds = array<i64: 256, 48>}, {pipeline_mode = #tpu.pipeline_mode<synchronous>, transform_indices = @transform_1, window_bounds = array<i64: 224, 128>}, {pipeline_mode = #tpu.pipeline_mode<synchronous>, transform_indices = @transform_2, window_bounds = array<i64: 16, 128>}, {transform_indices = @transform_3, window_bounds = array<i64: 16, 128>}]} {
    %c0 = arith.constant 0 : index
    %c0_0 = arith.constant 0 : index
    %0 = vector.load %arg1[%c0, %c0_0] : memref<256x48xbf16, #tpu.memory_space<vmem>>, vector<256x48xbf16>
    %c0_1 = arith.constant 0 : index
    %c0_2 = arith.constant 0 : index
    %1 = vector.load %arg2[%c0_1, %c0_2] : memref<224x128xbf16, #tpu.memory_space<vmem>>, vector<48x16xbf16>
    %cst = arith.constant dense<0.000000e+00> : vector<256x16xf32>
    %2 = tpu.matmul %0, %1, %cst {dimension_numbers = #tpu.dot_dimension_numbers<[1], [0], [0], [1], [0, 0, 1, 1], [], []>} : vector<256x48xbf16>, vector<48x16xbf16>, vector<256x16xf32> -> vector<256x16xf32>
    %c0_3 = arith.constant 0 : index
    %c0_4 = arith.constant 0 : index
    %3 = vector.load %arg3[%c0_3, %c0_4] : memref<16x128xf32, #tpu.memory_space<vmem>>, vector<1x16xf32>
    %4 = vector.broadcast %3 : vector<1x16xf32> to vector<256x16xf32>
    %5 = arith.addf %2, %4 : vector<256x16xf32>
    %c1 = arith.constant 1 : index
    %c0_5 = arith.constant 0 : index
    %6 = vector.load %arg3[%c1, %c0_5] : memref<16x128xf32, #tpu.memory_space<vmem>>, vector<1x16xf32>
    %c2 = arith.constant 2 : index
    %c0_6 = arith.constant 0 : index
    %7 = vector.load %arg3[%c2, %c0_6] : memref<16x128xf32, #tpu.memory_space<vmem>>, vector<1x16xf32>
    %cst_7 = arith.constant dense<0.000000e+00> : vector<256xf32>
    %8 = vector.multi_reduction <add>, %5, %cst_7 [1] : vector<256x16xf32> to vector<256xf32>
    %9 = vector.shape_cast %8 : vector<256xf32> to vector<256x1xf32>
    %cst_8 = arith.constant 1.600000e+01 : f32
    %10 = vector.broadcast %cst_8 : f32 to vector<256x1xf32>
    %11 = arith.divf %9, %10 : vector<256x1xf32>
    %12 = vector.broadcast %11 : vector<256x1xf32> to vector<256x16xf32>
    %13 = arith.subf %5, %12 : vector<256x16xf32>
    %14 = arith.mulf %13, %13 : vector<256x16xf32>
    %cst_9 = arith.constant dense<0.000000e+00> : vector<256xf32>
    %15 = vector.multi_reduction <add>, %14, %cst_9 [1] : vector<256x16xf32> to vector<256xf32>
    %16 = vector.shape_cast %15 : vector<256xf32> to vector<256x1xf32>
    %cst_10 = arith.constant 1.600000e+01 : f32
    %17 = vector.broadcast %cst_10 : f32 to vector<256x1xf32>
    %18 = arith.divf %16, %17 : vector<256x1xf32>
    %19 = vector.broadcast %11 : vector<256x1xf32> to vector<256x16xf32>
    %20 = arith.subf %5, %19 : vector<256x16xf32>
    %cst_11 = arith.constant 9.99999974E-6 : f32
    %21 = vector.broadcast %cst_11 : f32 to vector<256x1xf32>
    %22 = arith.addf %18, %21 : vector<256x1xf32>
    %23 = math.rsqrt %22 : vector<256x1xf32>
    %24 = vector.broadcast %23 : vector<256x1xf32> to vector<256x16xf32>
    %25 = arith.mulf %20, %24 : vector<256x16xf32>
    %26 = vector.broadcast %6 : vector<1x16xf32> to vector<256x16xf32>
    %27 = arith.mulf %25, %26 : vector<256x16xf32>
    %28 = vector.broadcast %7 : vector<1x16xf32> to vector<256x16xf32>
    %29 = arith.addf %27, %28 : vector<256x16xf32>
    %c3 = arith.constant 3 : index
    %c0_12 = arith.constant 0 : index
    %30 = vector.load %arg3[%c3, %c0_12] : memref<16x128xf32, #tpu.memory_space<vmem>>, vector<1x16xf32>
    %c4 = arith.constant 4 : index
    %c0_13 = arith.constant 0 : index
    %31 = vector.load %arg3[%c4, %c0_13] : memref<16x128xf32, #tpu.memory_space<vmem>>, vector<1x16xf32>
    %cst_14 = arith.constant dense<0.000000e+00> : vector<256xf32>
    %32 = vector.multi_reduction <add>, %29, %cst_14 [1] : vector<256x16xf32> to vector<256xf32>
    %33 = vector.shape_cast %32 : vector<256xf32> to vector<256x1xf32>
    %cst_15 = arith.constant 1.600000e+01 : f32
    %34 = vector.broadcast %cst_15 : f32 to vector<256x1xf32>
    %35 = arith.divf %33, %34 : vector<256x1xf32>
    %36 = vector.broadcast %35 : vector<256x1xf32> to vector<256x16xf32>
    %37 = arith.subf %29, %36 : vector<256x16xf32>
    %38 = arith.mulf %37, %37 : vector<256x16xf32>
    %cst_16 = arith.constant dense<0.000000e+00> : vector<256xf32>
    %39 = vector.multi_reduction <add>, %38, %cst_16 [1] : vector<256x16xf32> to vector<256xf32>
    %40 = vector.shape_cast %39 : vector<256xf32> to vector<256x1xf32>
    %cst_17 = arith.constant 1.600000e+01 : f32
    %41 = vector.broadcast %cst_17 : f32 to vector<256x1xf32>
    %42 = arith.divf %40, %41 : vector<256x1xf32>
    %43 = vector.broadcast %35 : vector<256x1xf32> to vector<256x16xf32>
    %44 = arith.subf %29, %43 : vector<256x16xf32>
    %cst_18 = arith.constant 9.99999974E-6 : f32
    %45 = vector.broadcast %cst_18 : f32 to vector<256x1xf32>
    %46 = arith.addf %42, %45 : vector<256x1xf32>
    %47 = math.rsqrt %46 : vector<256x1xf32>
    %48 = vector.broadcast %47 : vector<256x1xf32> to vector<256x16xf32>
    %49 = arith.mulf %44, %48 : vector<256x16xf32>
    %50 = vector.broadcast %30 : vector<1x16xf32> to vector<256x16xf32>
    %51 = arith.mulf %49, %50 : vector<256x16xf32>
    %52 = vector.broadcast %31 : vector<1x16xf32> to vector<256x16xf32>
    %53 = arith.addf %51, %52 : vector<256x16xf32>
    %c48 = arith.constant 48 : index
    %c0_19 = arith.constant 0 : index
    %54 = vector.load %arg2[%c48, %c0_19] : memref<224x128xbf16, #tpu.memory_space<vmem>>, vector<16x64xbf16>
    %55 = arith.truncf %53 : vector<256x16xf32> to vector<256x16xbf16>
    %cst_20 = arith.constant dense<0.000000e+00> : vector<256x64xf32>
    %56 = tpu.matmul %55, %54, %cst_20 {dimension_numbers = #tpu.dot_dimension_numbers<[1], [0], [0], [1], [0, 0, 1, 1], [], []>} : vector<256x16xbf16>, vector<16x64xbf16>, vector<256x64xf32> -> vector<256x64xf32>
    %c5 = arith.constant 5 : index
    %c0_21 = arith.constant 0 : index
    %57 = vector.load %arg3[%c5, %c0_21] : memref<16x128xf32, #tpu.memory_space<vmem>>, vector<1x64xf32>
    %58 = vector.broadcast %57 : vector<1x64xf32> to vector<256x64xf32>
    %59 = arith.addf %56, %58 : vector<256x64xf32>
    %60 = arith.mulf %59, %59 : vector<256x64xf32>
    %61 = arith.mulf %59, %60 : vector<256x64xf32>
    %cst_22 = arith.constant 4.471500e-02 : f32
    %62 = vector.broadcast %cst_22 : f32 to vector<256x64xf32>
    %63 = arith.mulf %62, %61 : vector<256x64xf32>
    %64 = arith.addf %59, %63 : vector<256x64xf32>
    %cst_23 = arith.constant 0.797884583 : f32
    %65 = vector.broadcast %cst_23 : f32 to vector<256x64xf32>
    %66 = arith.mulf %65, %64 : vector<256x64xf32>
    %67 = math.tanh %66 : vector<256x64xf32>
    %cst_24 = arith.constant 1.000000e+00 : f32
    %68 = vector.broadcast %cst_24 : f32 to vector<256x64xf32>
    %69 = arith.addf %68, %67 : vector<256x64xf32>
    %cst_25 = arith.constant 5.000000e-01 : f32
    %70 = vector.broadcast %cst_25 : f32 to vector<256x64xf32>
    %71 = arith.mulf %70, %69 : vector<256x64xf32>
    %72 = arith.mulf %59, %71 : vector<256x64xf32>
    %c64 = arith.constant 64 : index
    %c0_26 = arith.constant 0 : index
    %73 = vector.load %arg2[%c64, %c0_26] : memref<224x128xbf16, #tpu.memory_space<vmem>>, vector<64x16xbf16>
    %74 = arith.truncf %72 : vector<256x64xf32> to vector<256x64xbf16>
    %cst_27 = arith.constant dense<0.000000e+00> : vector<256x16xf32>
    %75 = tpu.matmul %74, %73, %cst_27 {dimension_numbers = #tpu.dot_dimension_numbers<[1], [0], [0], [1], [0, 0, 1, 1], [], []>} : vector<256x64xbf16>, vector<64x16xbf16>, vector<256x16xf32> -> vector<256x16xf32>
    %c6 = arith.constant 6 : index
    %c0_28 = arith.constant 0 : index
    %76 = vector.load %arg3[%c6, %c0_28] : memref<16x128xf32, #tpu.memory_space<vmem>>, vector<1x16xf32>
    %77 = vector.broadcast %76 : vector<1x16xf32> to vector<256x16xf32>
    %78 = arith.addf %75, %77 : vector<256x16xf32>
    %79 = arith.addf %29, %78 : vector<256x16xf32>
    %80 = vector.extract_strided_slice %79 {offsets = [0, 0], sizes = [64, 16], strides = [1, 1]} : vector<256x16xf32> to vector<64x16xf32>
    %c128 = arith.constant 128 : index
    %c0_29 = arith.constant 0 : index
    %81 = vector.load %arg2[%c128, %c0_29] : memref<224x128xbf16, #tpu.memory_space<vmem>>, vector<16x32xbf16>
    %82 = arith.truncf %80 : vector<64x16xf32> to vector<64x16xbf16>
    %cst_30 = arith.constant dense<0.000000e+00> : vector<64x32xf32>
    %83 = tpu.matmul %82, %81, %cst_30 {dimension_numbers = #tpu.dot_dimension_numbers<[1], [0], [0], [1], [0, 0, 1, 1], [], []>} : vector<64x16xbf16>, vector<16x32xbf16>, vector<64x32xf32> -> vector<64x32xf32>
    %84 = vector.extract_strided_slice %79 {offsets = [64, 0], sizes = [64, 16], strides = [1, 1]} : vector<256x16xf32> to vector<64x16xf32>
    %c144 = arith.constant 144 : index
    %c0_31 = arith.constant 0 : index
    %85 = vector.load %arg2[%c144, %c0_31] : memref<224x128xbf16, #tpu.memory_space<vmem>>, vector<16x32xbf16>
    %86 = arith.truncf %84 : vector<64x16xf32> to vector<64x16xbf16>
    %cst_32 = arith.constant dense<0.000000e+00> : vector<64x32xf32>
    %87 = tpu.matmul %86, %85, %cst_32 {dimension_numbers = #tpu.dot_dimension_numbers<[1], [0], [0], [1], [0, 0, 1, 1], [], []>} : vector<64x16xbf16>, vector<16x32xbf16>, vector<64x32xf32> -> vector<64x32xf32>
    %88 = arith.addf %83, %87 : vector<64x32xf32>
    %89 = vector.extract_strided_slice %79 {offsets = [128, 0], sizes = [64, 16], strides = [1, 1]} : vector<256x16xf32> to vector<64x16xf32>
    %c160 = arith.constant 160 : index
    %c0_33 = arith.constant 0 : index
    %90 = vector.load %arg2[%c160, %c0_33] : memref<224x128xbf16, #tpu.memory_space<vmem>>, vector<16x32xbf16>
    %91 = arith.truncf %89 : vector<64x16xf32> to vector<64x16xbf16>
    %cst_34 = arith.constant dense<0.000000e+00> : vector<64x32xf32>
    %92 = tpu.matmul %91, %90, %cst_34 {dimension_numbers = #tpu.dot_dimension_numbers<[1], [0], [0], [1], [0, 0, 1, 1], [], []>} : vector<64x16xbf16>, vector<16x32xbf16>, vector<64x32xf32> -> vector<64x32xf32>
    %93 = arith.addf %88, %92 : vector<64x32xf32>
    %94 = vector.extract_strided_slice %79 {offsets = [192, 0], sizes = [64, 16], strides = [1, 1]} : vector<256x16xf32> to vector<64x16xf32>
    %c176 = arith.constant 176 : index
    %c0_35 = arith.constant 0 : index
    %95 = vector.load %arg2[%c176, %c0_35] : memref<224x128xbf16, #tpu.memory_space<vmem>>, vector<16x32xbf16>
    %96 = arith.truncf %94 : vector<64x16xf32> to vector<64x16xbf16>
    %cst_36 = arith.constant dense<0.000000e+00> : vector<64x32xf32>
    %97 = tpu.matmul %96, %95, %cst_36 {dimension_numbers = #tpu.dot_dimension_numbers<[1], [0], [0], [1], [0, 0, 1, 1], [], []>} : vector<64x16xbf16>, vector<16x32xbf16>, vector<64x32xf32> -> vector<64x32xf32>
    %98 = arith.addf %93, %97 : vector<64x32xf32>
    %c7 = arith.constant 7 : index
    %c0_37 = arith.constant 0 : index
    %99 = vector.load %arg3[%c7, %c0_37] : memref<16x128xf32, #tpu.memory_space<vmem>>, vector<1x32xf32>
    %100 = vector.broadcast %99 : vector<1x32xf32> to vector<64x32xf32>
    %101 = arith.addf %98, %100 : vector<64x32xf32>
    %c8 = arith.constant 8 : index
    %c0_38 = arith.constant 0 : index
    %102 = vector.load %arg3[%c8, %c0_38] : memref<16x128xf32, #tpu.memory_space<vmem>>, vector<1x32xf32>
    %c9 = arith.constant 9 : index
    %c0_39 = arith.constant 0 : index
    %103 = vector.load %arg3[%c9, %c0_39] : memref<16x128xf32, #tpu.memory_space<vmem>>, vector<1x32xf32>
    %cst_40 = arith.constant dense<0.000000e+00> : vector<64xf32>
    %104 = vector.multi_reduction <add>, %101, %cst_40 [1] : vector<64x32xf32> to vector<64xf32>
    %105 = vector.shape_cast %104 : vector<64xf32> to vector<64x1xf32>
    %cst_41 = arith.constant 3.200000e+01 : f32
    %106 = vector.broadcast %cst_41 : f32 to vector<64x1xf32>
    %107 = arith.divf %105, %106 : vector<64x1xf32>
    %108 = vector.broadcast %107 : vector<64x1xf32> to vector<64x32xf32>
    %109 = arith.subf %101, %108 : vector<64x32xf32>
    %110 = arith.mulf %109, %109 : vector<64x32xf32>
    %cst_42 = arith.constant dense<0.000000e+00> : vector<64xf32>
    %111 = vector.multi_reduction <add>, %110, %cst_42 [1] : vector<64x32xf32> to vector<64xf32>
    %112 = vector.shape_cast %111 : vector<64xf32> to vector<64x1xf32>
    %cst_43 = arith.constant 3.200000e+01 : f32
    %113 = vector.broadcast %cst_43 : f32 to vector<64x1xf32>
    %114 = arith.divf %112, %113 : vector<64x1xf32>
    %115 = vector.broadcast %107 : vector<64x1xf32> to vector<64x32xf32>
    %116 = arith.subf %101, %115 : vector<64x32xf32>
    %cst_44 = arith.constant 9.99999974E-6 : f32
    %117 = vector.broadcast %cst_44 : f32 to vector<64x1xf32>
    %118 = arith.addf %114, %117 : vector<64x1xf32>
    %119 = math.rsqrt %118 : vector<64x1xf32>
    %120 = vector.broadcast %119 : vector<64x1xf32> to vector<64x32xf32>
    %121 = arith.mulf %116, %120 : vector<64x32xf32>
    %122 = vector.broadcast %102 : vector<1x32xf32> to vector<64x32xf32>
    %123 = arith.mulf %121, %122 : vector<64x32xf32>
    %124 = vector.broadcast %103 : vector<1x32xf32> to vector<64x32xf32>
    %125 = arith.addf %123, %124 : vector<64x32xf32>
    %126 = vector.extract_strided_slice %125 {offsets = [0, 0], sizes = [16, 32], strides = [1, 1]} : vector<64x32xf32> to vector<16x32xf32>
    %127 = vector.extract_strided_slice %125 {offsets = [16, 0], sizes = [16, 32], strides = [1, 1]} : vector<64x32xf32> to vector<16x32xf32>
    %128 = arith.addf %126, %127 : vector<16x32xf32>
    %129 = vector.extract_strided_slice %125 {offsets = [32, 0], sizes = [16, 32], strides = [1, 1]} : vector<64x32xf32> to vector<16x32xf32>
    %130 = arith.addf %128, %129 : vector<16x32xf32>
    %131 = vector.extract_strided_slice %125 {offsets = [48, 0], sizes = [16, 32], strides = [1, 1]} : vector<64x32xf32> to vector<16x32xf32>
    %132 = arith.addf %130, %131 : vector<16x32xf32>
    %cst_45 = arith.constant 2.500000e-01 : f32
    %133 = vector.broadcast %cst_45 : f32 to vector<16x32xf32>
    %134 = arith.mulf %132, %133 : vector<16x32xf32>
    %c192 = arith.constant 192 : index
    %c0_46 = arith.constant 0 : index
    %135 = vector.load %arg2[%c192, %c0_46] : memref<224x128xbf16, #tpu.memory_space<vmem>>, vector<32x128xbf16>
    %136 = arith.truncf %134 : vector<16x32xf32> to vector<16x32xbf16>
    %cst_47 = arith.constant dense<0.000000e+00> : vector<16x128xf32>
    %137 = tpu.matmul %136, %135, %cst_47 {dimension_numbers = #tpu.dot_dimension_numbers<[1], [0], [0], [1], [0, 0, 1, 1], [], []>} : vector<16x32xbf16>, vector<32x128xbf16>, vector<16x128xf32> -> vector<16x128xf32>
    %c10 = arith.constant 10 : index
    %c0_48 = arith.constant 0 : index
    %138 = vector.load %arg3[%c10, %c0_48] : memref<16x128xf32, #tpu.memory_space<vmem>>, vector<1x128xf32>
    %139 = vector.broadcast %138 : vector<1x128xf32> to vector<16x128xf32>
    %140 = arith.addf %137, %139 : vector<16x128xf32>
    %141 = arith.truncf %140 : vector<16x128xf32> to vector<16x128xbf16>
    %c0_49 = arith.constant 0 : index
    %c0_50 = arith.constant 0 : index
    %142 = vector.load %arg4[%c0_49, %c0_50] : memref<16x128xbf16, #tpu.memory_space<vmem>>, vector<16x128xbf16>
    tpu.vector_store %arg4[%c0_49, %c0_50], %141 {strides = array<i32>} : memref<16x128xbf16, #tpu.memory_space<vmem>>, vector<16x128xbf16>,
    return
  }
  func.func @transform_0(%arg0: i32) -> (i32, i32) {
    %c0_i32 = arith.constant 0 : i32
    %c0_i32_0 = arith.constant 0 : i32
    return %arg0, %c0_i32 : i32, i32
  }
  func.func @transform_1(%arg0: i32) -> (i32, i32) {
    %c0_i32 = arith.constant 0 : i32
    %c0_i32_0 = arith.constant 0 : i32
    %c0_i32_1 = arith.constant 0 : i32
    return %c0_i32, %c0_i32_0 : i32, i32
  }
  func.func @transform_2(%arg0: i32) -> (i32, i32) {
    %c0_i32 = arith.constant 0 : i32
    %c0_i32_0 = arith.constant 0 : i32
    %c0_i32_1 = arith.constant 0 : i32
    return %c0_i32, %c0_i32_0 : i32, i32
  }
  func.func @transform_3(%arg0: i32) -> (i32, i32) {
    %c0_i32 = arith.constant 0 : i32
    %c0_i32_0 = arith.constant 0 : i32
    return %arg0, %c0_i32 : i32, i32
  }
}

</mosaic_0001>

<bundles_post_ra>
// kernel: ctc_model_forward.1
= control target key start
LH: loop header
LB: loop body
LE: loop exit
PB: predicated region body
PF: predicated region fallthrough
CT: control target
= control target key end

     0   :  { %s3629_s12 = smov 0   ;;  %s5075_s0 = inlined_call_operand.vmem [shape: bf16[512,48], index: 0, kind: input, shape index: {}]   ;;  %s5076_s1 = inlined_call_operand.vmem [shape: bf16[224,128], index: 1, kind: input, shape index: {}]   ;;  %s5077_s2 = inlined_call_operand.vmem [shape: f32[16,128], index: 2, kind: input, shape index: {}]   ;;  %s5078_s3 = inlined_call_operand.vmem [shape: bf16[32,128], index: 3, kind: output, shape index: {}]  }
   0x1 LB: > { %s2986_s13 = sadd.s32 4294967295, %s3605_s12   ;;  %p2990_p0 = scmp.ge.s32.totalorder %s3605_s12, 1  ;;  %s3605_s12 = sphi %s3629_s12, %s13_s12  }
   0x2   : > { %p138_p1 = scmp.lt.s32.totalorder %s3605_s12, 3 }
   0x4   : > { %p139_p2 = pnand %p2990_p0, %p138_p1 }
   0x6   : > { %142 = sbr.rel (%p139_p2) target bundleno = 2090 (0x82a), region = 32 }
   0xb   : > { %v3361_v0 = vld [vmem:[%s5076_s1 + $0x10] sm:$0xff]   ;;  %s2991_s16 = sshll.u32 %s2986_s13, 5  ;;  %v3362_v1 = vld [vmem:[%s5076_s1 + $0x8] sm:$0xff]   ;;  %v3363_v2 = vld [vmem:[%s5076_s1] sm:$0xff]   ;;  %vm316_vm0 = vcmask 392192   ;;  %vm528_vm1 = vcmask 130048  }
   0xc   : > { %p163_p3 = scmp.lt.s32.totalorder %s2991_s16, 63  ;;  %3191 = vmatprep.subr.bf16.mxu0 %v3361_v0  ;;  %v3688_v19 = vld [vmem:[%s5077_s2] ss:$0 sm:$0xff]  ;;  %vm2087_vm2 = vcmask 523264   ;;  %vm2716_vm3 = vcmask 261120   ;;  %vm3608_vm4 = vmmov 0  }
   0xd   : > { %3192 = vmatpush3.bf16.msra.mxu0 %v3361_v0  ;;  %s2993_s17 = sshll.u32 %s2986_s13, 1 }
   0xe   : > { %s5143_s16 = smov (!%p163_p3, %s2991_s16), 63  ;;  %3193 = vmatprep.subr.bf16.mxu0 %v3362_v1  ;;  %p169_p4 = scmp.lt.s32.totalorder %s2993_s17, 3 }
   0xf   : > { %s2992_s21 = sshll.u32 %s5143_s16, 2 }
  0x10   : > { %s3651_s24 = scalar_lea.vmem %s5075_s0, %s2992_s21  ;;  %s5145_s17 = smov (!%p169_p4, %s2993_s17), 3 }
  0x11   : > { %3194 = vmatpush3.bf16.msra.mxu0 %v3362_v1  ;;  %v3364_v3 = vld [vmem:[%s3651_s24] sm:$0xff]   ;;  %v3365_v4 = vld [vmem:[%s3651_s24 + $0x8] sm:$0xff]   ;;  %v3366_v5 = vld [vmem:[%s3651_s24 + $0x10] sm:$0xff]   ;;  %s2994_s20 = sshll.u32 %s5145_s17, 2 }
  0x12   : > { %3195 = vmatprep.subr.bf16.mxu0 %v3363_v2  ;;  %3197 = vmatprep.mubr.msk.bf16.mxu0 %vm316_vm0, %v3364_v3  ;;  %v3367_v6 = vld [vmem:[%s3651_s24 + $0x18] sm:$0xff]   ;;  %v3368_v7 = vld [vmem:[%s3651_s24 + $0x20] sm:$0xff]   ;;  %v3369_v8 = vld [vmem:[%s3651_s24 + $0x28] sm:$0xff]   ;;  %s172_s23 = scalar_lea.vmem %s5078_s3, %s2994_s20 }
  0x13   : > { %v3370_v9 = vld [vmem:[%s3651_s24 + $0x30] sm:$0xff]   ;;  %v3371_v10 = vld [vmem:[%s3651_s24 + $0x38] sm:$0xff]   ;;  %v3372_v11 = vld [vmem:[%s3651_s24 + $0x40] sm:$0xff]  }
  0x14   : > { %v3373_v12 = vld [vmem:[%s3651_s24 + $0x48] sm:$0xff]   ;;  %v3374_v13 = vld [vmem:[%s3651_s24 + $0x50] sm:$0xff]   ;;  %v3375_v14 = vld [vmem:[%s3651_s24 + $0x58] sm:$0xff]  }
  0x15   : > { %3196 = vmatpush3.bf16.msra.mxu0 %v3363_v2  ;;  %v3376_v15 = vld [vmem:[%s3651_s24 + $0x60] sm:$0xff]   ;;  %v3377_v16 = vld [vmem:[%s3651_s24 + $0x68] sm:$0xff]   ;;  %v3378_v17 = vld [vmem:[%s3651_s24 + $0x70] sm:$0xff]  }
  0x16   : > { %v3379_v18 = vld [vmem:[%s3651_s24 + $0x78] sm:$0xff]  }
  0x18   : > { %3198 = vmatmul.mubr.msk.bf16.vlgmr.msra.gmra.mxu0 %vm316_vm0, %v3365_v4 }
  0x19   : > { %3201 = vmatprep.mubr.msk.bf16.mxu0 %vm316_vm0, %v3366_v5 }
  0x20   : > { %3202 = vmatmul.mubr.msk.bf16.gmra.mxu0 %vm316_vm0, %v3367_v6 }
  0x21   : > { %3205 = vmatprep.mubr.msk.bf16.mxu0 %vm316_vm0, %v3368_v7 }
  0x28   : > { %3206 = vmatmul.mubr.msk.bf16.gmra.mxu0 %vm316_vm0, %v3369_v8 }
  0x29   : > { %3209 = vmatprep.mubr.msk.bf16.mxu0 %vm316_vm0, %v3370_v9 }
  0x30   : > { %3210 = vmatmul.mubr.msk.bf16.gmra.mxu0 %vm316_vm0, %v3371_v10 }
  0x31   : > { %3213 = vmatprep.mubr.msk.bf16.mxu0 %vm316_vm0, %v3372_v11 }
  0x38   : > { %3214 = vmatmul.mubr.msk.bf16.gmra.mxu0 %vm316_vm0, %v3373_v12 }
  0x39   : > { %3217 = vmatprep.mubr.msk.bf16.mxu0 %vm316_vm0, %v3374_v13 }
  0x40   : > { %3218 = vmatmul.mubr.msk.bf16.gmra.mxu0 %vm316_vm0, %v3375_v14 }
  0x41   : > { %3221 = vmatprep.mubr.msk.bf16.mxu0 %vm316_vm0, %v3376_v15 }
  0x48   : > { %3222 = vmatmul.mubr.msk.bf16.gmra.mxu0 %vm316_vm0, %v3377_v16 }
  0x49   : > { %3225 = vmatprep.mubr.msk.bf16.mxu0 %vm316_vm0, %v3378_v17 }
  0x50   : > { %3226 = vmatmul.mubr.msk.bf16.gmra.mxu0 %vm316_vm0, %v3379_v18 }
  0xd8   : > { %v3199_v20 = vpop.f32.mrf.mxu0 }
  0xd9   : > { %v3691_v21 = vadd.f32 %v3199_v20, %v3688_v19 }
  0xda   : > { %v399_v22 = vpop.f32.mrf.mxu0 }
  0xdb   : > { %v3694_v23 = vadd.f32 %v3688_v19, %v399_v22  ;;  %v535_v24 = vsel %vm528_vm1, %v3691_v21, 0.0 }
  0xdc   : > { %536 = vadd.xlane.f32.xlu1 %v535_v24  ;;  %v3200_v25 = vpop.f32.mrf.mxu0 }
  0xdd   : > { %v3699_v26 = vadd.f32 %v3200_v25, %v3688_v19  ;;  %v529_v27 = vsel %vm528_vm1, %v3694_v23, 0.0 }
  0xde   : > { %v402_v28 = vpop.f32.mrf.mxu0  ;;  %530 = vadd.xlane.f32.xlu0 %v529_v27 }
  0xdf   : > { %v3704_v29 = vadd.f32 %v3688_v19, %v402_v28  ;;  %v538_v30 = vsel %vm528_vm1, %v3699_v26, 0.0 }
  0xe0   : > { %539 = vadd.xlane.f32.xlu1 %v538_v30  ;;  %v3203_v31 = vpop.f32.mrf.mxu0 }
  0xe1   : > { %v532_v32 = vsel %vm528_vm1, %v3704_v29, 0.0  ;;  %v3714_v36 = vadd.f32 %v3203_v31, %v3688_v19 }
  0xe2   : > { %v415_v33 = vpop.f32.mrf.mxu0  ;;  %533 = vadd.xlane.f32.xlu0 %v532_v32 }
  0xe3   : > { %v3711_v34 = vadd.f32 %v3688_v19, %v415_v33  ;;  %v547_v43 = vsel %vm528_vm1, %v3714_v36, 0.0 }
  0xe4   : > { %v3204_v35 = vpop.f32.mrf.mxu0 }
  0xe5   : > { %v541_v37 = vsel %vm528_vm1, %v3711_v34, 0.0  ;;  %v3722_v41 = vadd.f32 %v3204_v35, %v3688_v19 }
  0xe6   : > { %v418_v38 = vpop.f32.mrf.mxu0  ;;  %542 = vadd.xlane.f32.xlu0 %v541_v37 }
  0xe7   : > { %v3719_v39 = vadd.f32 %v3688_v19, %v418_v38  ;;  %v550_v48 = vsel %vm528_vm1, %v3722_v41, 0.0 }
  0xe8   : > { %v3207_v40 = vpop.f32.mrf.mxu0 }
  0xe9   : > { %v544_v42 = vsel %vm528_vm1, %v3719_v39, 0.0  ;;  %v3732_v47 = vadd.f32 %v3207_v40, %v3688_v19 }
  0xea   : > { %v431_v44 = vpop.f32.mrf.mxu0  ;;  %545 = vadd.xlane.f32.xlu1 %v544_v42  ;;  %548 = vadd.xlane.f32.xlu0 %v547_v43 }
  0xeb   : > { %v3729_v45 = vadd.f32 %v3688_v19, %v431_v44  ;;  %v559_v55 = vsel %vm528_vm1, %v3732_v47, 0.0 }
  0xec   : > { %v3208_v46 = vpop.f32.mrf.mxu0 }
  0xed   : > { %v553_v49 = vsel %vm528_vm1, %v3729_v45, 0.0  ;;  %v3742_v53 = vadd.f32 %v3208_v46, %v3688_v19 }
  0xee   : > { %v434_v50 = vpop.f32.mrf.mxu0  ;;  %551 = vadd.xlane.f32.xlu1 %v550_v48  ;;  %554 = vadd.xlane.f32.xlu0 %v553_v49 }
  0xef   : > { %v3739_v51 = vadd.f32 %v3688_v19, %v434_v50  ;;  %v562_v60 = vsel %vm528_vm1, %v3742_v53, 0.0 }
  0xf0   : > { %v3211_v52 = vpop.f32.mrf.mxu0 }
  0xf1   : > { %v556_v54 = vsel %vm528_vm1, %v3739_v51, 0.0  ;;  %v3752_v59 = vadd.f32 %v3211_v52, %v3688_v19 }
  0xf2   : > { %v447_v56 = vpop.f32.mrf.mxu0  ;;  %557 = vadd.xlane.f32.xlu1 %v556_v54  ;;  %560 = vadd.xlane.f32.xlu0 %v559_v55 }
  0xf3   : > { %v3749_v57 = vadd.f32 %v3688_v19, %v447_v56  ;;  %v571_v4 = vsel %vm528_vm1, %v3752_v59, 0.0 }
  0xf4   : > { %v3212_v58 = vpop.f32.mrf.mxu0 }
  0xf5   : > { %v565_v61 = vsel %vm528_vm1, %v3749_v57, 0.0  ;;  %v3762_v1 = vadd.f32 %v3212_v58, %v3688_v19 }
  0xf6   : > { %v450_v62 = vpop.f32.mrf.mxu0  ;;  %563 = vadd.xlane.f32.xlu1 %v562_v60  ;;  %566 = vadd.xlane.f32.xlu0 %v565_v61 }
  0xf7   : > { %v3759_v63 = vadd.f32 %v3688_v19, %v450_v62  ;;  %v574_v10 = vsel %vm528_vm1, %v3762_v1, 0.0 }
  0xf8   : > { %v3215_v0 = vpop.f32.mrf.mxu0 }
  0xf9   : > { %v3765_v2 = vadd.f32 %v3215_v0, %v3688_v19  ;;  %v568_v3 = vsel %vm528_vm1, %v3759_v63, 0.0 }
  0xfa   : > { %v463_v5 = vpop.f32.mrf.mxu0  ;;  %569 = vadd.xlane.f32.xlu1 %v568_v3  ;;  %572 = vadd.xlane.f32.xlu0 %v571_v4 }
  0xfb   : > { %v3772_v6 = vadd.f32 %v3688_v19, %v463_v5  ;;  %v583_v7 = vsel %vm528_vm1, %v3765_v2, 0.0 }
  0xfc   : > { %v3216_v8 = vpop.f32.mrf.mxu0 }
  0xfd   : > { %v3777_v9 = vadd.f32 %v3216_v8, %v3688_v19  ;;  %v577_v13 = vsel %vm528_vm1, %v3772_v6, 0.0 }
  0xfe   : > { %v466_v11 = vpop.f32.mrf.mxu0  ;;  %575 = vadd.xlane.f32.xlu1 %v574_v10  ;;  %584 = vadd.xlane.f32.xlu0 %v583_v7 }
  0xff   : > { %v586_v12 = vsel %vm528_vm1, %v3777_v9, 0.0  ;;  %v3786_v15 = vadd.f32 %v3688_v19, %v466_v11 }
 0x100   : > { %v3219_v14 = vpop.f32.mrf.mxu0 }
 0x101   : > { %v3789_v16 = vadd.f32 %v3219_v14, %v3688_v19  ;;  %v580_v25 = vsel %vm528_vm1, %v3786_v15, 0.0 }
 0x102   : > { %v479_v17 = vpop.f32.mrf.mxu0  ;;  %587 = vadd.xlane.f32.xlu1 %v586_v12  ;;  %578 = vadd.xlane.f32.xlu0 %v577_v13 }
 0x103   : > { %v3792_v18 = vadd.f32 %v3688_v19, %v479_v17  ;;  %v595_v20 = vsel %vm528_vm1, %v3789_v16, 0.0 }
 0x104   : > { %v3220_v22 = vpop.f32.mrf.mxu0 }
 0x105   : > { %v3797_v24 = vadd.f32 %v3220_v22, %v3688_v19  ;;  %v589_v30 = vsel %vm528_vm1, %v3792_v18, 0.0 }
 0x106   : > { %v482_v27 = vpop.f32.mrf.mxu0  ;;  %581 = vadd.xlane.f32.xlu1 %v580_v25  ;;  %596 = vadd.xlane.f32.xlu0 %v595_v20 }
 0x107   : > { %v598_v28 = vsel %vm528_vm1, %v3797_v24, 0.0  ;;  %v3806_v32 = vadd.f32 %v3688_v19, %v482_v27 }
 0x108   : > { %v3223_v31 = vpop.f32.mrf.mxu0 }
 0x109   : > { %v3809_v33 = vadd.f32 %v3223_v31, %v3688_v19  ;;  %v592_v43 = vsel %vm528_vm1, %v3806_v32, 0.0 }
 0x10a   : > { %v495_v35 = vpop.f32.mrf.mxu0  ;;  %599 = vadd.xlane.f32.xlu1 %v598_v28  ;;  %590 = vadd.xlane.f32.xlu0 %v589_v30 }
 0x10b   : > { %v3812_v37 = vadd.f32 %v3688_v19, %v495_v35  ;;  %v607_v38 = vsel %vm528_vm1, %v3809_v33, 0.0 }
 0x10c   : > { %v3224_v40 = vpop.f32.mrf.mxu0 }
 0x10d   : > { %v3817_v42 = vadd.f32 %v3224_v40, %v3688_v19  ;;  %v601_v48 = vsel %vm528_vm1, %v3812_v37, 0.0 }
 0x10e   : > { %v498_v44 = vpop.f32.mrf.mxu0  ;;  %593 = vadd.xlane.f32.xlu1 %v592_v43  ;;  %608 = vadd.xlane.f32.xlu0 %v607_v38 }
 0x10f   : > { %v610_v46 = vsel %vm528_vm1, %v3817_v42, 0.0  ;;  %v3826_v50 = vadd.f32 %v3688_v19, %v498_v44 }
 0x110   : > { %v3227_v49 = vpop.f32.mrf.mxu0 }
 0x111   : > { %v3829_v52 = vadd.f32 %v3227_v49, %v3688_v19  ;;  %v604_v61 = vsel %vm528_vm1, %v3826_v50, 0.0 }
 0x112   : > { %v511_v54 = vpop.f32.mrf.mxu0  ;;  %611 = vadd.xlane.f32.xlu1 %v610_v46  ;;  %602 = vadd.xlane.f32.xlu0 %v601_v48 }
 0x113   : > { %v3832_v55 = vadd.f32 %v3688_v19, %v511_v54  ;;  %v619_v56 = vsel %vm528_vm1, %v3829_v52, 0.0 }
 0x114   : > { %v3228_v58 = vpop.f32.mrf.mxu0 }
 0x115   : > { %v3837_v60 = vadd.f32 %v3228_v58, %v3688_v19  ;;  %v613_v3 = vsel %vm528_vm1, %v3832_v55, 0.0 }
 0x116   : > { %v514_v62 = vpop.f32.mrf.mxu0  ;;  %605 = vadd.xlane.f32.xlu1 %v604_v61  ;;  %620 = vadd.xlane.f32.xlu0 %v619_v56 }
 0x117   : > { %v622_v0 = vsel %vm528_vm1, %v3837_v60, 0.0  ;;  %v3846_v4 = vadd.f32 %v3688_v19, %v514_v62 }
 0x119   : > { %v616_v5 = vsel %vm528_vm1, %v3846_v4, 0.0 }
 0x11a   : > { %623 = vadd.xlane.f32.xlu1 %v622_v0  ;;  %614 = vadd.xlane.f32.xlu0 %v613_v3 }
 0x11e   : > { %617 = vadd.xlane.f32.xlu1 %v616_v5 }
 0x165   : > { %v537_v7 = vpop.xlane.xlu1 %536 }
 0x166   : > { %v628_v8 = vmul.f32 0.0625, %v537_v7 }
 0x167   : > { %v531_v10 = vpop.xlane.xlu0 %530 }
 0x168   : > { %v626_v11 = vmul.f32 0.0625, %v531_v10  ;;  %v3851_v13 = vsub.f32 %v3691_v21, %v628_v8 }
 0x169   : > { %v540_v12 = vpop.xlane.xlu1 %539 }
 0x16a   : > { %v3854_v14 = vsub.f32 %v3694_v23, %v626_v11  ;;  %v629_v17 = vmul.f32 0.0625, %v540_v12  ;;  %v692_v21 = vmul.f32 %v3851_v13, %v3851_v13 }
 0x16b   : > { %v534_v19 = vpop.xlane.xlu0 %533 }
 0x16c   : > { %v627_v20 = vmul.f32 0.0625, %v534_v19  ;;  %v690_v22 = vmul.f32 %v3854_v14, %v3854_v14  ;;  %v3859_v25 = vsub.f32 %v3699_v26, %v629_v17  ;;  %v728_v26 = vsel %vm528_vm1, %v692_v21, 0.0 }
 0x16e   : > { %v3862_v27 = vsub.f32 %v3704_v29, %v627_v20  ;;  %v722_v28 = vsel %vm528_vm1, %v690_v22, 0.0  ;;  %v693_v29 = vmul.f32 %v3859_v25, %v3859_v25 }
 0x16f   : > { %723 = vadd.xlane.f32.xlu0 %v722_v28  ;;  %v543_v23 = vpop.xlane.xlu0 %542 }
 0x170   : > { %v630_v30 = vmul.f32 0.0625, %v543_v23  ;;  %v691_v31 = vmul.f32 %v3862_v27, %v3862_v27  ;;  %v731_v54 = vsel %vm528_vm1, %v693_v29, 0.0 }
 0x172   : > { %v3870_v35 = vsub.f32 %v3711_v34, %v630_v30  ;;  %v725_v38 = vsel %vm528_vm1, %v691_v31, 0.0 }
 0x173   : > { %v546_v40 = vpop.xlane.xlu1 %545  ;;  %729 = vadd.xlane.f32.xlu0 %v728_v26  ;;  %726 = vadd.xlane.f32.xlu1 %v725_v38  ;;  %v549_v43 = vpop.xlane.xlu0 %548 }
 0x174   : > { %v631_v44 = vmul.f32 0.0625, %v546_v40  ;;  %v632_v46 = vmul.f32 0.0625, %v549_v43  ;;  %v694_v48 = vmul.f32 %v3870_v35, %v3870_v35 }
 0x176   : > { %v3879_v49 = vsub.f32 %v3719_v39, %v631_v44  ;;  %v3882_v34 = vsub.f32 %v3714_v36, %v632_v46  ;;  %v734_v56 = vsel %vm528_vm1, %v694_v48, 0.0 }
 0x177   : > { %v552_v58 = vpop.xlane.xlu1 %551  ;;  %732 = vadd.xlane.f32.xlu1 %v731_v54  ;;  %735 = vadd.xlane.f32.xlu0 %v734_v56  ;;  %v555_v61 = vpop.xlane.xlu0 %554 }
 0x178   : > { %v633_v62 = vmul.f32 0.0625, %v552_v58  ;;  %v634_v0 = vmul.f32 0.0625, %v555_v61  ;;  %v695_v3 = vmul.f32 %v3879_v49, %v3879_v49  ;;  %v696_v39 = vmul.f32 %v3882_v34, %v3882_v34 }
 0x17a   : > { %v3891_v5 = vsub.f32 %v3722_v41, %v633_v62  ;;  %v3894_v36 = vsub.f32 %v3729_v45, %v634_v0  ;;  %v737_v7 = vsel %vm528_vm1, %v695_v3, 0.0  ;;  %v740_v8 = vsel %vm528_vm1, %v696_v39, 0.0 }
 0x17b   : > { %v558_v10 = vpop.xlane.xlu1 %557  ;;  %738 = vadd.xlane.f32.xlu1 %v737_v7  ;;  %741 = vadd.xlane.f32.xlu0 %v740_v8  ;;  %v561_v11 = vpop.xlane.xlu0 %560 }
 0x17c   : > { %v635_v12 = vmul.f32 0.0625, %v558_v10  ;;  %v636_v17 = vmul.f32 0.0625, %v561_v11  ;;  %v697_v19 = vmul.f32 %v3891_v5, %v3891_v5  ;;  %v698_v41 = vmul.f32 %v3894_v36, %v3894_v36 }
 0x17e   : > { %v3903_v20 = vsub.f32 %v3739_v51, %v635_v12  ;;  %v3906_v45 = vsub.f32 %v3732_v47, %v636_v17  ;;  %v743_v22 = vsel %vm528_vm1, %v697_v19, 0.0  ;;  %v746_v28 = vsel %vm528_vm1, %v698_v41, 0.0 }
 0x17f   : > { %v564_v21 = vpop.xlane.xlu1 %563  ;;  %744 = vadd.xlane.f32.xlu1 %v743_v22  ;;  %747 = vadd.xlane.f32.xlu0 %v746_v28  ;;  %v567_v23 = vpop.xlane.xlu0 %566 }
 0x180   : > { %v637_v30 = vmul.f32 0.0625, %v564_v21  ;;  %v638_v31 = vmul.f32 0.0625, %v567_v23  ;;  %v699_v26 = vmul.f32 %v3903_v20, %v3903_v20  ;;  %v700_v51 = vmul.f32 %v3906_v45, %v3906_v45 }
 0x182   : > { %v3915_v38 = vsub.f32 %v3742_v53, %v637_v30  ;;  %v3918_v47 = vsub.f32 %v3749_v57, %v638_v31  ;;  %v749_v29 = vsel %vm528_vm1, %v699_v26, 0.0  ;;  %v752_v40 = vsel %vm528_vm1, %v700_v51, 0.0 }
 0x183   : > { %v570_v43 = vpop.xlane.xlu1 %569  ;;  %750 = vadd.xlane.f32.xlu1 %v749_v29  ;;  %753 = vadd.xlane.f32.xlu0 %v752_v40  ;;  %v573_v44 = vpop.xlane.xlu0 %572 }
 0x184   : > { %v639_v46 = vmul.f32 0.0625, %v570_v43  ;;  %v640_v48 = vmul.f32 0.0625, %v573_v44  ;;  %v701_v54 = vmul.f32 %v3915_v38, %v3915_v38  ;;  %v702_v53 = vmul.f32 %v3918_v47, %v3918_v47 }
 0x186   : > { %v3927_v56 = vsub.f32 %v3759_v63, %v639_v46  ;;  %v3930_v57 = vsub.f32 %v3752_v59, %v640_v48  ;;  %v755_v58 = vsel %vm528_vm1, %v701_v54, 0.0  ;;  %v758_v61 = vsel %vm528_vm1, %v702_v53, 0.0 }
 0x187   : > { %v576_v62 = vpop.xlane.xlu1 %575  ;;  %756 = vadd.xlane.f32.xlu1 %v755_v58  ;;  %759 = vadd.xlane.f32.xlu0 %v758_v61  ;;  %v585_v0 = vpop.xlane.xlu0 %584 }
 0x188   : > { %v641_v3 = vmul.f32 0.0625, %v576_v62  ;;  %v703_v39 = vmul.f32 %v3927_v56, %v3927_v56  ;;  %v704_v7 = vmul.f32 %v3930_v57, %v3930_v57  ;;  %v644_v63 = vmul.f32 0.0625, %v585_v0 }
 0x18a   : > { %v3939_v8 = vsub.f32 %v3762_v1, %v641_v3  ;;  %v761_v59 = vsel %vm528_vm1, %v703_v39, 0.0  ;;  %v764_v10 = vsel %vm528_vm1, %v704_v7, 0.0  ;;  %v3946_v41 = vsub.f32 %v3765_v2, %v644_v63 }
 0x18b   : > { %v588_v11 = vpop.xlane.xlu1 %587  ;;  %762 = vadd.xlane.f32.xlu1 %v761_v59  ;;  %765 = vadd.xlane.f32.xlu0 %v764_v10  ;;  %v579_v12 = vpop.xlane.xlu0 %578 }
 0x18c   : > { %v642_v17 = vmul.f32 0.0625, %v579_v12  ;;  %v705_v19 = vmul.f32 %v3939_v8, %v3939_v8  ;;  %v645_v22 = vmul.f32 0.0625, %v588_v11  ;;  %v708_v2 = vmul.f32 %v3946_v41, %v3946_v41 }
 0x18e   : > { %v3949_v28 = vsub.f32 %v3772_v6, %v642_v17  ;;  %v767_v1 = vsel %vm528_vm1, %v705_v19, 0.0  ;;  %v3955_v26 = vsub.f32 %v3777_v9, %v645_v22  ;;  %v776_v48 = vsel %vm528_vm1, %v708_v2, 0.0 }
 0x18f   : > { %v582_v21 = vpop.xlane.xlu1 %581  ;;  %768 = vadd.xlane.f32.xlu1 %v767_v1  ;;  %v597_v23 = vpop.xlane.xlu0 %596 }
 0x190   : > { %v643_v30 = vmul.f32 0.0625, %v582_v21  ;;  %v706_v31 = vmul.f32 %v3949_v28, %v3949_v28  ;;  %v648_v6 = vmul.f32 0.0625, %v597_v23  ;;  %v709_v9 = vmul.f32 %v3955_v26, %v3955_v26 }
 0x192   : > { %v3960_v51 = vsub.f32 %v3786_v15, %v643_v30  ;;  %v770_v29 = vsel %vm528_vm1, %v706_v31, 0.0  ;;  %v3969_v54 = vsub.f32 %v3789_v16, %v648_v6  ;;  %v779_v7 = vsel %vm528_vm1, %v709_v9, 0.0 }
 0x193   : > { %v600_v40 = vpop.xlane.xlu1 %599  ;;  %771 = vadd.xlane.f32.xlu0 %v770_v29  ;;  %v591_v43 = vpop.xlane.xlu0 %590 }
 0x194   : > { %v646_v44 = vmul.f32 0.0625, %v591_v43  ;;  %v707_v46 = vmul.f32 %v3960_v51, %v3960_v51  ;;  %v649_v15 = vmul.f32 0.0625, %v600_v40  ;;  %v712_v59 = vmul.f32 %v3969_v54, %v3969_v54 }
 0x196   : > { %v3972_v53 = vsub.f32 %v3792_v18, %v646_v44  ;;  %v773_v58 = vsel %vm528_vm1, %v707_v46, 0.0  ;;  %v3979_v16 = vsub.f32 %v3797_v24, %v649_v15  ;;  %v788_v1 = vsel %vm528_vm1, %v712_v59, 0.0 }
 0x197   : > { %v594_v61 = vpop.xlane.xlu1 %593  ;;  %774 = vadd.xlane.f32.xlu1 %v773_v58  ;;  %777 = vadd.xlane.f32.xlu0 %v776_v48  ;;  %v609_v62 = vpop.xlane.xlu0 %608 }
 0x198   : > { %v647_v0 = vmul.f32 0.0625, %v594_v61  ;;  %v710_v3 = vmul.f32 %v3972_v53, %v3972_v53  ;;  %v652_v39 = vmul.f32 0.0625, %v609_v62  ;;  %v713_v21 = vmul.f32 %v3979_v16, %v3979_v16 }
 0x19a   : > { %v3982_v63 = vsub.f32 %v3806_v32, %v647_v0  ;;  %v782_v18 = vsel %vm528_vm1, %v710_v3, 0.0  ;;  %v3990_v19 = vsub.f32 %v3809_v33, %v652_v39  ;;  %v791_v40 = vsel %vm528_vm1, %v713_v21, 0.0 }
 0x19b   : > { %v612_v10 = vpop.xlane.xlu1 %611  ;;  %780 = vadd.xlane.f32.xlu1 %v779_v7  ;;  %783 = vadd.xlane.f32.xlu0 %v782_v18  ;;  %v603_v11 = vpop.xlane.xlu0 %602 }
 0x19c   : > { %v650_v12 = vmul.f32 0.0625, %v603_v11  ;;  %v711_v17 = vmul.f32 %v3982_v63, %v3982_v63  ;;  %v653_v24 = vmul.f32 0.0625, %v612_v10 }
 0x19e   : > { %v3993_v32 = vsub.f32 %v3812_v37, %v650_v12  ;;  %v785_v22 = vsel %vm528_vm1, %v711_v17, 0.0  ;;  %v4002_v2 = vsub.f32 %v3817_v42, %v653_v24  ;;  %v716_v37 = vmul.f32 %v3990_v19, %v3990_v19 }
 0x19f   : > { %v606_v23 = vpop.xlane.xlu1 %605  ;;  %786 = vadd.xlane.f32.xlu1 %v785_v22  ;;  %789 = vadd.xlane.f32.xlu0 %v788_v1  ;;  %v621_v30 = vpop.xlane.xlu0 %620 }
 0x1a0   : > { %v651_v31 = vmul.f32 0.0625, %v606_v23  ;;  %v714_v33 = vmul.f32 %v3993_v32, %v3993_v32  ;;  %v656_v29 = vmul.f32 0.0625, %v621_v30  ;;  %v800_v9 = vsel %vm528_vm1, %v716_v37, 0.0 }
 0x1a1   : > { %v717_v15 = vmul.f32 %v4002_v2, %v4002_v2 }
 0x1a2   : > { %v4007_v6 = vsub.f32 %v3826_v50, %v651_v31  ;;  %v794_v43 = vsel %vm528_vm1, %v714_v33, 0.0  ;;  %v4017_v50 = vsub.f32 %v3829_v52, %v656_v29 }
 0x1a3   : > { %v624_v44 = vpop.xlane.xlu1 %623  ;;  %792 = vadd.xlane.f32.xlu1 %v791_v40  ;;  %795 = vadd.xlane.f32.xlu0 %v794_v43  ;;  %v615_v46 = vpop.xlane.xlu0 %614  ;;  %v803_v7 = vsel %vm528_vm1, %v717_v15, 0.0 }
 0x1a4   : > { %v654_v48 = vmul.f32 0.0625, %v615_v46  ;;  %v715_v42 = vmul.f32 %v4007_v6, %v4007_v6  ;;  %v657_v58 = vmul.f32 0.0625, %v624_v44  ;;  %v720_v59 = vmul.f32 %v4017_v50, %v4017_v50 }
 0x1a6   : > { %v4020_v61 = vsub.f32 %v3832_v55, %v654_v48  ;;  %v797_v62 = vsel %vm528_vm1, %v715_v42, 0.0  ;;  %v4027_v18 = vsub.f32 %v3837_v60, %v657_v58  ;;  %v812_v12 = vsel %vm528_vm1, %v720_v59, 0.0  ;;  %v4045_v59 = vld [vmem:[%s5077_s2 + $0x1] ss:$0 sm:$0xff] }
 0x1a7   : > { %v618_v0 = vpop.xlane.xlu1 %617  ;;  %798 = vadd.xlane.f32.xlu1 %v797_v62  ;;  %801 = vadd.xlane.f32.xlu0 %v800_v9 }
 0x1a8   : > { %v655_v3 = vmul.f32 0.0625, %v618_v0  ;;  %v718_v39 = vmul.f32 %v4020_v61, %v4020_v61  ;;  %v721_v60 = vmul.f32 %v4027_v18, %v4027_v18 }
 0x1aa   : > { %v4030_v52 = vsub.f32 %v3846_v4, %v655_v3  ;;  %v806_v55 = vsel %vm528_vm1, %v718_v39, 0.0  ;;  %v815_v4 = vsel %vm528_vm1, %v721_v60, 0.0 }
 0x1ab   : > { %804 = vadd.xlane.f32.xlu1 %v803_v7  ;;  %807 = vadd.xlane.f32.xlu0 %v806_v55 }
 0x1ac   : > { %v719_v10 = vmul.f32 %v4030_v52, %v4030_v52 }
 0x1ae   : > { %v809_v11 = vsel %vm528_vm1, %v719_v10, 0.0 }
 0x1af   : > { %810 = vadd.xlane.f32.xlu1 %v809_v11  ;;  %813 = vadd.xlane.f32.xlu0 %v812_v12 }
 0x1b3   : > { %816 = vadd.xlane.f32.xlu1 %v815_v4 }
 0x1f8   : > { %v724_v17 = vpop.xlane.xlu0 %723 }
 0x1f9   : > { %v818_v24 = vmul.f32 0.0625, %v724_v17  ;;  %v4051_v17 = vld [vmem:[%s5077_s2 + $0x2] ss:$0 sm:$0xff] }
 0x1fb   : > { %v850_v22 = vadd.f32 1e-05, %v818_v24 }
 0x1fc   : > { %v727_v1 = vpop.xlane.xlu1 %726  ;;  %v730_v21 = vpop.xlane.xlu0 %729 }
 0x1fd   : > { %3391 = vrsqrt.f32 %v850_v22  ;;  %v819_v23 = vmul.f32 0.0625, %v727_v1  ;;  %v820_v30 = vmul.f32 0.0625, %v730_v21 }
 0x1ff   : > { %v851_v31 = vadd.f32 1e-05, %v819_v23  ;;  %v852_v33 = vadd.f32 1e-05, %v820_v30 }
 0x200   : > { %v733_v37 = vpop.xlane.xlu1 %732  ;;  %v736_v29 = vpop.xlane.xlu0 %735 }
 0x201   : > { %3393 = vrsqrt.f32 %v851_v31  ;;  %v821_v40 = vmul.f32 0.0625, %v733_v37  ;;  %v822_v43 = vmul.f32 0.0625, %v736_v29 }
 0x202   : > { %3395 = vrsqrt.f32 %v852_v33 }
 0x203   : > { %v853_v44 = vadd.f32 1e-05, %v821_v40  ;;  %v854_v46 = vadd.f32 1e-05, %v822_v43 }
 0x204   : > { %v739_v48 = vpop.xlane.xlu1 %738  ;;  %v742_v42 = vpop.xlane.xlu0 %741 }
 0x205   : > { %3397 = vrsqrt.f32 %v853_v44  ;;  %v823_v9 = vmul.f32 0.0625, %v739_v48  ;;  %v824_v15 = vmul.f32 0.0625, %v742_v42 }
 0x206   : > { %3399 = vrsqrt.f32 %v854_v46 }
 0x207   : > { %v855_v58 = vadd.f32 1e-05, %v823_v9  ;;  %v856_v62 = vadd.f32 1e-05, %v824_v15 }
 0x208   : > { %v745_v0 = vpop.xlane.xlu1 %744  ;;  %v748_v3 = vpop.xlane.xlu0 %747 }
 0x209   : > { %3401 = vrsqrt.f32 %v855_v58  ;;  %v825_v39 = vmul.f32 0.0625, %v745_v0  ;;  %v826_v7 = vmul.f32 0.0625, %v748_v3 }
 0x20a   : > { %v3392_v55 = vpop.eup %3391  ;;  %3403 = vrsqrt.f32 %v856_v62 }
 0x20b   : > { %v857_v10 = vadd.f32 1e-05, %v825_v39  ;;  %v858_v11 = vadd.f32 1e-05, %v826_v7  ;;  %v914_v12 = vmul.f32 %v3392_v55, %v3854_v14 }
 0x20c   : > { %v751_v60 = vpop.xlane.xlu1 %750  ;;  %v754_v4 = vpop.xlane.xlu0 %753 }
 0x20d   : > { %3405 = vrsqrt.f32 %v857_v10  ;;  %v827_v24 = vmul.f32 0.0625, %v751_v60  ;;  %v828_v22 = vmul.f32 0.0625, %v754_v4  ;;  %v950_v1 = vmul.f32 %v4045_v59, %v914_v12 }
 0x20e   : > { %v3394_v21 = vpop.eup %3393  ;;  %3407 = vrsqrt.f32 %v858_v11 }
 0x20f   : > { %v3396_v23 = vpop.eup %3395  ;;  %v859_v30 = vadd.f32 1e-05, %v827_v24  ;;  %v860_v31 = vadd.f32 1e-05, %v828_v22  ;;  %v4055_v33 = vadd.f32 %v4051_v17, %v950_v1  ;;  %v915_v14 = vmul.f32 %v3394_v21, %v3862_v27 }
 0x210   : > { %v757_v37 = vpop.xlane.xlu1 %756  ;;  %v760_v29 = vpop.xlane.xlu0 %759  ;;  %v916_v40 = vmul.f32 %v3396_v23, %v3851_v13 }
 0x211   : > { %3409 = vrsqrt.f32 %v859_v30  ;;  %v829_v43 = vmul.f32 0.0625, %v757_v37  ;;  %v830_v44 = vmul.f32 0.0625, %v760_v29  ;;  %v1020_v46 = vsel %vm528_vm1, %v4055_v33, 0.0 }
 0x212   : > { %v3398_v48 = vpop.eup %3397  ;;  %3411 = vrsqrt.f32 %v860_v31  ;;  %1021 = vadd.xlane.f32.xlu0 %v1020_v46  ;;  %v951_v42 = vmul.f32 %v4045_v59, %v915_v14  ;;  %v952_v9 = vmul.f32 %v4045_v59, %v916_v40 }
 0x213   : > { %v3400_v15 = vpop.eup %3399  ;;  %v861_v58 = vadd.f32 1e-05, %v829_v43  ;;  %v862_v27 = vadd.f32 1e-05, %v830_v44  ;;  %v917_v62 = vmul.f32 %v3398_v48, %v3859_v25 }
 0x214   : > { %v763_v0 = vpop.xlane.xlu1 %762  ;;  %v766_v13 = vpop.xlane.xlu0 %765  ;;  %v4065_v3 = vadd.f32 %v4051_v17, %v951_v42  ;;  %v4068_v39 = vadd.f32 %v4051_v17, %v952_v9  ;;  %v918_v7 = vmul.f32 %v3400_v15, %v3870_v35 }
 0x215   : > { %3413 = vrsqrt.f32 %v861_v58  ;;  %v831_v55 = vmul.f32 0.0625, %v763_v0  ;;  %v832_v10 = vmul.f32 0.0625, %v766_v13  ;;  %v953_v11 = vmul.f32 %v4045_v59, %v917_v62 }
 0x216   : > { %5100 = vst [vmem:[#allocation2_spill] sm:$0xff] %v4068_v39  ;;  %v3402_v12 = vpop.eup %3401  ;;  %3415 = vrsqrt.f32 %v862_v27  ;;  %v1023_v25 = vsel %vm528_vm1, %v4065_v3, 0.0  ;;  %v1026_v60 = vsel %vm528_vm1, %v4068_v39, 0.0  ;;  %v954_v4 = vmul.f32 %v4045_v59, %v918_v7 }
 0x217   : > { %v3404_v24 = vpop.eup %3403  ;;  %v863_v22 = vadd.f32 1e-05, %v831_v55  ;;  %v864_v1 = vadd.f32 1e-05, %v832_v10  ;;  %1024 = vadd.xlane.f32.xlu1 %v1023_v25  ;;  %1027 = vadd.xlane.f32.xlu0 %v1026_v60  ;;  %v4078_v35 = vadd.f32 %v4051_v17, %v953_v11  ;;  %v919_v21 = vmul.f32 %v3402_v12, %v3879_v49 }
 0x218   : > { %v769_v23 = vpop.xlane.xlu1 %768  ;;  %v4082_v30 = vadd.f32 %v4051_v17, %v954_v4  ;;  %v920_v31 = vmul.f32 %v3404_v24, %v3882_v34 }
 0x219   : > { %3417 = vrsqrt.f32 %v863_v22  ;;  %v833_v14 = vmul.f32 0.0625, %v769_v23  ;;  %v1029_v37 = vsel %vm528_vm1, %v4078_v35, 0.0  ;;  %v955_v29 = vmul.f32 %v4045_v59, %v919_v21 }
 0x21a   : > { %5101 = vst [vmem:[#allocation3_spill] sm:$0xff] %v4082_v30  ;;  %v3406_v40 = vpop.eup %3405  ;;  %3419 = vrsqrt.f32 %v864_v1  ;;  %v1032_v43 = vsel %vm528_vm1, %v4082_v30, 0.0  ;;  %v956_v49 = vmul.f32 %v4045_v59, %v920_v31 }
 0x21b   : > { %v3408_v44 = vpop.eup %3407  ;;  %v865_v46 = vadd.f32 1e-05, %v833_v14  ;;  %1030 = vadd.xlane.f32.xlu1 %v1029_v37  ;;  %1033 = vadd.xlane.f32.xlu0 %v1032_v43  ;;  %v4092_v34 = vadd.f32 %v4051_v17, %v955_v29  ;;  %v921_v48 = vmul.f32 %v3406_v40, %v3891_v5 }
 0x21c   : > { %v772_v42 = vpop.xlane.xlu0 %771  ;;  %v4096_v9 = vadd.f32 %v4051_v17, %v956_v49  ;;  %v922_v15 = vmul.f32 %v3408_v44, %v3894_v36 }
 0x21d   : > { %5102 = vst [vmem:[#allocation4_spill] sm:$0xff] %v4092_v34  ;;  %3421 = vrsqrt.f32 %v865_v46  ;;  %v834_v58 = vmul.f32 0.0625, %v772_v42  ;;  %v1035_v27 = vsel %vm528_vm1, %v4092_v34, 0.0  ;;  %v957_v62 = vmul.f32 %v4045_v59, %v921_v48 }
 0x21e   : > { %5103 = vst [vmem:[#allocation5_spill] sm:$0xff] %v4096_v9  ;;  %v3410_v0 = vpop.eup %3409  ;;  %v1038_v13 = vsel %vm528_vm1, %v4096_v9, 0.0  ;;  %v958_v7 = vmul.f32 %v4045_v59, %v922_v15 }
 0x21f   : > { %v3412_v5 = vpop.eup %3411  ;;  %v866_v55 = vadd.f32 1e-05, %v834_v58  ;;  %1036 = vadd.xlane.f32.xlu1 %v1035_v27  ;;  %1039 = vadd.xlane.f32.xlu0 %v1038_v13  ;;  %v4106_v10 = vadd.f32 %v4051_v17, %v957_v62  ;;  %v923_v36 = vmul.f32 %v3410_v0, %v3903_v20 }
 0x220   : > { %v775_v11 = vpop.xlane.xlu1 %774  ;;  %v778_v12 = vpop.xlane.xlu0 %777  ;;  %v4110_v25 = vadd.f32 %v4051_v17, %v958_v7  ;;  %v924_v60 = vmul.f32 %v3412_v5, %v3906_v45 }
 0x221   : > { %5104 = vst [vmem:[#allocation6_spill] sm:$0xff] %v4106_v10  ;;  %v835_v4 = vmul.f32 0.0625, %v775_v11  ;;  %v836_v24 = vmul.f32 0.0625, %v778_v12  ;;  %v1041_v22 = vsel %vm528_vm1, %v4106_v10, 0.0  ;;  %3423 = vrsqrt.f32 %v866_v55 }
 0x222   : > { %v3414_v1 = vpop.eup %3413  ;;  %v1044_v21 = vsel %vm528_vm1, %v4110_v25, 0.0  ;;  %v959_v23 = vmul.f32 %v4045_v59, %v923_v36  ;;  %v960_v20 = vmul.f32 %v4045_v59, %v924_v60 }
 0x223   : > { %v3416_v31 = vpop.eup %3415  ;;  %v867_v14 = vadd.f32 1e-05, %v835_v4  ;;  %v868_v37 = vadd.f32 1e-05, %v836_v24  ;;  %1042 = vadd.xlane.f32.xlu1 %v1041_v22  ;;  %1045 = vadd.xlane.f32.xlu0 %v1044_v21  ;;  %v925_v45 = vmul.f32 %v3414_v1, %v3915_v38 }
 0x224   : > { %v781_v29 = vpop.xlane.xlu1 %780  ;;  %v784_v40 = vpop.xlane.xlu0 %783  ;;  %v4121_v43 = vadd.f32 %v4051_v17, %v959_v23  ;;  %v4124_v49 = vadd.f32 %v4051_v17, %v960_v20  ;;  %v926_v44 = vmul.f32 %v3416_v31, %v3918_v47 }
 0x225   : > { %3425 = vrsqrt.f32 %v867_v14  ;;  %v837_v46 = vmul.f32 0.0625, %v781_v29  ;;  %v838_v48 = vmul.f32 0.0625, %v784_v40  ;;  %v961_v42 = vmul.f32 %v4045_v59, %v925_v45 }
 0x226   : > { %v3418_v15 = vpop.eup %3417  ;;  %3427 = vrsqrt.f32 %v868_v37  ;;  %v1047_v38 = vsel %vm528_vm1, %v4121_v43, 0.0  ;;  %v1050_v58 = vsel %vm528_vm1, %v4124_v49, 0.0  ;;  %v962_v27 = vmul.f32 %v4045_v59, %v926_v44 }
 0x227   : > { %v3420_v62 = vpop.eup %3419  ;;  %v869_v0 = vadd.f32 1e-05, %v837_v46  ;;  %v870_v13 = vadd.f32 1e-05, %v838_v48  ;;  %1048 = vadd.xlane.f32.xlu1 %v1047_v38  ;;  %1051 = vadd.xlane.f32.xlu0 %v1050_v58  ;;  %v4134_v47 = vadd.f32 %v4051_v17, %v961_v42  ;;  %v927_v7 = vmul.f32 %v3418_v15, %v3927_v56 }
 0x228   : > { %v787_v5 = vpop.xlane.xlu1 %786  ;;  %v790_v55 = vpop.xlane.xlu0 %789  ;;  %v4138_v36 = vadd.f32 %v4051_v17, %v962_v27  ;;  %v928_v11 = vmul.f32 %v3420_v62, %v3930_v57 }
 0x229   : > { %3429 = vrsqrt.f32 %v869_v0  ;;  %v839_v12 = vmul.f32 0.0625, %v787_v5  ;;  %v840_v60 = vmul.f32 0.0625, %v790_v55  ;;  %v1053_v4 = vsel %vm528_vm1, %v4134_v47, 0.0 }
 0x22a   : > { %v3422_v24 = vpop.eup %3421  ;;  %3431 = vrsqrt.f32 %v870_v13  ;;  %v1056_v22 = vsel %vm528_vm1, %v4138_v36, 0.0  ;;  %v963_v56 = vmul.f32 %v4045_v59, %v927_v7  ;;  %v964_v1 = vmul.f32 %v4045_v59, %v928_v11 }
 0x22b   : > { %v871_v21 = vadd.f32 1e-05, %v839_v12  ;;  %v872_v23 = vadd.f32 1e-05, %v840_v60  ;;  %1054 = vadd.xlane.f32.xlu1 %v1053_v4  ;;  %1057 = vadd.xlane.f32.xlu0 %v1056_v22  ;;  %v929_v57 = vmul.f32 %v3422_v24, %v3939_v8 }
 0x22c   : > { %v793_v20 = vpop.xlane.xlu1 %792  ;;  %v796_v31 = vpop.xlane.xlu0 %795  ;;  %v4149_v14 = vadd.f32 %v4051_v17, %v963_v56  ;;  %v4152_v37 = vadd.f32 %v4051_v17, %v964_v1 }
 0x22d   : > { %3433 = vrsqrt.f32 %v871_v21  ;;  %v841_v45 = vmul.f32 0.0625, %v793_v20  ;;  %v842_v29 = vmul.f32 0.0625, %v796_v31  ;;  %v965_v40 = vmul.f32 %v4045_v59, %v929_v57 }
 0x22e   : > { %3435 = vrsqrt.f32 %v872_v23  ;;  %v1059_v44 = vsel %vm528_vm1, %v4149_v14, 0.0  ;;  %v1062_v8 = vsel %vm528_vm1, %v4152_v37, 0.0  ;;  %v3424_v46 = vpop.eup %3423 }
 0x22f   : > { %v873_v48 = vadd.f32 1e-05, %v841_v45  ;;  %v874_v42 = vadd.f32 1e-05, %v842_v29  ;;  %1060 = vadd.xlane.f32.xlu1 %v1059_v44  ;;  %1063 = vadd.xlane.f32.xlu0 %v1062_v8  ;;  %v4160_v15 = vadd.f32 %v4051_v17, %v965_v40  ;;  %v930_v7 = vmul.f32 %v3424_v46, %v3949_v28 }
 0x230   : > { %v799_v38 = vpop.xlane.xlu1 %798  ;;  %v802_v58 = vpop.xlane.xlu0 %801 }
 0x231   : > { %3437 = vrsqrt.f32 %v873_v48  ;;  %v843_v27 = vmul.f32 0.0625, %v799_v38  ;;  %v844_v62 = vmul.f32 0.0625, %v802_v58  ;;  %v1065_v0 = vsel %vm528_vm1, %v4160_v15, 0.0 }
 0x232   : > { %v3426_v13 = vpop.eup %3425  ;;  %3439 = vrsqrt.f32 %v874_v42  ;;  %v966_v23 = vmul.f32 %v4045_v59, %v930_v7 }
 0x233   : > { %v3428_v5 = vpop.eup %3427  ;;  %v875_v55 = vadd.f32 1e-05, %v843_v27  ;;  %v876_v11 = vadd.f32 1e-05, %v844_v62  ;;  %1066 = vadd.xlane.f32.xlu1 %v1065_v0  ;;  %v931_v24 = vmul.f32 %v3426_v13, %v3960_v51 }
 0x234   : > { %v805_v12 = vpop.xlane.xlu1 %804  ;;  %v808_v60 = vpop.xlane.xlu0 %807  ;;  %v932_v4 = vmul.f32 %v3428_v5, %v3946_v41  ;;  %v4178_v42 = vadd.f32 %v4051_v17, %v966_v23 }
 0x235   : > { %3441 = vrsqrt.f32 %v875_v55  ;;  %v845_v22 = vmul.f32 0.0625, %v805_v12  ;;  %v846_v56 = vmul.f32 0.0625, %v808_v60  ;;  %v967_v51 = vmul.f32 %v4045_v59, %v931_v24 }
 0x236   : > { %v3430_v1 = vpop.eup %3429  ;;  %3443 = vrsqrt.f32 %v876_v11  ;;  %v968_v21 = vmul.f32 %v4045_v59, %v932_v4  ;;  %5106 = vst [vmem:[#allocation8_spill] sm:$0xff] %v4178_v42  ;;  %v1068_v12 = vsel %vm528_vm1, %v4178_v42, 0.0 }
 0x237   : > { %v3432_v28 = vpop.eup %3431  ;;  %v877_v57 = vadd.f32 1e-05, %v845_v22  ;;  %v878_v20 = vadd.f32 1e-05, %v846_v56  ;;  %v933_v31 = vmul.f32 %v3430_v1, %v3955_v26  ;;  %v4185_v13 = vadd.f32 %v4051_v17, %v967_v51 }
 0x238   : > { %v811_v45 = vpop.xlane.xlu1 %810  ;;  %v814_v29 = vpop.xlane.xlu0 %813  ;;  %v4171_v41 = vadd.f32 %v4051_v17, %v968_v21  ;;  %v934_v26 = vmul.f32 %v3432_v28, %v3972_v53 }
 0x239   : > { %3445 = vrsqrt.f32 %v877_v57  ;;  %v847_v40 = vmul.f32 0.0625, %v811_v45  ;;  %v848_v44 = vmul.f32 0.0625, %v814_v29  ;;  %v969_v8 = vmul.f32 %v4045_v59, %v933_v31  ;;  %5108 = vst [vmem:[#allocation10_spill] sm:$0xff] %v4185_v13 }
 0x23a   : > { %5105 = vst [vmem:[#allocation7_spill] sm:$0xff] %v4171_v41  ;;  %v3434_v46 = vpop.eup %3433  ;;  %3447 = vrsqrt.f32 %v878_v20  ;;  %v1074_v48 = vsel %vm528_vm1, %v4171_v41, 0.0  ;;  %v970_v4 = vmul.f32 %v4045_v59, %v934_v26 }
 0x23b   : > { %v3436_v38 = vpop.eup %3435  ;;  %v879_v58 = vadd.f32 1e-05, %v847_v40  ;;  %v880_v27 = vadd.f32 1e-05, %v848_v44  ;;  %1075 = vadd.xlane.f32.xlu0 %v1074_v48  ;;  %v4182_v62 = vadd.f32 %v4051_v17, %v969_v8  ;;  %v935_v53 = vmul.f32 %v3434_v46, %v3982_v63 }
 0x23c   : > { %v817_v0 = vpop.xlane.xlu1 %816  ;;  %v936_v7 = vmul.f32 %v3436_v38, %v3969_v54  ;;  %v1071_v63 = vsel %vm528_vm1, %v4185_v13, 0.0  ;;  %v4206_v57 = vadd.f32 %v4051_v17, %v970_v4 }
 0x23d   : > { %5107 = vst [vmem:[#allocation9_spill] sm:$0xff] %v4182_v62  ;;  %3449 = vrsqrt.f32 %v879_v58  ;;  %v849_v5 = vmul.f32 0.0625, %v817_v0  ;;  %v1077_v55 = vsel %vm528_vm1, %v4182_v62, 0.0  ;;  %v971_v21 = vmul.f32 %v4045_v59, %v935_v53 }
 0x23e   : > { %v3438_v11 = vpop.eup %3437  ;;  %3451 = vrsqrt.f32 %v880_v27  ;;  %1078 = vadd.xlane.f32.xlu1 %v1077_v55  ;;  %v972_v60 = vmul.f32 %v4045_v59, %v936_v7  ;;  %5110 = vst [vmem:[#allocation12_spill] sm:$0xff] %v4206_v57 }
 0x23f   : > { %v3440_v24 = vpop.eup %3439  ;;  %v881_v22 = vadd.f32 1e-05, %v849_v5  ;;  %1069 = vadd.xlane.f32.xlu0 %v1068_v12  ;;  %v937_v54 = vmul.f32 %v3438_v11, %v3979_v16  ;;  %v4216_v51 = vadd.f32 %v4051_v17, %v971_v21 }
 0x240   : > { %v4197_v56 = vadd.f32 %v4051_v17, %v972_v60  ;;  %v938_v16 = vmul.f32 %v3440_v24, %v3993_v32  ;;  %v1080_v32 = vsel %vm528_vm1, %v4206_v57, 0.0 }
 0x241   : > { %3453 = vrsqrt.f32 %v881_v22  ;;  %v973_v1 = vmul.f32 %v4045_v59, %v937_v54  ;;  %5112 = vst [vmem:[#allocation14_spill] sm:$0xff] %v4216_v51  ;;  %v1083_v38 = vsel %vm528_vm1, %v4216_v51, 0.0 }
 0x242   : > { %5109 = vst [vmem:[#allocation11_spill] sm:$0xff] %v4197_v56  ;;  %v3442_v23 = vpop.eup %3441  ;;  %1072 = vadd.xlane.f32.xlu1 %v1071_v63  ;;  %v1086_v28 = vsel %vm528_vm1, %v4197_v56, 0.0  ;;  %v974_v46 = vmul.f32 %v4045_v59, %v938_v16 }
 0x243   : > { %v3444_v20 = vpop.eup %3443  ;;  %1087 = vadd.xlane.f32.xlu0 %v1086_v28  ;;  %v4210_v31 = vadd.f32 %v4051_v17, %v973_v1  ;;  %v939_v40 = vmul.f32 %v3442_v23, %v4007_v6 }
 0x244   : > { %v940_v45 = vmul.f32 %v3444_v20, %v3990_v19  ;;  %v4234_v7 = vadd.f32 %v4051_v17, %v974_v46 }
 0x245   : > { %5111 = vst [vmem:[#allocation13_spill] sm:$0xff] %v4210_v31  ;;  %v1089_v29 = vsel %vm528_vm1, %v4210_v31, 0.0  ;;  %v975_v58 = vmul.f32 %v4045_v59, %v939_v40 }
 0x246   : > { %v3446_v44 = vpop.eup %3445  ;;  %1090 = vadd.xlane.f32.xlu1 %v1089_v29  ;;  %v976_v8 = vmul.f32 %v4045_v59, %v940_v45  ;;  %5114 = vst [vmem:[#allocation16_spill] sm:$0xff] %v4234_v7 }
 0x247   : > { %v3448_v48 = vpop.eup %3447  ;;  %1081 = vadd.xlane.f32.xlu0 %v1080_v32  ;;  %v941_v19 = vmul.f32 %v3446_v44, %v4002_v2  ;;  %v4244_v12 = vadd.f32 %v4051_v17, %v975_v58 }
 0x248   : > { %v4225_v26 = vadd.f32 %v4051_v17, %v976_v8  ;;  %v942_v2 = vmul.f32 %v3448_v48, %v4020_v61  ;;  %v1092_v61 = vsel %vm528_vm1, %v4234_v7, 0.0 }
 0x249   : > { %v977_v6 = vmul.f32 %v4045_v59, %v941_v19  ;;  %5116 = vst [vmem:[#allocation18_spill] sm:$0xff] %v4244_v12  ;;  %v1095_v63 = vsel %vm528_vm1, %v4244_v12, 0.0 }
 0x24a   : > { %5113 = vst [vmem:[#allocation15_spill] sm:$0xff] %v4225_v26  ;;  %v3450_v27 = vpop.eup %3449  ;;  %1084 = vadd.xlane.f32.xlu1 %v1083_v38  ;;  %v1098_v0 = vsel %vm528_vm1, %v4225_v26, 0.0  ;;  %v978_v22 = vmul.f32 %v4045_v59, %v942_v2 }
 0x24b   : > { %v3452_v5 = vpop.eup %3451  ;;  %1099 = vadd.xlane.f32.xlu0 %v1098_v0  ;;  %v4238_v55 = vadd.f32 %v4051_v17, %v977_v6  ;;  %v943_v60 = vmul.f32 %v3450_v27, %v4030_v52 }
 0x24c   : > { %v944_v53 = vmul.f32 %v3452_v5, %v4017_v50  ;;  %v4262_v23 = vadd.f32 %v4051_v17, %v978_v22 }
 0x24d   : > { %5115 = vst [vmem:[#allocation17_spill] sm:$0xff] %v4238_v55  ;;  %v1101_v11 = vsel %vm528_vm1, %v4238_v55, 0.0  ;;  %v979_v1 = vmul.f32 %v4045_v59, %v943_v60 }
 0x24e   : > { %v3454_v4 = vpop.eup %3453  ;;  %1102 = vadd.xlane.f32.xlu1 %v1101_v11  ;;  %v980_v24 = vmul.f32 %v4045_v59, %v944_v53  ;;  %5118 = vst [vmem:[#allocation20_spill] sm:$0xff] %v4262_v23 }
 0x24f   : > { %1093 = vadd.xlane.f32.xlu0 %v1092_v61  ;;  %v945_v50 = vmul.f32 %v3454_v4, %v4027_v18  ;;  %v4270_v16 = vadd.f32 %v4051_v17, %v979_v1 }
 0x250   : > { %v4253_v54 = vadd.f32 %v4051_v17, %v980_v24 }
 0x251   : > { %v981_v52 = vmul.f32 %v4045_v59, %v945_v50  ;;  %5120 = vst [vmem:[#allocation22_spill] sm:$0xff] %v4270_v16  ;;  %v1104_v59 = vsel %vm528_vm1, %v4262_v23, 0.0  ;;  %v1107_v20 = vsel %vm528_vm1, %v4270_v16, 0.0 }
 0x252   : > { %5117 = vst [vmem:[#allocation19_spill] sm:$0xff] %v4253_v54  ;;  %1096 = vadd.xlane.f32.xlu1 %v1095_v63  ;;  %v1110_v21 = vsel %vm528_vm1, %v4253_v54, 0.0 }
 0x253   : > { %1111 = vadd.xlane.f32.xlu0 %v1110_v21  ;;  %v4265_v18 = vadd.f32 %v4051_v17, %v981_v52 }
 0x255   : > { %5119 = vst [vmem:[#allocation21_spill] sm:$0xff] %v4265_v18  ;;  %v1113_v28 = vsel %vm528_vm1, %v4265_v18, 0.0 }
 0x256   : > { %1114 = vadd.xlane.f32.xlu1 %v1113_v28 }
 0x257   : > { %1105 = vadd.xlane.f32.xlu0 %v1104_v59 }
 0x25a   : > { %1108 = vadd.xlane.f32.xlu1 %v1107_v20 }
 0x29b   : > { %v1022_v45 = vpop.xlane.xlu0 %1021 }
 0x29c   : > { %v1116_v29 = vmul.f32 0.0625, %v1022_v45 }
 0x29e   : > { %v4277_v40 = vsub.f32 %v4055_v33, %v1116_v29 }
 0x2a0   : > { %v1025_v44 = vpop.xlane.xlu1 %1024  ;;  %v1028_v32 = vpop.xlane.xlu0 %1027  ;;  %v1180_v17 = vmul.f32 %v4277_v40, %v4277_v40 }
 0x2a1   : > { %v1117_v8 = vmul.f32 0.0625, %v1025_v44  ;;  %v1118_v46 = vmul.f32 0.0625, %v1028_v32 }
 0x2a2   : > { %v1212_v48 = vsel %vm528_vm1, %v1180_v17, 0.0 }
 0x2a3   : > { %v4283_v19 = vsub.f32 %v4065_v3, %v1117_v8  ;;  %v4286_v38 = vsub.f32 %v4068_v39, %v1118_v46  ;;  %1213 = vadd.xlane.f32.xlu0 %v1212_v48 }
 0x2a4   : > { %v1031_v6 = vpop.xlane.xlu1 %1030  ;;  %v1034_v58 = vpop.xlane.xlu0 %1033 }
 0x2a5   : > { %v1119_v27 = vmul.f32 0.0625, %v1031_v6  ;;  %v1120_v0 = vmul.f32 0.0625, %v1034_v58  ;;  %v1181_v2 = vmul.f32 %v4283_v19, %v4283_v19  ;;  %v1182_v5 = vmul.f32 %v4286_v38, %v4286_v38 }
 0x2a7   : > { %v4293_v53 = vsub.f32 %v4078_v35, %v1119_v27  ;;  %v4296_v11 = vsub.f32 %v4082_v30, %v1120_v0  ;;  %v1215_v60 = vsel %vm528_vm1, %v1181_v2, 0.0  ;;  %v1218_v4 = vsel %vm528_vm1, %v1182_v5, 0.0 }
 0x2a8   : > { %1216 = vadd.xlane.f32.xlu1 %v1215_v60  ;;  %v1037_v61 = vpop.xlane.xlu1 %1036  ;;  %1219 = vadd.xlane.f32.xlu0 %v1218_v4  ;;  %v1040_v24 = vpop.xlane.xlu0 %1039 }
 0x2a9   : > { %v1121_v22 = vmul.f32 0.0625, %v1037_v61  ;;  %v1122_v50 = vmul.f32 0.0625, %v1040_v24  ;;  %v1183_v63 = vmul.f32 %v4293_v53, %v4293_v53  ;;  %v1184_v52 = vmul.f32 %v4296_v11, %v4296_v11 }
 0x2ab   : > { %v4305_v1 = vsub.f32 %v4092_v34, %v1121_v22  ;;  %v4308_v21 = vsub.f32 %v4096_v9, %v1122_v50  ;;  %v1221_v28 = vsel %vm528_vm1, %v1183_v63, 0.0  ;;  %v1224_v59 = vsel %vm528_vm1, %v1184_v52, 0.0 }
 0x2ac   : > { %1222 = vadd.xlane.f32.xlu1 %v1221_v28  ;;  %v1043_v20 = vpop.xlane.xlu1 %1042  ;;  %1225 = vadd.xlane.f32.xlu0 %v1224_v59  ;;  %v1046_v45 = vpop.xlane.xlu0 %1045 }
 0x2ad   : > { %v1123_v29 = vmul.f32 0.0625, %v1043_v20  ;;  %v1124_v44 = vmul.f32 0.0625, %v1046_v45  ;;  %v1185_v32 = vmul.f32 %v4305_v1, %v4305_v1  ;;  %v1186_v17 = vmul.f32 %v4308_v21, %v4308_v21 }
 0x2af   : > { %v4317_v8 = vsub.f32 %v4106_v10, %v1123_v29  ;;  %v4320_v46 = vsub.f32 %v4110_v25, %v1124_v44  ;;  %v1227_v48 = vsel %vm528_vm1, %v1185_v32, 0.0  ;;  %v1230_v6 = vsel %vm528_vm1, %v1186_v17, 0.0 }
 0x2b0   : > { %1228 = vadd.xlane.f32.xlu1 %v1227_v48  ;;  %v1049_v58 = vpop.xlane.xlu1 %1048  ;;  %1231 = vadd.xlane.f32.xlu0 %v1230_v6  ;;  %v1052_v27 = vpop.xlane.xlu0 %1051 }
 0x2b1   : > { %v1125_v0 = vmul.f32 0.0625, %v1049_v58  ;;  %v1126_v2 = vmul.f32 0.0625, %v1052_v27  ;;  %v1187_v5 = vmul.f32 %v4317_v8, %v4317_v8  ;;  %v1188_v60 = vmul.f32 %v4320_v46, %v4320_v46 }
 0x2b3   : > { %v4329_v4 = vsub.f32 %v4121_v43, %v1125_v0  ;;  %v4332_v61 = vsub.f32 %v4124_v49, %v1126_v2  ;;  %v1233_v24 = vsel %vm528_vm1, %v1187_v5, 0.0  ;;  %v1236_v22 = vsel %vm528_vm1, %v1188_v60, 0.0 }
 0x2b4   : > { %1234 = vadd.xlane.f32.xlu1 %v1233_v24  ;;  %v1055_v50 = vpop.xlane.xlu1 %1054  ;;  %1237 = vadd.xlane.f32.xlu0 %v1236_v22  ;;  %v1058_v63 = vpop.xlane.xlu0 %1057 }
 0x2b5   : > { %v1127_v52 = vmul.f32 0.0625, %v1055_v50  ;;  %v1128_v28 = vmul.f32 0.0625, %v1058_v63  ;;  %v1189_v59 = vmul.f32 %v4329_v4, %v4329_v4  ;;  %v1190_v20 = vmul.f32 %v4332_v61, %v4332_v61 }
 0x2b7   : > { %v4341_v45 = vsub.f32 %v4134_v47, %v1127_v52  ;;  %v4344_v29 = vsub.f32 %v4138_v36, %v1128_v28  ;;  %v1239_v44 = vsel %vm528_vm1, %v1189_v59, 0.0  ;;  %v1242_v32 = vsel %vm528_vm1, %v1190_v20, 0.0 }
 0x2b8   : > { %1240 = vadd.xlane.f32.xlu1 %v1239_v44  ;;  %v1061_v17 = vpop.xlane.xlu1 %1060  ;;  %1243 = vadd.xlane.f32.xlu0 %v1242_v32  ;;  %v1064_v48 = vpop.xlane.xlu0 %1063 }
 0x2b9   : > { %v1129_v6 = vmul.f32 0.0625, %v1061_v17  ;;  %v1130_v58 = vmul.f32 0.0625, %v1064_v48  ;;  %v1191_v27 = vmul.f32 %v4341_v45, %v4341_v45  ;;  %v1192_v0 = vmul.f32 %v4344_v29, %v4344_v29 }
 0x2bb   : > { %v4353_v2 = vsub.f32 %v4149_v14, %v1129_v6  ;;  %v4356_v5 = vsub.f32 %v4152_v37, %v1130_v58  ;;  %v1245_v60 = vsel %vm528_vm1, %v1191_v27, 0.0  ;;  %v1248_v24 = vsel %vm528_vm1, %v1192_v0, 0.0 }
 0x2bc   : > { %1246 = vadd.xlane.f32.xlu1 %v1245_v60  ;;  %v1067_v22 = vpop.xlane.xlu1 %1066  ;;  %1249 = vadd.xlane.f32.xlu0 %v1248_v24 }
 0x2bd   : > { %v1131_v50 = vmul.f32 0.0625, %v1067_v22  ;;  %v1193_v63 = vmul.f32 %v4353_v2, %v4353_v2  ;;  %v1194_v52 = vmul.f32 %v4356_v5, %v4356_v5 }
 0x2bf   : > { %v4365_v28 = vsub.f32 %v4160_v15, %v1131_v50  ;;  %v1251_v59 = vsel %vm528_vm1, %v1193_v63, 0.0  ;;  %v1254_v20 = vsel %vm528_vm1, %v1194_v52, 0.0  ;;  %v3380_v50 = vld [vmem:[%s5076_s1 + $0x18] sm:$0xff]  }
 0x2c0   : > { %1252 = vadd.xlane.f32.xlu1 %v1251_v59  ;;  %1255 = vadd.xlane.f32.xlu0 %v1254_v20 }
 0x2c1   : > { %v1195_v44 = vmul.f32 %v4365_v28, %v4365_v28  ;;  %3229 = vmatprep.subr.bf16.mxu1 %v3380_v50 }
 0x2c2   : > { %3230 = vmatpush3.bf16.msra.mxu1 %v3380_v50 }
 0x2c3   : > { %v1257_v32 = vsel %vm528_vm1, %v1195_v44, 0.0 }
 0x2c4   : > { %1258 = vadd.xlane.f32.xlu1 %v1257_v32  ;;  %v1076_v17 = vpop.xlane.xlu0 %1075 }
 0x2c5   : > { %v1134_v48 = vmul.f32 0.0625, %v1076_v17 }
 0x2c7   : > { %v1079_v6 = vpop.xlane.xlu1 %1078  ;;  %v4373_v60 = vsub.f32 %v4171_v41, %v1134_v48 }
 0x2c8   : > { %v1070_v58 = vpop.xlane.xlu0 %1069  ;;  %v1135_v0 = vmul.f32 0.0625, %v1079_v6 }
 0x2c9   : > { %v1132_v27 = vmul.f32 0.0625, %v1070_v58  ;;  %v1198_v6 = vmul.f32 %v4373_v60, %v4373_v60 }
 0x2ca   : > { %v4384_v20 = vsub.f32 %v4182_v62, %v1135_v0 }
 0x2cb   : > { %v4376_v24 = vsub.f32 %v4178_v42, %v1132_v27  ;;  %v1073_v22 = vpop.xlane.xlu1 %1072 }
 0x2cc   : > { %v1133_v63 = vmul.f32 0.0625, %v1073_v22  ;;  %v1088_v52 = vpop.xlane.xlu0 %1087 }
 0x2cd   : > { %v1196_v59 = vmul.f32 %v4376_v24, %v4376_v24  ;;  %v1138_v32 = vmul.f32 0.0625, %v1088_v52 }
 0x2ce   : > { %v4387_v44 = vsub.f32 %v4185_v13, %v1133_v63  ;;  %v1199_v63 = vmul.f32 %v4384_v20, %v4384_v20 }
 0x2cf   : > { %v1091_v17 = vpop.xlane.xlu1 %1090  ;;  %v1260_v48 = vsel %vm528_vm1, %v1196_v59, 0.0  ;;  %v4398_v50 = vsub.f32 %v4197_v56, %v1138_v32 }
 0x2d0   : > { %1261 = vadd.xlane.f32.xlu0 %v1260_v48  ;;  %v1082_v58 = vpop.xlane.xlu0 %1081  ;;  %v1197_v27 = vmul.f32 %v4387_v44, %v4387_v44  ;;  %v1139_v41 = vmul.f32 0.0625, %v1091_v17  ;;  %v1266_v48 = vsel %vm528_vm1, %v1198_v6, 0.0  ;;  %v1269_v32 = vsel %vm528_vm1, %v1199_v63, 0.0 }
 0x2d1   : > { %v1136_v22 = vmul.f32 0.0625, %v1082_v58  ;;  %v1202_v6 = vmul.f32 %v4398_v50, %v4398_v50 }
 0x2d2   : > { %v1263_v0 = vsel %vm528_vm1, %v1197_v27, 0.0  ;;  %v4407_v58 = vsub.f32 %v4210_v31, %v1139_v41 }
 0x2d3   : > { %v4401_v52 = vsub.f32 %v4206_v57, %v1136_v22  ;;  %1264 = vadd.xlane.f32.xlu1 %v1263_v0  ;;  %v1085_v59 = vpop.xlane.xlu1 %1084 }
 0x2d4   : > { %v1137_v62 = vmul.f32 0.0625, %v1085_v59  ;;  %1267 = vadd.xlane.f32.xlu0 %v1266_v48  ;;  %v1100_v9 = vpop.xlane.xlu0 %1099  ;;  %v1203_v63 = vmul.f32 %v4407_v58, %v4407_v58 }
 0x2d5   : > { %v1200_v17 = vmul.f32 %v4401_v52, %v4401_v52  ;;  %v1142_v22 = vmul.f32 0.0625, %v1100_v9 }
 0x2d6   : > { %v4410_v27 = vsub.f32 %v4216_v51, %v1137_v62 }
 0x2d7   : > { %1270 = vadd.xlane.f32.xlu1 %v1269_v32  ;;  %v1103_v0 = vpop.xlane.xlu1 %1102  ;;  %v1272_v56 = vsel %vm528_vm1, %v1200_v17, 0.0  ;;  %v4422_v9 = vsub.f32 %v4225_v26, %v1142_v22  ;;  %v1281_v22 = vsel %vm528_vm1, %v1203_v63, 0.0 }
 0x2d8   : > { %1273 = vadd.xlane.f32.xlu0 %v1272_v56  ;;  %v1094_v59 = vpop.xlane.xlu0 %1093  ;;  %v1201_v48 = vmul.f32 %v4410_v27, %v4410_v27  ;;  %v1143_v31 = vmul.f32 0.0625, %v1103_v0  ;;  %v1278_v56 = vsel %vm528_vm1, %v1202_v6, 0.0 }
 0x2d9   : > { %v1140_v41 = vmul.f32 0.0625, %v1094_v59  ;;  %v1206_v6 = vmul.f32 %v4422_v9, %v4422_v9 }
 0x2da   : > { %v1275_v62 = vsel %vm528_vm1, %v1201_v48, 0.0  ;;  %v4431_v59 = vsub.f32 %v4238_v55, %v1143_v31 }
 0x2db   : > { %v4425_v17 = vsub.f32 %v4234_v7, %v1140_v41  ;;  %1276 = vadd.xlane.f32.xlu1 %v1275_v62  ;;  %v1097_v32 = vpop.xlane.xlu1 %1096 }
 0x2dc   : > { %v1141_v57 = vmul.f32 0.0625, %v1097_v32  ;;  %1279 = vadd.xlane.f32.xlu0 %v1278_v56  ;;  %v1112_v51 = vpop.xlane.xlu0 %1111  ;;  %v1207_v63 = vmul.f32 %v4431_v59, %v4431_v59 }
 0x2dd   : > { %v1204_v0 = vmul.f32 %v4425_v17, %v4425_v17  ;;  %v1146_v41 = vmul.f32 0.0625, %v1112_v51 }
 0x2de   : > { %v4434_v48 = vsub.f32 %v4244_v12, %v1141_v57 }
 0x2df   : > { %1282 = vadd.xlane.f32.xlu1 %v1281_v22  ;;  %v1115_v62 = vpop.xlane.xlu1 %1114  ;;  %v1284_v26 = vsel %vm528_vm1, %v1204_v0, 0.0  ;;  %v4446_v51 = vsub.f32 %v4253_v54, %v1146_v41  ;;  %v1293_v41 = vsel %vm528_vm1, %v1207_v63, 0.0 }
 0x2e0   : > { %1285 = vadd.xlane.f32.xlu0 %v1284_v26  ;;  %v1106_v32 = vpop.xlane.xlu0 %1105  ;;  %v1205_v56 = vmul.f32 %v4434_v48, %v4434_v48  ;;  %v1147_v55 = vmul.f32 0.0625, %v1115_v62  ;;  %v1290_v26 = vsel %vm528_vm1, %v1206_v6, 0.0 }
 0x2e1   : > { %v1144_v31 = vmul.f32 0.0625, %v1106_v32 }
 0x2e2   : > { %v1287_v57 = vsel %vm528_vm1, %v1205_v56, 0.0  ;;  %v4455_v32 = vsub.f32 %v4265_v18, %v1147_v55 }
 0x2e3   : > { %v4449_v0 = vsub.f32 %v4262_v23, %v1144_v31  ;;  %1288 = vadd.xlane.f32.xlu1 %v1287_v57  ;;  %v1109_v22 = vpop.xlane.xlu1 %1108  ;;  %v1210_v57 = vmul.f32 %v4446_v51, %v4446_v51 }
 0x2e4   : > { %v1145_v7 = vmul.f32 0.0625, %v1109_v22  ;;  %1291 = vadd.xlane.f32.xlu0 %v1290_v26  ;;  %v1211_v55 = vmul.f32 %v4455_v32, %v4455_v32  ;;  %v4474_v26 = vld [vmem:[%s5076_s1 + $0x38] sm:$0xff]  }
 0x2e5   : > { %v1208_v62 = vmul.f32 %v4449_v0, %v4449_v0  ;;  %3263 = vmatprep.subr.bf16.mxu1 %v4474_v26 }
 0x2e6   : > { %v4458_v56 = vsub.f32 %v4270_v16, %v1145_v7  ;;  %v1302_v7 = vsel %vm528_vm1, %v1210_v57, 0.0  ;;  %v1305_v63 = vsel %vm528_vm1, %v1211_v55, 0.0 }
 0x2e7   : > { %1294 = vadd.xlane.f32.xlu1 %v1293_v41  ;;  %v1296_v31 = vsel %vm528_vm1, %v1208_v62, 0.0 }
 0x2e8   : > { %1297 = vadd.xlane.f32.xlu0 %v1296_v31  ;;  %v1209_v6 = vmul.f32 %v4458_v56, %v4458_v56 }
 0x2ea   : > { %v1299_v22 = vsel %vm528_vm1, %v1209_v6, 0.0 }
 0x2eb   : > { %1300 = vadd.xlane.f32.xlu1 %v1299_v22 }
 0x2ec   : > { %1303 = vadd.xlane.f32.xlu0 %v1302_v7 }
 0x2ef   : > { %1306 = vadd.xlane.f32.xlu1 %v1305_v63 }
 0x32c   : > { %v1214_v62 = vpop.xlane.xlu0 %1213 }
 0x32d   : > { %v1308_v41 = vmul.f32 0.0625, %v1214_v62 }
 0x32f   : > { %v1340_v31 = vadd.f32 1e-05, %v1308_v41 }
 0x331   : > { %3455 = vrsqrt.f32 %v1340_v31  ;;  %v1217_v6 = vpop.xlane.xlu1 %1216  ;;  %v1220_v54 = vpop.xlane.xlu0 %1219 }
 0x332   : > { %v1309_v22 = vmul.f32 0.0625, %v1217_v6  ;;  %v1310_v18 = vmul.f32 0.0625, %v1220_v54 }
 0x334   : > { %v1341_v57 = vadd.f32 1e-05, %v1309_v22  ;;  %v1342_v7 = vadd.f32 1e-05, %v1310_v18 }
 0x335   : > { %v1223_v16 = vpop.xlane.xlu1 %1222  ;;  %v1226_v55 = vpop.xlane.xlu0 %1225 }
 0x336   : > { %3457 = vrsqrt.f32 %v1341_v57  ;;  %v1311_v63 = vmul.f32 0.0625, %v1223_v16  ;;  %v1312_v23 = vmul.f32 0.0625, %v1226_v55 }
 0x337   : > { %3459 = vrsqrt.f32 %v1342_v7 }
 0x338   : > { %v1343_v12 = vadd.f32 1e-05, %v1311_v63  ;;  %v1344_v42 = vadd.f32 1e-05, %v1312_v23 }
 0x339   : > { %v1229_v10 = vpop.xlane.xlu1 %1228  ;;  %v1232_v13 = vpop.xlane.xlu0 %1231 }
 0x33a   : > { %3461 = vrsqrt.f32 %v1343_v12  ;;  %v1313_v62 = vmul.f32 0.0625, %v1229_v10  ;;  %v1314_v41 = vmul.f32 0.0625, %v1232_v13  ;;  %v4481_v12 = vld [vmem:[%s5077_s2 + $0x3] ss:$0 sm:$0xff] }
 0x33b   : > { %3463 = vrsqrt.f32 %v1344_v42 }
 0x33c   : > { %v1345_v31 = vadd.f32 1e-05, %v1313_v62  ;;  %v1346_v30 = vadd.f32 1e-05, %v1314_v41 }
 0x33d   : > { %v1235_v6 = vpop.xlane.xlu1 %1234  ;;  %v1238_v54 = vpop.xlane.xlu0 %1237 }
 0x33e   : > { %v3456_v22 = vpop.eup %3455  ;;  %3465 = vrsqrt.f32 %v1345_v31  ;;  %v1315_v18 = vmul.f32 0.0625, %v1235_v6  ;;  %v1316_v39 = vmul.f32 0.0625, %v1238_v54 }
 0x33f   : > { %3467 = vrsqrt.f32 %v1346_v30  ;;  %v1404_v16 = vmul.f32 %v3456_v22, %v4277_v40 }
 0x340   : > { %v1347_v57 = vadd.f32 1e-05, %v1315_v18  ;;  %v1348_v7 = vadd.f32 1e-05, %v1316_v39  ;;  %v4487_v39 = vld [vmem:[%s5077_s2 + $0x4] ss:$0 sm:$0xff] }
 0x341   : > { %v1241_v10 = vpop.xlane.xlu1 %1240  ;;  %v1244_v42 = vpop.xlane.xlu0 %1243  ;;  %v1440_v63 = vmul.f32 %v4481_v12, %v1404_v16 }
 0x342   : > { %3469 = vrsqrt.f32 %v1347_v57  ;;  %v1317_v13 = vmul.f32 0.0625, %v1241_v10  ;;  %v1318_v23 = vmul.f32 0.0625, %v1244_v42 }
 0x343   : > { %v3458_v55 = vpop.eup %3457  ;;  %3471 = vrsqrt.f32 %v1348_v7  ;;  %v1476_v7 = vadd.f32 %v4487_v39, %v1440_v63 }
 0x344   : > { %v3460_v62 = vpop.eup %3459  ;;  %v1349_v30 = vadd.f32 1e-05, %v1317_v13  ;;  %v1350_v41 = vadd.f32 1e-05, %v1318_v23  ;;  %v1405_v40 = vmul.f32 %v3458_v55, %v4283_v19 }
 0x345   : > { %v1247_v31 = vpop.xlane.xlu1 %1246  ;;  %v1250_v6 = vpop.xlane.xlu0 %1249  ;;  %v1406_v54 = vmul.f32 %v3460_v62, %v4286_v38 }
 0x346   : > { %3473 = vrsqrt.f32 %v1349_v30  ;;  %v1319_v22 = vmul.f32 0.0625, %v1247_v31  ;;  %v1320_v18 = vmul.f32 0.0625, %v1250_v6  ;;  %v1441_v57 = vmul.f32 %v4481_v12, %v1405_v40 }
 0x347   : > { %v3462_v16 = vpop.eup %3461  ;;  %3475 = vrsqrt.f32 %v1350_v41  ;;  %v1442_v38 = vmul.f32 %v4481_v12, %v1406_v54 }
 0x348   : > { %v3464_v10 = vpop.eup %3463  ;;  %v1351_v42 = vadd.f32 1e-05, %v1319_v22  ;;  %v1352_v13 = vadd.f32 1e-05, %v1320_v18  ;;  %v1477_v23 = vadd.f32 %v4487_v39, %v1441_v57  ;;  %v1407_v19 = vmul.f32 %v3462_v16, %v4293_v53 }
 0x349   : > { %v1253_v55 = vpop.xlane.xlu1 %1252  ;;  %v1256_v34 = vpop.xlane.xlu0 %1255  ;;  %v1408_v62 = vmul.f32 %v3464_v10, %v4296_v11  ;;  %v1478_v11 = vadd.f32 %v4487_v39, %v1442_v38 }
 0x34a   : > { %3477 = vrsqrt.f32 %v1351_v42  ;;  %v1321_v30 = vmul.f32 0.0625, %v1253_v55  ;;  %v1322_v40 = vmul.f32 0.0625, %v1256_v34  ;;  %v1510_v31 = vpack.c.bf16 %v1477_v23, %v1476_v7 }
 0x34b   : > { %v3466_v41 = vpop.eup %3465  ;;  %3479 = vrsqrt.f32 %v1352_v13  ;;  %v1443_v63 = vmul.f32 %v4481_v12, %v1407_v19  ;;  %v1444_v6 = vmul.f32 %v4481_v12, %v1408_v62 }
 0x34c   : > { %v3468_v22 = vpop.eup %3467  ;;  %v1353_v18 = vadd.f32 1e-05, %v1321_v30  ;;  %v1354_v57 = vadd.f32 1e-05, %v1322_v40  ;;  %3231 = vmatprep.mubr.msk.bf16.mxu1 %vm528_vm1, %v1510_v31  ;;  %v1409_v53 = vmul.f32 %v3466_v41, %v4305_v1  ;;  %v3382_v1 = vld [vmem:[%s5076_s1 + $0x30] sm:$0xff]  }
 0x34d   : > { %v1259_v54 = vpop.xlane.xlu1 %1258  ;;  %v1479_v16 = vadd.f32 %v4487_v39, %v1443_v63  ;;  %v1410_v34 = vmul.f32 %v3468_v22, %v4308_v21  ;;  %v1480_v23 = vadd.f32 %v4487_v39, %v1444_v6 }
 0x34e   : > { %3481 = vrsqrt.f32 %v1353_v18  ;;  %v1323_v7 = vmul.f32 0.0625, %v1259_v54  ;;  %v1445_v10 = vmul.f32 %v4481_v12, %v1409_v53 }
 0x34f   : > { %v3470_v42 = vpop.eup %3469  ;;  %3483 = vrsqrt.f32 %v1354_v57  ;;  %v1511_v13 = vpack.c.bf16 %v1479_v16, %v1478_v11  ;;  %v1446_v21 = vmul.f32 %v4481_v12, %v1410_v34 }
 0x350   : > { %v3472_v19 = vpop.eup %3471  ;;  %v1355_v55 = vadd.f32 1e-05, %v1323_v7  ;;  %v1481_v38 = vadd.f32 %v4487_v39, %v1445_v10  ;;  %v1411_v62 = vmul.f32 %v3470_v42, %v4317_v8 }
 0x351   : > { %3232 = vmatmul.mubr.msk.bf16.vlgmr.msra.gmra.mxu1 %vm528_vm1, %v1511_v13  ;;  %v1412_v30 = vmul.f32 %v3472_v19, %v4320_v46  ;;  %v1482_v6 = vadd.f32 %v4487_v39, %v1446_v21 }
 0x352   : > { %3485 = vrsqrt.f32 %v1355_v55  ;;  %v1512_v40 = vpack.c.bf16 %v1481_v38, %v1480_v23  ;;  %v1447_v31 = vmul.f32 %v4481_v12, %v1411_v62  ;;  %3264 = vmatpush3.bf16.msra.mxu1 %v4474_v26 }
 0x353   : > { %v3474_v41 = vpop.eup %3473  ;;  %3265 = vmatprep.subr.bf16.mxu1 %v3382_v1  ;;  %v1448_v18 = vmul.f32 %v4481_v12, %v1412_v30 }
 0x354   : > { %v3476_v63 = vpop.eup %3475  ;;  %3235 = vmatprep.mubr.msk.bf16.mxu1 %vm528_vm1, %v1512_v40  ;;  %v1483_v8 = vadd.f32 %v4487_v39, %v1447_v31  ;;  %v1413_v22 = vmul.f32 %v3474_v41, %v4329_v4 }
 0x355   : > { %v1414_v46 = vmul.f32 %v3476_v63, %v4332_v61  ;;  %v1484_v11 = vadd.f32 %v4487_v39, %v1448_v18 }
 0x356   : > { %v1513_v57 = vpack.c.bf16 %v1483_v8, %v1482_v6  ;;  %v1449_v53 = vmul.f32 %v4481_v12, %v1413_v22  ;;  %3266 = vmatpush3.bf16.msra.mxu1 %v3382_v1 }
 0x357   : > { %v3478_v26 = vpop.eup %3477  ;;  %v1450_v7 = vmul.f32 %v4481_v12, %v1414_v46 }
 0x358   : > { %v3480_v54 = vpop.eup %3479  ;;  %v1485_v16 = vadd.f32 %v4487_v39, %v1449_v53  ;;  %v1415_v34 = vmul.f32 %v3478_v26, %v4341_v45 }
 0x359   : > { %3236 = vmatmul.mubr.msk.bf16.gmra.mxu1 %vm528_vm1, %v1513_v57  ;;  %v1262_v4 = vpop.xlane.xlu0 %1261  ;;  %v1416_v10 = vmul.f32 %v3480_v54, %v4344_v29  ;;  %v1486_v45 = vadd.f32 %v4487_v39, %v1450_v7 }
 0x35a   : > { %v1324_v61 = vmul.f32 0.0625, %v1262_v4  ;;  %v1514_v42 = vpack.c.bf16 %v1485_v16, %v1484_v11  ;;  %v1451_v13 = vmul.f32 %v4481_v12, %v1415_v34 }
 0x35b   : > { %v3482_v23 = vpop.eup %3481  ;;  %v1452_v1 = vmul.f32 %v4481_v12, %v1416_v10 }
 0x35c   : > { %v3484_v19 = vpop.eup %3483  ;;  %v1356_v55 = vadd.f32 1e-05, %v1324_v61  ;;  %3239 = vmatprep.mubr.msk.bf16.mxu1 %vm528_vm1, %v1514_v42  ;;  %v1265_v38 = vpop.xlane.xlu1 %1264  ;;  %v1487_v62 = vadd.f32 %v4487_v39, %v1451_v13  ;;  %v1417_v21 = vmul.f32 %v3482_v23, %v4353_v2 }
 0x35d   : > { %v1325_v30 = vmul.f32 0.0625, %v1265_v38  ;;  %v1268_v29 = vpop.xlane.xlu0 %1267  ;;  %v1418_v40 = vmul.f32 %v3484_v19, %v4356_v5  ;;  %v1488_v22 = vadd.f32 %v4487_v39, %v1452_v1 }
 0x35e   : > { %3487 = vrsqrt.f32 %v1356_v55  ;;  %v1326_v31 = vmul.f32 0.0625, %v1268_v29  ;;  %v1515_v41 = vpack.c.bf16 %v1487_v62, %v1486_v45  ;;  %v1453_v63 = vmul.f32 %v4481_v12, %v1417_v21 }
 0x35f   : > { %v3486_v6 = vpop.eup %3485  ;;  %v1357_v8 = vadd.f32 1e-05, %v1325_v30  ;;  %v1454_v2 = vmul.f32 %v4481_v12, %v1418_v40 }
 0x360   : > { %v1358_v18 = vadd.f32 1e-05, %v1326_v31  ;;  %v1271_v46 = vpop.xlane.xlu1 %1270  ;;  %v1489_v57 = vadd.f32 %v4487_v39, %v1453_v63  ;;  %v1419_v53 = vmul.f32 %v3486_v6, %v4365_v28 }
 0x361   : > { %3489 = vrsqrt.f32 %v1357_v8  ;;  %3240 = vmatmul.mubr.msk.bf16.gmra.mxu1 %vm528_vm1, %v1515_v41  ;;  %v1327_v5 = vmul.f32 0.0625, %v1271_v46  ;;  %v1274_v26 = vpop.xlane.xlu0 %1273  ;;  %v1490_v10 = vadd.f32 %v4487_v39, %v1454_v2 }
 0x362   : > { %3491 = vrsqrt.f32 %v1358_v18  ;;  %v1328_v54 = vmul.f32 0.0625, %v1274_v26  ;;  %v1516_v11 = vpack.c.bf16 %v1489_v57, %v1488_v22  ;;  %v1455_v16 = vmul.f32 %v4481_v12, %v1419_v53 }
 0x363   : > { %v1359_v34 = vadd.f32 1e-05, %v1327_v5 }
 0x364   : > { %v1360_v7 = vadd.f32 1e-05, %v1328_v54  ;;  %3243 = vmatprep.mubr.msk.bf16.mxu1 %vm528_vm1, %v1516_v11  ;;  %v1277_v4 = vpop.xlane.xlu1 %1276  ;;  %v1491_v28 = vadd.f32 %v4487_v39, %v1455_v16 }
 0x365   : > { %3493 = vrsqrt.f32 %v1359_v34  ;;  %v1329_v61 = vmul.f32 0.0625, %v1277_v4  ;;  %v1280_v42 = vpop.xlane.xlu0 %1279 }
 0x366   : > { %3495 = vrsqrt.f32 %v1360_v7  ;;  %v1330_v13 = vmul.f32 0.0625, %v1280_v42  ;;  %v1517_v23 = vpack.c.bf16 %v1491_v28, %v1490_v10 }
 0x367   : > { %v1361_v1 = vadd.f32 1e-05, %v1329_v61 }
 0x368   : > { %v1362_v19 = vadd.f32 1e-05, %v1330_v13  ;;  %v1283_v55 = vpop.xlane.xlu1 %1282 }
 0x369   : > { %3497 = vrsqrt.f32 %v1361_v1  ;;  %3244 = vmatmul.mubr.msk.bf16.gmra.mxu1 %vm528_vm1, %v1517_v23  ;;  %v1331_v38 = vmul.f32 0.0625, %v1283_v55  ;;  %v1286_v45 = vpop.xlane.xlu0 %1285 }
 0x36a   : > { %3499 = vrsqrt.f32 %v1362_v19  ;;  %v1332_v62 = vmul.f32 0.0625, %v1286_v45 }
 0x36b   : > { %v3488_v21 = vpop.eup %3487  ;;  %v1363_v30 = vadd.f32 1e-05, %v1331_v38 }
 0x36c   : > { %v1364_v29 = vadd.f32 1e-05, %v1332_v62  ;;  %v1289_v40 = vpop.xlane.xlu1 %1288  ;;  %v1420_v31 = vmul.f32 %v3488_v21, %v4376_v24 }
 0x36d   : > { %3501 = vrsqrt.f32 %v1363_v30  ;;  %v1333_v41 = vmul.f32 0.0625, %v1289_v40  ;;  %v1292_v63 = vpop.xlane.xlu0 %1291 }
 0x36e   : > { %v3490_v6 = vpop.eup %3489  ;;  %3503 = vrsqrt.f32 %v1364_v29  ;;  %v1334_v8 = vmul.f32 0.0625, %v1292_v63  ;;  %v1456_v22 = vmul.f32 %v4481_v12, %v1420_v31 }
 0x36f   : > { %v3492_v18 = vpop.eup %3491  ;;  %v1365_v46 = vadd.f32 1e-05, %v1333_v41  ;;  %v1421_v57 = vmul.f32 %v3490_v6, %v4387_v44 }
 0x370   : > { %v1366_v53 = vadd.f32 1e-05, %v1334_v8  ;;  %v1295_v2 = vpop.xlane.xlu1 %1294  ;;  %v1422_v5 = vmul.f32 %v3492_v18, %v4373_v60  ;;  %v1492_v34 = vadd.f32 %v4487_v39, %v1456_v22 }
 0x371   : > { %3505 = vrsqrt.f32 %v1365_v46  ;;  %v1335_v26 = vmul.f32 0.0625, %v1295_v2  ;;  %v1298_v54 = vpop.xlane.xlu0 %1297  ;;  %v1457_v24 = vmul.f32 %v4481_v12, %v1421_v57 }
 0x372   : > { %v3494_v11 = vpop.eup %3493  ;;  %3507 = vrsqrt.f32 %v1366_v53  ;;  %v1336_v16 = vmul.f32 0.0625, %v1298_v54  ;;  %v1458_v28 = vmul.f32 %v4481_v12, %v1422_v5 }
 0x373   : > { %v3496_v7 = vpop.eup %3495  ;;  %v1367_v4 = vadd.f32 1e-05, %v1335_v26  ;;  %v1493_v10 = vadd.f32 %v4487_v39, %v1457_v24  ;;  %v1423_v44 = vmul.f32 %v3494_v11, %v4384_v20 }
 0x374   : > { %v1368_v61 = vadd.f32 1e-05, %v1336_v16  ;;  %v1301_v60 = vpop.xlane.xlu1 %1300  ;;  %v1424_v42 = vmul.f32 %v3496_v7, %v4401_v52  ;;  %v1494_v20 = vadd.f32 %v4487_v39, %v1458_v28 }
 0x375   : > { %3509 = vrsqrt.f32 %v1367_v4  ;;  %v1337_v13 = vmul.f32 0.0625, %v1301_v60  ;;  %v1304_v23 = vpop.xlane.xlu0 %1303  ;;  %v1518_v1 = vpack.c.bf16 %v1493_v10, %v1492_v34  ;;  %v1459_v19 = vmul.f32 %v4481_v12, %v1423_v44 }
 0x376   : > { %v3498_v55 = vpop.eup %3497  ;;  %3511 = vrsqrt.f32 %v1368_v61  ;;  %v1338_v38 = vmul.f32 0.0625, %v1304_v23  ;;  %v1460_v45 = vmul.f32 %v4481_v12, %v1424_v42 }
 0x377   : > { %v3500_v62 = vpop.eup %3499  ;;  %v1369_v21 = vadd.f32 1e-05, %v1337_v13  ;;  %3247 = vmatprep.mubr.msk.bf16.mxu1 %vm528_vm1, %v1518_v1  ;;  %v1495_v30 = vadd.f32 %v4487_v39, %v1459_v19  ;;  %v1425_v52 = vmul.f32 %v3498_v55, %v4410_v27 }
 0x378   : > { %v1370_v29 = vadd.f32 1e-05, %v1338_v38  ;;  %v1307_v40 = vpop.xlane.xlu1 %1306  ;;  %v1426_v31 = vmul.f32 %v3500_v62, %v4398_v50  ;;  %v1496_v22 = vadd.f32 %v4487_v39, %v1460_v45 }
 0x379   : > { %3513 = vrsqrt.f32 %v1369_v21  ;;  %v1339_v41 = vmul.f32 0.0625, %v1307_v40  ;;  %v1519_v63 = vpack.c.bf16 %v1495_v30, %v1494_v20  ;;  %v1461_v6 = vmul.f32 %v4481_v12, %v1425_v52 }
 0x37a   : > { %v3502_v8 = vpop.eup %3501  ;;  %3515 = vrsqrt.f32 %v1370_v29  ;;  %v1462_v53 = vmul.f32 %v4481_v12, %v1426_v31 }
 0x37b   : > { %v3504_v18 = vpop.eup %3503  ;;  %v1371_v46 = vadd.f32 1e-05, %v1339_v41  ;;  %3248 = vmatmul.mubr.msk.bf16.gmra.mxu1 %vm528_vm1, %v1519_v63  ;;  %v1497_v57 = vadd.f32 %v4487_v39, %v1461_v6  ;;  %v1427_v27 = vmul.f32 %v3502_v8, %v4407_v58  ;;  %v3383_v41 = vld [vmem:[%s5076_s1 + $0x28] sm:$0xff]  }
 0x37c   : > { %v1428_v50 = vmul.f32 %v3504_v18, %v4425_v17  ;;  %v1498_v24 = vadd.f32 %v4487_v39, %v1462_v53  ;;  %3267 = vmatprep.subr.bf16.mxu1 %v3383_v41 }
 0x37d   : > { %3517 = vrsqrt.f32 %v1371_v46  ;;  %v1520_v2 = vpack.c.bf16 %v1497_v57, %v1496_v22  ;;  %v1463_v5 = vmul.f32 %v4481_v12, %v1427_v27  ;;  %3268 = vmatpush3.bf16.msra.mxu1 %v3383_v41 }
 0x37e   : > { %v3506_v26 = vpop.eup %3505  ;;  %v1464_v58 = vmul.f32 %v4481_v12, %v1428_v50 }
 0x37f   : > { %v3508_v54 = vpop.eup %3507  ;;  %3251 = vmatprep.mubr.msk.bf16.mxu1 %vm528_vm1, %v1520_v2  ;;  %v1499_v11 = vadd.f32 %v4487_v39, %v1463_v5  ;;  %v1429_v16 = vmul.f32 %v3506_v26, %v4434_v48 }
 0x380   : > { %v1430_v34 = vmul.f32 %v3508_v54, %v4422_v9  ;;  %v1500_v44 = vadd.f32 %v4487_v39, %v1464_v58 }
 0x381   : > { %v1521_v7 = vpack.c.bf16 %v1499_v11, %v1498_v24  ;;  %v1465_v17 = vmul.f32 %v4481_v12, %v1429_v16 }
 0x382   : > { %v3510_v4 = vpop.eup %3509  ;;  %v1466_v60 = vmul.f32 %v4481_v12, %v1430_v34 }
 0x383   : > { %v3512_v10 = vpop.eup %3511  ;;  %3252 = vmatmul.mubr.msk.bf16.gmra.mxu1 %vm528_vm1, %v1521_v7  ;;  %v1501_v28 = vadd.f32 %v4487_v39, %v1465_v17  ;;  %v1431_v61 = vmul.f32 %v3510_v4, %v4431_v59 }
 0x384   : > { %v1432_v48 = vmul.f32 %v3512_v10, %v4449_v0  ;;  %v1502_v1 = vadd.f32 %v4487_v39, %v1466_v60 }
 0x385   : > { %v1522_v42 = vpack.c.bf16 %v1501_v28, %v1500_v44  ;;  %v1467_v9 = vmul.f32 %v4481_v12, %v1431_v61 }
 0x386   : > { %v3514_v13 = vpop.eup %3513  ;;  %v1468_v38 = vmul.f32 %v4481_v12, %v1432_v48 }
 0x387   : > { %v3516_v23 = vpop.eup %3515  ;;  %3255 = vmatprep.mubr.msk.bf16.mxu1 %vm528_vm1, %v1522_v42  ;;  %v1503_v19 = vadd.f32 %v4487_v39, %v1467_v9  ;;  %v1433_v55 = vmul.f32 %v3514_v13, %v4458_v56 }
 0x388   : > { %v1434_v59 = vmul.f32 %v3516_v23, %v4446_v51  ;;  %v1504_v21 = vadd.f32 %v4487_v39, %v1468_v38 }
 0x389   : > { %v1523_v45 = vpack.c.bf16 %v1503_v19, %v1502_v1  ;;  %v1469_v0 = vmul.f32 %v4481_v12, %v1433_v55 }
 0x38a   : > { %v3518_v62 = vpop.eup %3517  ;;  %v1470_v52 = vmul.f32 %v4481_v12, %v1434_v59 }
 0x38b   : > { %3256 = vmatmul.mubr.msk.bf16.gmra.mxu1 %vm528_vm1, %v1523_v45  ;;  %v1505_v20 = vadd.f32 %v4487_v39, %v1469_v0  ;;  %v1435_v30 = vmul.f32 %v3518_v62, %v4455_v32  ;;  %v3384_v32 = vld [vmem:[%s5076_s1 + $0x20] sm:$0xff]  }
 0x38c   : > { %v1506_v51 = vadd.f32 %v4487_v39, %v1470_v52  ;;  %3269 = vmatprep.subr.bf16.mxu1 %v3384_v32 }
 0x38d   : > { %v1524_v29 = vpack.c.bf16 %v1505_v20, %v1504_v21  ;;  %v1471_v56 = vmul.f32 %v4481_v12, %v1435_v30  ;;  %3270 = vmatpush3.bf16.msra.mxu1 %v3384_v32  ;;  %v3385_v12 = vld [vmem:[%s5076_s1 + $0x48] sm:$0xff]  }
 0x38e   : > { %3303 = vmatprep.subr.bf16.mxu0 %v3385_v12 }
 0x38f   : > { %3259 = vmatprep.mubr.msk.bf16.mxu1 %vm528_vm1, %v1524_v29  ;;  %v1507_v40 = vadd.f32 %v4487_v39, %v1471_v56  ;;  %3304 = vmatpush3.bf16.msra.mxu0 %v3385_v12  ;;  %v4615_v39 = vld [vmem:[%s5077_s2 + $0x5] ss:$0 sm:$0xff] }
 0x391   : > { %v1525_v31 = vpack.c.bf16 %v1507_v40, %v1506_v51 }
 0x393   : > { %3260 = vmatmul.mubr.msk.bf16.gmra.mxu1 %vm528_vm1, %v1525_v31 }
 0x411   : > { %v3233_v63 = vpop.f32.mrf.mxu1 }
 0x412   : > { %v4618_v6 = vadd.f32 %v3233_v63, %v4615_v39 }
 0x413   : > { %v1619_v8 = vpop.f32.mrf.mxu1 }
 0x414   : > { %v1748_v22 = vmul.f32 %v4618_v6, %v4618_v6  ;;  %v4623_v18 = vadd.f32 %v4615_v39, %v1619_v8 }
 0x415   : > { %v3234_v46 = vpop.f32.mrf.mxu1 }
 0x416   : > { %v1780_v57 = vmul.f32 %v1748_v22, %v4618_v6  ;;  %v1746_v27 = vmul.f32 %v4623_v18, %v4623_v18  ;;  %v4629_v53 = vadd.f32 %v3234_v46, %v4615_v39 }
 0x417   : > { %v1622_v50 = vpop.f32.mrf.mxu1 }
 0x418   : > { %v1812_v2 = vmul.f32 0.044715, %v1780_v57  ;;  %v1778_v5 = vmul.f32 %v1746_v27, %v4623_v18  ;;  %v1749_v26 = vmul.f32 %v4629_v53, %v4629_v53  ;;  %v4635_v54 = vadd.f32 %v4615_v39, %v1622_v50 }
 0x419   : > { %v3237_v24 = vpop.f32.mrf.mxu1 }
 0x41a   : > { %v1844_v11 = vadd.f32 %v1812_v2, %v4618_v6  ;;  %v1810_v16 = vmul.f32 0.044715, %v1778_v5  ;;  %v1781_v58 = vmul.f32 %v1749_v26, %v4629_v53  ;;  %v1747_v34 = vmul.f32 %v4635_v54, %v4635_v54 }
 0x41b   : > { %v4642_v7 = vadd.f32 %v3237_v24, %v4615_v39  ;;  %v1635_v17 = vpop.f32.mrf.mxu1 }
 0x41c   : > { %v1876_v4 = vmul.f32 0.7978846, %v1844_v11  ;;  %v1842_v10 = vadd.f32 %v1810_v16, %v4623_v18  ;;  %v1813_v44 = vmul.f32 0.044715, %v1781_v58  ;;  %v1779_v28 = vmul.f32 %v1747_v34, %v4635_v54 }
 0x41d   : > { %v1752_v61 = vmul.f32 %v4642_v7, %v4642_v7  ;;  %v4649_v60 = vadd.f32 %v4615_v39, %v1635_v17  ;;  %v3238_v48 = vpop.f32.mrf.mxu1 }
 0x41e   : > { %3519 = vtanh.f32 %v1876_v4  ;;  %v1874_v42 = vmul.f32 0.7978846, %v1842_v10  ;;  %v1845_v9 = vadd.f32 %v1813_v44, %v4629_v53  ;;  %v1811_v13 = vmul.f32 0.044715, %v1779_v28 }
 0x41f   : > { %v1784_v23 = vmul.f32 %v1752_v61, %v4642_v7  ;;  %v1750_v1 = vmul.f32 %v4649_v60, %v4649_v60  ;;  %v4656_v19 = vadd.f32 %v3238_v48, %v4615_v39  ;;  %v1638_v55 = vpop.f32.mrf.mxu1 }
 0x420   : > { %3521 = vtanh.f32 %v1874_v42  ;;  %v1877_v38 = vmul.f32 0.7978846, %v1845_v9  ;;  %v1843_v59 = vadd.f32 %v1811_v13, %v4635_v54  ;;  %v4660_v45 = vadd.f32 %v4615_v39, %v1638_v55 }
 0x421   : > { %v1816_v0 = vmul.f32 0.044715, %v1784_v23  ;;  %v1782_v62 = vmul.f32 %v1750_v1, %v4649_v60  ;;  %v1753_v21 = vmul.f32 %v4656_v19, %v4656_v19  ;;  %v3241_v20 = vpop.f32.mrf.mxu1 }
 0x422   : > { %3523 = vtanh.f32 %v1877_v38  ;;  %v1875_v30 = vmul.f32 0.7978846, %v1843_v59  ;;  %v1751_v52 = vmul.f32 %v4660_v45, %v4660_v45  ;;  %v4668_v29 = vadd.f32 %v3241_v20, %v4615_v39 }
 0x423   : > { %v1848_v56 = vadd.f32 %v1816_v0, %v4642_v7  ;;  %v1814_v51 = vmul.f32 0.044715, %v1782_v62  ;;  %v1785_v40 = vmul.f32 %v1753_v21, %v4656_v19  ;;  %v1651_v31 = vpop.f32.mrf.mxu1 }
 0x424   : > { %3525 = vtanh.f32 %v1875_v30  ;;  %v1783_v41 = vmul.f32 %v1751_v52, %v4660_v45  ;;  %v1756_v32 = vmul.f32 %v4668_v29, %v4668_v29  ;;  %v4676_v12 = vadd.f32 %v4615_v39, %v1651_v31 }
 0x425   : > { %v1880_v63 = vmul.f32 0.7978846, %v1848_v56  ;;  %v1846_v8 = vadd.f32 %v1814_v51, %v4649_v60  ;;  %v1817_v22 = vmul.f32 0.044715, %v1785_v40  ;;  %v3242_v46 = vpop.f32.mrf.mxu1 }
 0x426   : > { %v1815_v57 = vmul.f32 0.044715, %v1783_v41  ;;  %v1788_v27 = vmul.f32 %v1756_v32, %v4668_v29  ;;  %v1754_v50 = vmul.f32 %v4676_v12, %v4676_v12  ;;  %v4683_v2 = vadd.f32 %v3242_v46, %v4615_v39 }
 0x427   : > { %3527 = vtanh.f32 %v1880_v63  ;;  %v1878_v5 = vmul.f32 0.7978846, %v1846_v8  ;;  %v1849_v26 = vadd.f32 %v1817_v22, %v4656_v19  ;;  %v1654_v24 = vpop.f32.mrf.mxu1 }
 0x428   : > { %v1847_v11 = vadd.f32 %v1815_v57, %v4660_v45  ;;  %v1820_v16 = vmul.f32 0.044715, %v1788_v27  ;;  %v1786_v58 = vmul.f32 %v1754_v50, %v4676_v12  ;;  %v1757_v34 = vmul.f32 %v4683_v2, %v4683_v2 }
 0x429   : > { %3529 = vtanh.f32 %v1878_v5  ;;  %v1881_v17 = vmul.f32 0.7978846, %v1849_v26  ;;  %v4691_v4 = vadd.f32 %v4615_v39, %v1654_v24  ;;  %v3245_v10 = vpop.f32.mrf.mxu1 }
 0x42a   : > { %v1879_v44 = vmul.f32 0.7978846, %v1847_v11  ;;  %v1852_v28 = vadd.f32 %v1820_v16, %v4668_v29  ;;  %v1818_v61 = vmul.f32 0.044715, %v1786_v58  ;;  %v1789_v48 = vmul.f32 %v1757_v34, %v4683_v2 }
 0x42b   : > { %v3520_v42 = vpop.eup %3519  ;;  %3531 = vtanh.f32 %v1881_v17  ;;  %v1755_v9 = vmul.f32 %v4691_v4, %v4691_v4  ;;  %v4698_v13 = vadd.f32 %v3245_v10, %v4615_v39  ;;  %v1667_v23 = vpop.f32.mrf.mxu1 }
 0x42c   : > { %v1940_v1 = vadd.f32 1.0, %v3520_v42  ;;  %3533 = vtanh.f32 %v1879_v44  ;;  %v1884_v55 = vmul.f32 0.7978846, %v1852_v28  ;;  %v1850_v38 = vadd.f32 %v1818_v61, %v4676_v12 }
 0x42d   : > { %v3522_v59 = vpop.eup %3521  ;;  %v1821_v0 = vmul.f32 0.044715, %v1789_v48  ;;  %v1787_v62 = vmul.f32 %v1755_v9, %v4691_v4  ;;  %v1760_v21 = vmul.f32 %v4698_v13, %v4698_v13  ;;  %v4705_v20 = vadd.f32 %v4615_v39, %v1667_v23  ;;  %v3246_v30 = vpop.f32.mrf.mxu1 }
 0x42e   : > { %v1972_v52 = vmul.f32 0.5, %v1940_v1  ;;  %v1938_v56 = vadd.f32 1.0, %v3522_v59  ;;  %3535 = vtanh.f32 %v1884_v55  ;;  %v1882_v51 = vmul.f32 0.7978846, %v1850_v38 }
 0x42f   : > { %v3524_v40 = vpop.eup %3523  ;;  %v1853_v31 = vadd.f32 %v1821_v0, %v4683_v2  ;;  %v1819_v41 = vmul.f32 0.044715, %v1787_v62  ;;  %v1792_v32 = vmul.f32 %v1760_v21, %v4698_v13  ;;  %v1758_v63 = vmul.f32 %v4705_v20, %v4705_v20  ;;  %v1670_v26 = vpop.f32.mrf.mxu1 }
 0x430   : > { %v2004_v8 = vmul.f32 %v1972_v52, %v4618_v6  ;;  %v1941_v22 = vadd.f32 1.0, %v3524_v40  ;;  %3537 = vtanh.f32 %v1882_v51  ;;  %v1970_v24 = vmul.f32 0.5, %v1938_v56 }
 0x431   : > { %v3526_v46 = vpop.eup %3525  ;;  %v1885_v57 = vmul.f32 0.7978846, %v1853_v31  ;;  %v1851_v27 = vadd.f32 %v1819_v41, %v4691_v4  ;;  %v1824_v50 = vmul.f32 0.044715, %v1792_v32  ;;  %v1790_v5 = vmul.f32 %v1758_v63, %v4705_v20 }
 0x432   : > { %v1973_v11 = vmul.f32 0.5, %v1941_v22  ;;  %v1939_v16 = vadd.f32 1.0, %v3526_v46  ;;  %v4715_v58 = vadd.f32 %v3246_v30, %v4615_v39  ;;  %v4722_v48 = vadd.f32 %v4615_v39, %v1670_v26 }
 0x433   : > { %3539 = vtanh.f32 %v1885_v57  ;;  %v1883_v34 = vmul.f32 0.7978846, %v1851_v27  ;;  %v1856_v6 = vadd.f32 %v1824_v50, %v4698_v13  ;;  %v1822_v17 = vmul.f32 0.044715, %v1790_v5 }
 0x434   : > { %v3528_v10 = vpop.eup %3527  ;;  %v2005_v44 = vmul.f32 %v1973_v11, %v4629_v53  ;;  %v1971_v28 = vmul.f32 0.5, %v1939_v16  ;;  %v1761_v61 = vmul.f32 %v4715_v58, %v4715_v58  ;;  %v2002_v55 = vmul.f32 %v1970_v24, %v4623_v18 }
 0x435   : > { %v1944_v42 = vadd.f32 1.0, %v3528_v10  ;;  %3541 = vtanh.f32 %v1883_v34  ;;  %v1888_v9 = vmul.f32 0.7978846, %v1856_v6  ;;  %v1854_v23 = vadd.f32 %v1822_v17, %v4705_v20 }
 0x436   : > { %v3530_v1 = vpop.eup %3529  ;;  %v2003_v38 = vmul.f32 %v1971_v28, %v4635_v54  ;;  %v1793_v59 = vmul.f32 %v1761_v61, %v4715_v58  ;;  %v1759_v53 = vmul.f32 %v4722_v48, %v4722_v48  ;;  %v2043_v30 = vpack.c.bf16 %v2005_v44, %v2004_v8 }
 0x437   : > { %v1942_v0 = vadd.f32 1.0, %v3530_v1  ;;  %3543 = vtanh.f32 %v1888_v9  ;;  %v1886_v62 = vmul.f32 0.7978846, %v1854_v23  ;;  %v1976_v31 = vmul.f32 0.5, %v1944_v42 }
 0x438   : > { %v3532_v21 = vpop.eup %3531  ;;  %v1825_v52 = vmul.f32 0.044715, %v1793_v59  ;;  %v1791_v56 = vmul.f32 %v1759_v53, %v4722_v48  ;;  %v2042_v51 = vpack.c.bf16 %v2003_v38, %v2002_v55 }
 0x439   : > { %v3534_v40 = vpop.eup %3533  ;;  %v1974_v18 = vmul.f32 0.5, %v1942_v0  ;;  %v1945_v41 = vadd.f32 1.0, %v3532_v21  ;;  %3545 = vtanh.f32 %v1886_v62  ;;  %v2008_v24 = vmul.f32 %v1976_v31, %v4642_v7 }
 0x43a   : > { %v1943_v54 = vadd.f32 1.0, %v3534_v40  ;;  %v1857_v32 = vadd.f32 %v1825_v52, %v4715_v58  ;;  %v1823_v63 = vmul.f32 0.044715, %v1791_v56  ;;  %3271 = vmatprep.mubr.msk.bf16.mxu1 %vm2087_vm2, %v2042_v51 }
 0x43b   : > { %v3536_v22 = vpop.eup %3535  ;;  %v1977_v46 = vmul.f32 0.5, %v1945_v41  ;;  %3272 = vmatmul.mubr.msk.bf16.vlgmr.msra.gmra.mxu1 %vm2087_vm2, %v2043_v30  ;;  %v3249_v8 = vpop.f32.mrf.mxu1  ;;  %v2006_v11 = vmul.f32 %v1974_v18, %v4649_v60 }
 0x43c   : > { %v1975_v57 = vmul.f32 0.5, %v1943_v54  ;;  %v1948_v27 = vadd.f32 1.0, %v3536_v22  ;;  %v1889_v50 = vmul.f32 0.7978846, %v1857_v32  ;;  %v1855_v5 = vadd.f32 %v1823_v63, %v4722_v48 }
 0x43d   : > { %v3538_v26 = vpop.eup %3537  ;;  %v2009_v16 = vmul.f32 %v1977_v46, %v4656_v19  ;;  %v4739_v34 = vadd.f32 %v3249_v8, %v4615_v39  ;;  %v1683_v6 = vpop.f32.mrf.mxu1 }
 0x43e   : > { %v2007_v17 = vmul.f32 %v1975_v57, %v4660_v45  ;;  %v1980_v10 = vmul.f32 0.5, %v1948_v27  ;;  %v1946_v44 = vadd.f32 1.0, %v3538_v26  ;;  %3547 = vtanh.f32 %v1889_v50 }
 0x43f   : > { %v1887_v28 = vmul.f32 0.7978846, %v1855_v5  ;;  %v1764_v61 = vmul.f32 %v4739_v34, %v4739_v34  ;;  %v4745_v42 = vadd.f32 %v4615_v39, %v1683_v6  ;;  %v3250_v7 = vpop.f32.mrf.mxu1  ;;  %v2045_v1 = vpack.c.bf16 %v2009_v16, %v2008_v24 }
 0x440   : > { %v3540_v60 = vpop.eup %3539  ;;  %v1978_v9 = vmul.f32 0.5, %v1946_v44  ;;  %v4748_v19 = vadd.f32 %v3250_v7, %v4615_v39  ;;  %v2044_v23 = vpack.c.bf16 %v2007_v17, %v2006_v11  ;;  %v4754_v0 = vmul.f32 %v1980_v10, %v4668_v29 }
 0x441   : > { %v1949_v55 = vadd.f32 1.0, %v3540_v60  ;;  %3549 = vtanh.f32 %v1887_v28  ;;  %v1796_v45 = vmul.f32 %v1764_v61, %v4739_v34  ;;  %v1762_v38 = vmul.f32 %v4745_v42, %v4745_v42  ;;  %v1686_v59 = vpop.f32.mrf.mxu1 }
 0x442   : > { %v3542_v53 = vpop.eup %3541  ;;  %v1765_v62 = vmul.f32 %v4748_v19, %v4748_v19  ;;  %3275 = vmatprep.mubr.msk.bf16.mxu1 %vm2087_vm2, %v2044_v23  ;;  %v4760_v21 = vadd.f32 %v4615_v39, %v1686_v59  ;;  %v2010_v29 = vmul.f32 %v1978_v9, %v4676_v12 }
 0x443   : > { %v1981_v30 = vmul.f32 0.5, %v1949_v55  ;;  %v1947_v52 = vadd.f32 1.0, %v3542_v53  ;;  %v1828_v56 = vmul.f32 0.044715, %v1796_v45  ;;  %v1794_v51 = vmul.f32 %v1762_v38, %v4745_v42  ;;  %3276 = vmatmul.mubr.msk.bf16.gmra.mxu1 %vm2087_vm2, %v2045_v1  ;;  %v3253_v40 = vpop.f32.mrf.mxu1 }
 0x444   : > { %v3544_v31 = vpop.eup %3543  ;;  %v1797_v18 = vmul.f32 %v1765_v62, %v4748_v19  ;;  %v1763_v41 = vmul.f32 %v4760_v21, %v4760_v21  ;;  %v4769_v54 = vadd.f32 %v3253_v40, %v4615_v39 }
 0x445   : > { %v2013_v32 = vmul.f32 %v1981_v30, %v4683_v2  ;;  %v1979_v63 = vmul.f32 0.5, %v1947_v52  ;;  %v1952_v22 = vadd.f32 1.0, %v3544_v31  ;;  %v1860_v46 = vadd.f32 %v1828_v56, %v4739_v34  ;;  %v1699_v8 = vpop.f32.mrf.mxu1 }
 0x446   : > { %v3546_v57 = vpop.eup %3545  ;;  %v1826_v27 = vmul.f32 0.044715, %v1794_v51  ;;  %v1829_v50 = vmul.f32 0.044715, %v1797_v18  ;;  %v1795_v12 = vmul.f32 %v1763_v41, %v4760_v21  ;;  %v1768_v5 = vmul.f32 %v4769_v54, %v4769_v54 }
 0x447   : > { %v2011_v26 = vmul.f32 %v1979_v63, %v4691_v4  ;;  %v1984_v24 = vmul.f32 0.5, %v1952_v22  ;;  %v1950_v11 = vadd.f32 1.0, %v3546_v57  ;;  %v1892_v16 = vmul.f32 0.7978846, %v1860_v46  ;;  %v3254_v6 = vpop.f32.mrf.mxu1 }
 0x448   : > { %v1858_v2 = vadd.f32 %v1826_v27, %v4745_v42  ;;  %v1861_v17 = vadd.f32 %v1829_v50, %v4748_v19  ;;  %v1827_v10 = vmul.f32 0.044715, %v1795_v12  ;;  %v1800_v44 = vmul.f32 %v1768_v5, %v4769_v54 }
 0x449   : > { %v4781_v28 = vmul.f32 %v1984_v24, %v4698_v13  ;;  %v1982_v61 = vmul.f32 0.5, %v1950_v11  ;;  %3551 = vtanh.f32 %v1892_v16  ;;  %v4784_v7 = vadd.f32 %v4615_v39, %v1699_v8  ;;  %v1702_v4 = vpop.f32.mrf.mxu1 }
 0x44a   : > { %v1890_v60 = vmul.f32 0.7978846, %v1858_v2  ;;  %v1893_v9 = vmul.f32 0.7978846, %v1861_v17  ;;  %v1859_v23 = vadd.f32 %v1827_v10, %v4760_v21  ;;  %v1832_v1 = vmul.f32 0.044715, %v1800_v44 }
 0x44b   : > { %v3548_v55 = vpop.eup %3547  ;;  %v2014_v45 = vmul.f32 %v1982_v61, %v4705_v20  ;;  %v1766_v38 = vmul.f32 %v4784_v7, %v4784_v7  ;;  %v4791_v13 = vadd.f32 %v3254_v6, %v4615_v39  ;;  %v2046_v59 = vpack.c.bf16 %v2011_v26, %v2010_v29  ;;  %v3257_v53 = vpop.f32.mrf.mxu1 }
 0x44c   : > { %v1953_v62 = vadd.f32 1.0, %v3548_v55  ;;  %3553 = vtanh.f32 %v1890_v60  ;;  %v1891_v30 = vmul.f32 0.7978846, %v1859_v23  ;;  %v1864_v52 = vadd.f32 %v1832_v1, %v4769_v54 }
 0x44d   : > { %3555 = vtanh.f32 %v1893_v9  ;;  %v1798_v56 = vmul.f32 %v1766_v38, %v4784_v7  ;;  %v1769_v51 = vmul.f32 %v4791_v13, %v4791_v13  ;;  %3279 = vmatprep.mubr.msk.bf16.mxu1 %vm2087_vm2, %v2046_v59  ;;  %v4799_v20 = vadd.f32 %v4615_v39, %v1702_v4  ;;  %v1715_v40 = vpop.f32.mrf.mxu1 }
 0x44e   : > { %v3550_v31 = vpop.eup %3549  ;;  %v1985_v29 = vmul.f32 0.5, %v1953_v62  ;;  %3557 = vtanh.f32 %v1891_v30  ;;  %v1896_v18 = vmul.f32 0.7978846, %v1864_v52  ;;  %v2047_v41 = vpack.c.bf16 %v2013_v32, %v4754_v0 }
 0x44f   : > { %v1951_v63 = vadd.f32 1.0, %v3550_v31  ;;  %v1830_v22 = vmul.f32 0.044715, %v1798_v56  ;;  %v1801_v46 = vmul.f32 %v1769_v51, %v4791_v13  ;;  %v1767_v8 = vmul.f32 %v4799_v20, %v4799_v20  ;;  %v3258_v57 = vpop.f32.mrf.mxu1 }
 0x450   : > { %v2017_v27 = vmul.f32 %v1985_v29, %v4715_v58  ;;  %3559 = vtanh.f32 %v1896_v18  ;;  %3280 = vmatmul.mubr.msk.bf16.gmra.mxu1 %vm2087_vm2, %v2047_v41  ;;  %v4808_v50 = vadd.f32 %v3257_v53, %v4615_v39  ;;  %v4811_v12 = vadd.f32 %v4615_v39, %v1715_v40 }
 0x451   : > { %v1983_v0 = vmul.f32 0.5, %v1951_v63  ;;  %v1862_v32 = vadd.f32 %v1830_v22, %v4784_v7  ;;  %v1833_v5 = vmul.f32 0.044715, %v1801_v46  ;;  %v1799_v26 = vmul.f32 %v1767_v8, %v4799_v20  ;;  %v1718_v24 = vpop.f32.mrf.mxu1 }
 0x452   : > { %v1772_v11 = vmul.f32 %v4808_v50, %v4808_v50  ;;  %v1770_v58 = vmul.f32 %v4811_v12, %v4811_v12  ;;  %v4820_v16 = vadd.f32 %v3258_v57, %v4615_v39  ;;  %v4823_v6 = vadd.f32 %v4615_v39, %v1718_v24 }
 0x453   : > { %v2015_v2 = vmul.f32 %v1983_v0, %v4722_v48  ;;  %v1894_v17 = vmul.f32 0.7978846, %v1862_v32  ;;  %v1865_v10 = vadd.f32 %v1833_v5, %v4791_v13  ;;  %v1831_v44 = vmul.f32 0.044715, %v1799_v26  ;;  %v3261_v61 = vpop.f32.mrf.mxu1 }
 0x454   : > { %v1804_v4 = vmul.f32 %v1772_v11, %v4808_v50  ;;  %v1802_v60 = vmul.f32 %v1770_v58, %v4811_v12  ;;  %v1773_v9 = vmul.f32 %v4820_v16, %v4820_v16  ;;  %v1771_v23 = vmul.f32 %v4823_v6, %v4823_v6 }
 0x455   : > { %3561 = vtanh.f32 %v1894_v17  ;;  %v1897_v1 = vmul.f32 0.7978846, %v1865_v10  ;;  %v1863_v55 = vadd.f32 %v1831_v44, %v4799_v20  ;;  %v2048_v48 = vpack.c.bf16 %v2015_v2, %v2014_v45  ;;  %v1731_v38 = vpop.f32.mrf.mxu1 }
 0x456   : > { %v3552_v59 = vpop.eup %3551  ;;  %v1836_v53 = vmul.f32 0.044715, %v1804_v4  ;;  %v1834_v62 = vmul.f32 0.044715, %v1802_v60  ;;  %v1805_v30 = vmul.f32 %v1773_v9, %v4820_v16  ;;  %v1803_v52 = vmul.f32 %v1771_v23, %v4823_v6 }
 0x457   : > { %v1956_v56 = vadd.f32 1.0, %v3552_v59  ;;  %3563 = vtanh.f32 %v1897_v1  ;;  %v1895_v51 = vmul.f32 0.7978846, %v1863_v55  ;;  %3283 = vmatprep.mubr.msk.bf16.mxu1 %vm2087_vm2, %v2048_v48  ;;  %v2049_v40 = vpack.c.bf16 %v2017_v27, %v4781_v28  ;;  %v3262_v46 = vpop.f32.mrf.mxu1 }
 0x458   : > { %v1868_v31 = vadd.f32 %v1836_v53, %v4808_v50  ;;  %v1866_v29 = vadd.f32 %v1834_v62, %v4811_v12  ;;  %v1837_v45 = vmul.f32 0.044715, %v1805_v30  ;;  %v1835_v18 = vmul.f32 0.044715, %v1803_v52 }
 0x459   : > { %v3554_v41 = vpop.eup %3553  ;;  %v1988_v63 = vmul.f32 0.5, %v1956_v56  ;;  %3565 = vtanh.f32 %v1895_v51  ;;  %3284 = vmatmul.mubr.msk.bf16.gmra.mxu1 %vm2087_vm2, %v2049_v40  ;;  %v4842_v22 = vadd.f32 %v3261_v61, %v4615_v39  ;;  %v4849_v11 = vadd.f32 %v4615_v39, %v1731_v38  ;;  %v1734_v60 = vpop.f32.mrf.mxu1 }
 0x45a   : > { %v3556_v8 = vpop.eup %3555  ;;  %v1954_v57 = vadd.f32 1.0, %v3554_v41  ;;  %v1900_v0 = vmul.f32 0.7978846, %v1868_v31  ;;  %v1898_v32 = vmul.f32 0.7978846, %v1866_v29  ;;  %v1869_v28 = vadd.f32 %v1837_v45, %v4820_v16 }
 0x45b   : > { %v3558_v27 = vpop.eup %3557  ;;  %v1957_v5 = vadd.f32 1.0, %v3556_v8  ;;  %v1867_v26 = vadd.f32 %v1835_v18, %v4823_v6  ;;  %v1776_v24 = vmul.f32 %v4842_v22, %v4842_v22  ;;  %v1774_v55 = vmul.f32 %v4849_v11, %v4849_v11 }
 0x45c   : > { %v1986_v58 = vmul.f32 0.5, %v1954_v57  ;;  %v1955_v2 = vadd.f32 1.0, %v3558_v27  ;;  %3567 = vtanh.f32 %v1900_v0  ;;  %v1901_v17 = vmul.f32 0.7978846, %v1869_v28 }
 0x45d   : > { %v3560_v10 = vpop.eup %3559  ;;  %v1989_v44 = vmul.f32 0.5, %v1957_v5  ;;  %3569 = vtanh.f32 %v1898_v32  ;;  %v1899_v61 = vmul.f32 0.7978846, %v1867_v26  ;;  %v1808_v4 = vmul.f32 %v1776_v24, %v4842_v22 }
 0x45e   : > { %v1987_v9 = vmul.f32 0.5, %v1955_v2  ;;  %3571 = vtanh.f32 %v1901_v17  ;;  %v2018_v48 = vmul.f32 %v1986_v58, %v4745_v42  ;;  %v4858_v59 = vadd.f32 %v3262_v46, %v4615_v39 }
 0x45f   : > { %v2021_v23 = vmul.f32 %v1989_v44, %v4748_v19  ;;  %3573 = vtanh.f32 %v1899_v61  ;;  %v1840_v1 = vmul.f32 0.044715, %v1808_v4  ;;  %v4861_v53 = vadd.f32 %v4615_v39, %v1734_v60 }
 0x460   : > { %v2019_v38 = vmul.f32 %v1987_v9, %v4760_v21  ;;  %v2020_v62 = vmul.f32 %v1988_v63, %v4739_v34  ;;  %v1806_v19 = vmul.f32 %v1774_v55, %v4849_v11  ;;  %v1777_v56 = vmul.f32 %v4858_v59, %v4858_v59 }
 0x461   : > { %v1872_v30 = vadd.f32 %v1840_v1, %v4842_v22  ;;  %v1775_v42 = vmul.f32 %v4861_v53, %v4861_v53  ;;  %v1960_v39 = vadd.f32 1.0, %v3560_v10 }
 0x462   : > { %v3562_v52 = vpop.eup %3561  ;;  %v2050_v21 = vpack.c.bf16 %v2019_v38, %v2018_v48  ;;  %v1838_v40 = vmul.f32 0.044715, %v1806_v19  ;;  %v2051_v31 = vpack.c.bf16 %v2021_v23, %v2020_v62  ;;  %v1809_v34 = vmul.f32 %v1777_v56, %v4858_v59 }
 0x463   : > { %v1958_v51 = vadd.f32 1.0, %v3562_v52  ;;  %v1904_v45 = vmul.f32 0.7978846, %v1872_v30  ;;  %v1807_v18 = vmul.f32 %v1775_v42, %v4861_v53  ;;  %v1992_v5 = vmul.f32 0.5, %v1960_v39 }
 0x464   : > { %v3564_v29 = vpop.eup %3563  ;;  %3287 = vmatprep.mubr.msk.bf16.mxu1 %vm2087_vm2, %v2050_v21  ;;  %v1870_v63 = vadd.f32 %v1838_v40, %v4849_v11  ;;  %v1841_v8 = vmul.f32 0.044715, %v1809_v34 }
 0x465   : > { %v1961_v41 = vadd.f32 1.0, %v3564_v29  ;;  %3288 = vmatmul.mubr.msk.bf16.gmra.mxu1 %vm2087_vm2, %v2051_v31  ;;  %v1839_v57 = vmul.f32 0.044715, %v1807_v18  ;;  %v1990_v0 = vmul.f32 0.5, %v1958_v51  ;;  %3575 = vtanh.f32 %v1904_v45 }
 0x466   : > { %v3566_v46 = vpop.eup %3565  ;;  %v1902_v27 = vmul.f32 0.7978846, %v1870_v63  ;;  %v1873_v26 = vadd.f32 %v1841_v8, %v4858_v59  ;;  %v2024_v55 = vmul.f32 %v1992_v5, %v4769_v54 }
 0x467   : > { %v1993_v32 = vmul.f32 0.5, %v1961_v41  ;;  %v1959_v28 = vadd.f32 1.0, %v3566_v46  ;;  %v1871_v24 = vadd.f32 %v1839_v57, %v4861_v53  ;;  %v2022_v60 = vmul.f32 %v1990_v0, %v4784_v7 }
 0x468   : > { %3577 = vtanh.f32 %v1902_v27  ;;  %v1905_v44 = vmul.f32 0.7978846, %v1873_v26  ;;  %v3386_v27 = vld [vmem:[%s5076_s1 + $0x40] sm:$0xff]  }
 0x469   : > { %v3568_v58 = vpop.eup %3567  ;;  %v1991_v2 = vmul.f32 0.5, %v1959_v28  ;;  %v2025_v10 = vmul.f32 %v1993_v32, %v4791_v13  ;;  %v1903_v61 = vmul.f32 0.7978846, %v1871_v24  ;;  %3313 = vmatprep.subr.bf16.mxu0 %v3386_v27 }
 0x46a   : > { %v3570_v17 = vpop.eup %3569  ;;  %v1964_v48 = vadd.f32 1.0, %v3568_v58  ;;  %3579 = vtanh.f32 %v1905_v44 }
 0x46b   : > { %v3572_v4 = vpop.eup %3571  ;;  %v2023_v9 = vmul.f32 %v1991_v2, %v4799_v20  ;;  %v1962_v23 = vadd.f32 1.0, %v3570_v17  ;;  %3581 = vtanh.f32 %v1903_v61  ;;  %v2053_v13 = vpack.c.bf16 %v2025_v10, %v2024_v55  ;;  %v4903_v10 = vld [vmem:[%s5077_s2 + $0x6] ss:$0 sm:$0xff] }
 0x46c   : > { %v3574_v1 = vpop.eup %3573  ;;  %v1965_v38 = vadd.f32 1.0, %v3572_v4  ;;  %v1996_v42 = vmul.f32 0.5, %v1964_v48 }
 0x46d   : > { %v1994_v62 = vmul.f32 0.5, %v1962_v23  ;;  %v1963_v30 = vadd.f32 1.0, %v3574_v1  ;;  %v2052_v19 = vpack.c.bf16 %v2023_v9, %v2022_v60 }
 0x46e   : > { %v1997_v52 = vmul.f32 0.5, %v1965_v38  ;;  %v2028_v51 = vmul.f32 %v1996_v42, %v4808_v50 }
 0x46f   : > { %v1995_v56 = vmul.f32 0.5, %v1963_v30  ;;  %3291 = vmatprep.mubr.msk.bf16.mxu1 %vm2087_vm2, %v2052_v19  ;;  %v2026_v7 = vmul.f32 %v1994_v62, %v4811_v12 }
 0x470   : > { %3292 = vmatmul.mubr.msk.bf16.gmra.mxu1 %vm2087_vm2, %v2053_v13  ;;  %v2029_v54 = vmul.f32 %v1997_v52, %v4820_v16  ;;  %v3387_v13 = vld [vmem:[%s5076_s1 + $0x50] sm:$0xff]  }
 0x471   : > { %v2027_v20 = vmul.f32 %v1995_v56, %v4823_v6 }
 0x472   : > { %v3576_v40 = vpop.eup %3575  ;;  %v2055_v29 = vpack.c.bf16 %v2029_v54, %v2028_v51 }
 0x473   : > { %v2054_v21 = vpack.c.bf16 %v2027_v20, %v2026_v7  ;;  %v1968_v45 = vadd.f32 1.0, %v3576_v40 }
 0x475   : > { %3295 = vmatprep.mubr.msk.bf16.mxu1 %vm2087_vm2, %v2054_v21  ;;  %v3578_v31 = vpop.eup %3577  ;;  %v2000_v6 = vmul.f32 0.5, %v1968_v45 }
 0x476   : > { %v1966_v39 = vadd.f32 1.0, %v3578_v31 }
 0x477   : > { %v3580_v34 = vpop.eup %3579  ;;  %v2032_v0 = vmul.f32 %v2000_v6, %v4842_v22  ;;  %v5122_v6 = vld [vmem:[#allocation2_spill] sm:$0xff] }
 0x478   : > { %3296 = vmatmul.mubr.msk.bf16.gmra.mxu1 %vm2087_vm2, %v2055_v29  ;;  %v3582_v18 = vpop.eup %3581  ;;  %v1969_v41 = vadd.f32 1.0, %v3580_v34  ;;  %v1998_v12 = vmul.f32 0.5, %v1966_v39 }
 0x479   : > { %v1967_v63 = vadd.f32 1.0, %v3582_v18 }
 0x47a   : > { %v2001_v46 = vmul.f32 0.5, %v1969_v41  ;;  %v2030_v50 = vmul.f32 %v1998_v12, %v4849_v11 }
 0x47b   : > { %v1999_v16 = vmul.f32 0.5, %v1967_v63 }
 0x47c   : > { %v2033_v8 = vmul.f32 %v2001_v46, %v4858_v59 }
 0x47d   : > { %v2031_v57 = vmul.f32 %v1999_v16, %v4861_v53 }
 0x47e   : > { %v2057_v28 = vpack.c.bf16 %v2033_v8, %v2032_v0  ;;  %v5123_v8 = vld [vmem:[#allocation3_spill] sm:$0xff] }
 0x47f   : > { %v2056_v32 = vpack.c.bf16 %v2031_v57, %v2030_v50 }
 0x481   : > { %3299 = vmatprep.mubr.msk.bf16.mxu1 %vm2087_vm2, %v2056_v32 }
 0x482   : > { %3300 = vmatmul.mubr.msk.bf16.gmra.mxu1 %vm2087_vm2, %v2057_v28  ;;  %v3388_v28 = vld [vmem:[%s5076_s1 + $0x58] sm:$0xff]  }
 0x4fb   : > { %v3273_v5 = vpop.f32.mrf.mxu1 }
 0x4fd   : > { %v2170_v26 = vpop.f32.mrf.mxu1 }
 0x4fe   : > { %v2171_v7 = vadd.f32 %v4903_v10, %v2170_v26  ;;  %v5124_v26 = vld [vmem:[#allocation10_spill] sm:$0xff] }
 0x4ff   : > { %v3274_v59 = vpop.f32.mrf.mxu1 }
 0x500   : > { %v2297_v29 = vadd.f32 %v2171_v7, %v4055_v33  ;;  %v2182_v45 = vadd.f32 %v3274_v59, %v4903_v10 }
 0x501   : > { %v2173_v24 = vpop.f32.mrf.mxu1 }
 0x502   : > { %v2174_v42 = vadd.f32 %v4903_v10, %v2173_v24  ;;  %v2300_v33 = vadd.f32 %v2182_v45, %v4078_v35 }
 0x503   : > { %v4898_v11 = vpop.f32.mrf.mxu1 }
 0x504   : > { %v2298_v21 = vadd.f32 %v2174_v42, %v4065_v3  ;;  %v2179_v3 = vadd.f32 %v3273_v5, %v4903_v10  ;;  %v2195_v5 = vadd.f32 %v4898_v11, %v4903_v10 }
 0x505   : > { %v2186_v53 = vpop.f32.mrf.mxu1 }
 0x506   : > { %v2331_v41 = vpack.c.bf16 %v2298_v21, %v2297_v29  ;;  %v2299_v46 = vadd.f32 %v2179_v3, %v5122_v6  ;;  %v5136_v6 = vld [vmem:[#allocation17_spill] sm:$0xff] }
 0x507   : > { %v3278_v58 = vpop.f32.mrf.mxu1 }
 0x508   : > { %v2332_v0 = vpack.c.bf16 %v2300_v33, %v2299_v46  ;;  %v2198_v32 = vadd.f32 %v3278_v58, %v4903_v10 }
 0x509   : > { %v2189_v22 = vpop.f32.mrf.mxu1 }
 0x50a   : > { %v2190_v12 = vadd.f32 %v4903_v10, %v2189_v22  ;;  %v5126_v22 = vld [vmem:[#allocation8_spill] sm:$0xff] }
 0x510   : > { %v3281_v2 = vpop.f32.mrf.mxu1 }
 0x511   : > { %v2211_v60 = vadd.f32 %v3281_v2, %v4903_v10 }
 0x512   : > { %v2202_v17 = vpop.f32.mrf.mxu1 }
 0x513   : > { %v2203_v61 = vadd.f32 %v4903_v10, %v2202_v17  ;;  %v2307_v62 = vadd.f32 %v2211_v60, %v4124_v49 }
 0x514   : > { %v3282_v44 = vpop.f32.mrf.mxu1 }
 0x515   : > { %v2214_v4 = vadd.f32 %v3282_v44, %v4903_v10  ;;  %v2305_v55 = vadd.f32 %v2203_v61, %v4110_v25  ;;  %v5127_v44 = vld [vmem:[#allocation5_spill] sm:$0xff] }
 0x516   : > { %v2205_v9 = vpop.f32.mrf.mxu1  ;;  %v2303_v61 = vadd.f32 %v2195_v5, %v5127_v44  ;;  %v5139_v5 = vld [vmem:[#allocation22_spill] sm:$0xff] }
 0x517   : > { %v2206_v23 = vadd.f32 %v4903_v10, %v2205_v9  ;;  %v2308_v1 = vadd.f32 %v2214_v4, %v4134_v47 }
 0x519   : > { %v2306_v48 = vadd.f32 %v2206_v23, %v4121_v43  ;;  %v3285_v38 = vpop.f32.mrf.mxu1  ;;  %v2338_v52 = vpack.c.bf16 %v2308_v1, %v2307_v62  ;;  %v5128_v62 = vld [vmem:[#allocation9_spill] sm:$0xff] }
 0x51a   : > { %v2227_v43 = vadd.f32 %v3285_v38, %v4903_v10 }
 0x51b   : > { %v2337_v30 = vpack.c.bf16 %v2306_v48, %v2305_v55  ;;  %v2218_v19 = vpop.f32.mrf.mxu1 }
 0x51c   : > { %v2219_v47 = vadd.f32 %v4903_v10, %v2218_v19  ;;  %v2311_v31 = vadd.f32 %v2227_v43, %v4152_v37  ;;  %v5129_v19 = vld [vmem:[#allocation14_spill] sm:$0xff] }
 0x51d   : > { %v3286_v56 = vpop.f32.mrf.mxu1  ;;  %3305 = vmatprep.mubr.msk.bf16.mxu0 %vm528_vm1, %v2337_v30 }
 0x51e   : > { %v2230_v25 = vadd.f32 %v3286_v56, %v4903_v10  ;;  %3306 = vmatmul.mubr.msk.bf16.vlgmr.msra.gmra.mxu0 %vm528_vm1, %v2338_v52  ;;  %v2309_v51 = vadd.f32 %v2219_v47, %v4138_v36  ;;  %v5131_v47 = vld [vmem:[#allocation7_spill] sm:$0xff] }
 0x51f   : > { %v2221_v49 = vpop.f32.mrf.mxu1  ;;  %3314 = vmatpush3.bf16.msra.mxu0 %v3386_v27 }
 0x520   : > { %v2222_v20 = vadd.f32 %v4903_v10, %v2221_v49  ;;  %3323 = vmatprep.subr.bf16.mxu0 %v3387_v13  ;;  %v2312_v54 = vadd.f32 %v2230_v25, %v4160_v15  ;;  %v5121_v15 = vld [vmem:[#allocation4_spill] sm:$0xff] }
 0x521   : > { %v2302_v63 = vadd.f32 %v2190_v12, %v5121_v15 }
 0x522   : > { %v2310_v40 = vadd.f32 %v2222_v20, %v4149_v14  ;;  %v2340_v34 = vpack.c.bf16 %v2312_v54, %v2311_v31  ;;  %v2187_v14 = vadd.f32 %v4903_v10, %v2186_v53  ;;  %v5125_v53 = vld [vmem:[#allocation6_spill] sm:$0xff]  ;;  %v5132_v31 = vld [vmem:[#allocation13_spill] sm:$0xff] }
 0x523   : > { %v2304_v58 = vadd.f32 %v2198_v32, %v5125_v53  ;;  %v5140_v53 = vld [vmem:[#allocation21_spill] sm:$0xff] }
 0x524   : > { %v2339_v39 = vpack.c.bf16 %v2310_v40, %v2309_v51  ;;  %v2301_v50 = vadd.f32 %v2187_v14, %v5123_v8 }
 0x525   : > { %v3289_v18 = vpop.f32.mrf.mxu1  ;;  %v2334_v9 = vpack.c.bf16 %v2304_v58, %v2303_v61 }
 0x526   : > { %3309 = vmatprep.mubr.msk.bf16.mxu0 %vm528_vm1, %v2339_v39  ;;  %v2333_v27 = vpack.c.bf16 %v2302_v63, %v2301_v50  ;;  %v2243_v55 = vadd.f32 %v3289_v18, %v4903_v10  ;;  %v5133_v39 = vld [vmem:[#allocation18_spill] sm:$0xff]  ;;  %v5137_v50 = vld [vmem:[#allocation15_spill] sm:$0xff] }
 0x527   : > { %3310 = vmatmul.mubr.msk.bf16.gmra.mxu0 %vm528_vm1, %v2340_v34  ;;  %v2234_v36 = vpop.f32.mrf.mxu1  ;;  %v5134_v34 = vld [vmem:[#allocation16_spill] sm:$0xff] }
 0x528   : > { %3315 = vmatprep.mubr.msk.bf16.mxu0 %vm528_vm1, %v2331_v41  ;;  %v2235_v35 = vadd.f32 %v4903_v10, %v2234_v36  ;;  %v2315_v25 = vadd.f32 %v2243_v55, %v5131_v47  ;;  %v5135_v41 = vld [vmem:[#allocation11_spill] sm:$0xff] }
 0x529   : > { %v3290_v37 = vpop.f32.mrf.mxu1 }
 0x52a   : > { %v2313_v2 = vadd.f32 %v2235_v35, %v5126_v22  ;;  %v2246_v11 = vadd.f32 %v3290_v37, %v4903_v10  ;;  %v5141_v22 = vld [vmem:[#allocation19_spill] sm:$0xff] }
 0x52b   : > { %v2237_v16 = vpop.f32.mrf.mxu1 }
 0x52c   : > { %v2238_v57 = vadd.f32 %v4903_v10, %v2237_v16  ;;  %v2316_v30 = vadd.f32 %v2246_v11, %v5128_v62 }
 0x52e   : > { %v2314_v59 = vadd.f32 %v2238_v57, %v5124_v26  ;;  %v2510_v7 = vpack.c.bf16 %v2316_v30, %v2315_v25 }
 0x52f   : > { %3316 = vmatmul.mubr.msk.bf16.vlgmr.msra.gmra.mxu0 %vm528_vm1, %v2332_v0 }
 0x530   : > { %3324 = vmatpush3.bf16.msra.mxu0 %v3387_v13  ;;  %3319 = vmatprep.mubr.msk.bf16.mxu0 %vm528_vm1, %v2333_v27  ;;  %v3293_v24 = vpop.f32.mrf.mxu1  ;;  %v2509_v4 = vpack.c.bf16 %v2314_v59, %v2313_v2  ;;  %v5130_v13 = vld [vmem:[#allocation12_spill] sm:$0xff] }
 0x531   : > { %3333 = vmatprep.subr.bf16.mxu0 %v3388_v28  ;;  %v2259_v51 = vadd.f32 %v3293_v24, %v4903_v10 }
 0x532   : > { %v2250_v17 = vpop.f32.mrf.mxu1 }
 0x533   : > { %v2251_v23 = vadd.f32 %v4903_v10, %v2250_v17  ;;  %v2319_v12 = vadd.f32 %v2259_v51, %v5135_v41 }
 0x534   : > { %v3294_v60 = vpop.f32.mrf.mxu1 }
 0x535   : > { %v2317_v56 = vadd.f32 %v2251_v23, %v5130_v13  ;;  %v2262_v20 = vadd.f32 %v3294_v60, %v4903_v10 }
 0x536   : > { %v2253_v1 = vpop.f32.mrf.mxu1 }
 0x537   : > { %3320 = vmatmul.mubr.msk.bf16.gmra.mxu0 %vm528_vm1, %v2334_v9  ;;  %v2254_v48 = vadd.f32 %v4903_v10, %v2253_v1  ;;  %v2320_v29 = vadd.f32 %v2262_v20, %v5132_v31 }
 0x538   : > { %3325 = vmatprep.mubr.msk.bf16.mxu0 %vm528_vm1, %v2509_v4  ;;  %v3297_v38 = vpop.f32.mrf.mxu1 }
 0x539   : > { %v2318_v52 = vadd.f32 %v2254_v48, %v5129_v19  ;;  %v2512_v14 = vpack.c.bf16 %v2320_v29, %v2319_v12  ;;  %v2275_v15 = vadd.f32 %v3297_v38, %v4903_v10 }
 0x53a   : > { %v2266_v42 = vpop.f32.mrf.mxu1 }
 0x53b   : > { %v2511_v43 = vpack.c.bf16 %v2318_v52, %v2317_v56  ;;  %v2267_v54 = vadd.f32 %v4903_v10, %v2266_v42  ;;  %v2323_v57 = vadd.f32 %v2275_v15, %v5137_v50 }
 0x53c   : > { %v3298_v49 = vpop.f32.mrf.mxu1 }
 0x53d   : > { %v2321_v18 = vadd.f32 %v2267_v54, %v5134_v34  ;;  %v2278_v33 = vadd.f32 %v3298_v49, %v4903_v10 }
 0x53e   : > { %v2269_v21 = vpop.f32.mrf.mxu1 }
 0x53f   : > { %3326 = vmatmul.mubr.msk.bf16.vlgmr.msra.gmra.mxu0 %vm528_vm1, %v2510_v7  ;;  %v2270_v40 = vadd.f32 %v4903_v10, %v2269_v21  ;;  %v2324_v46 = vadd.f32 %v2278_v33, %v5136_v6 }
 0x540   : > { %3334 = vmatpush3.bf16.msra.mxu0 %v3388_v28  ;;  %3329 = vmatprep.mubr.msk.bf16.mxu0 %vm528_vm1, %v2511_v43  ;;  %v5138_v28 = vld [vmem:[#allocation20_spill] sm:$0xff] }
 0x541   : > { %v2322_v45 = vadd.f32 %v2270_v40, %v5133_v39  ;;  %v2607_v32 = vpack.c.bf16 %v2324_v46, %v2323_v57  ;;  %v3094_v40 = vld [vmem:[%s5077_s2 + $0x7] ss:$0 sm:$0xff] }
 0x542   : > { %v3301_v36 = vpop.f32.mrf.mxu1 }
 0x543   : > { %v2606_v3 = vpack.c.bf16 %v2322_v45, %v2321_v18  ;;  %v2291_v59 = vadd.f32 %v3301_v36, %v4903_v10 }
 0x544   : > { %v2282_v37 = vpop.f32.mrf.mxu1 }
 0x545   : > { %v2283_v16 = vadd.f32 %v4903_v10, %v2282_v37  ;;  %v2327_v2 = vadd.f32 %v2291_v59, %v5141_v22 }
 0x546   : > { %v3302_v63 = vpop.f32.mrf.mxu1 }
 0x547   : > { %3330 = vmatmul.mubr.msk.bf16.gmra.mxu0 %vm528_vm1, %v2512_v14  ;;  %v2325_v27 = vadd.f32 %v2283_v16, %v5138_v28  ;;  %v2294_v35 = vadd.f32 %v3302_v63, %v4903_v10 }
 0x548   : > { %3335 = vmatprep.mubr.msk.bf16.mxu0 %vm528_vm1, %v2606_v3  ;;  %v2285_v8 = vpop.f32.mrf.mxu1 }
 0x549   : > { %v2286_v0 = vadd.f32 %v4903_v10, %v2285_v8  ;;  %v2328_v58 = vadd.f32 %v2294_v35, %v5140_v53 }
 0x54b   : > { %v2326_v26 = vadd.f32 %v2286_v0, %v5139_v5  ;;  %v2609_v17 = vpack.c.bf16 %v2328_v58, %v2327_v2 }
 0x54d   : > { %v2608_v24 = vpack.c.bf16 %v2326_v26, %v2325_v27 }
 0x54f   : > { %3336 = vmatmul.mubr.msk.bf16.vlgmr.msra.gmra.mxu0 %vm528_vm1, %v2607_v32 }
 0x550   : > { %3339 = vmatprep.mubr.msk.bf16.mxu0 %vm528_vm1, %v2608_v24 }
 0x557   : > { %3340 = vmatmul.mubr.msk.bf16.gmra.mxu0 %vm528_vm1, %v2609_v17 }
 0x5de   : > { %v3307_v44 = vpop.f32.mrf.mxu0 }
 0x5e0   : > { %v2393_v61 = vpop.f32.mrf.mxu0 }
 0x5e2   : > { %v3308_v4 = vpop.f32.mrf.mxu0 }
 0x5e4   : > { %v2396_v60 = vpop.f32.mrf.mxu0 }
 0x5e7   : > { %v3311_v9 = vpop.f32.mrf.mxu0 }
 0x5e9   : > { %v2409_v11 = vpop.f32.mrf.mxu0 }
 0x5eb   : > { %v3312_v23 = vpop.f32.mrf.mxu0 }
 0x5ed   : > { %v2412_v10 = vpop.f32.mrf.mxu0 }
 0x5ef   : > { %v3317_v1 = vpop.f32.mrf.mxu0 }
 0x5f0   : > { %v2485_v7 = vadd.f32 %v3317_v1, %v3307_v44 }
 0x5f1   : > { %v2476_v55 = vpop.f32.mrf.mxu0 }
 0x5f2   : > { %v2477_v54 = vadd.f32 %v2476_v55, %v2393_v61  ;;  %v3389_v55 = vld [vmem:[%s5076_s1 + $0x68] sm:$0xff]  }
 0x5f3   : > { %v3318_v48 = vpop.f32.mrf.mxu0 }
 0x5f4   : > { %v2488_v31 = vadd.f32 %v3318_v48, %v3308_v4  ;;  %v3607_v48 = vmov 0.0  }
 0x5f5   : > { %v2479_v38 = vpop.f32.mrf.mxu0  ;;  %3343 = vmatprep.subr.bf16.mxu1 %v3607_v48  ;;  %3347 = vmatprep.mubr.msk.bf16.mxu1 %vm3608_vm4, %v3607_v48 }
 0x5f6   : > { %v2480_v34 = vadd.f32 %v2479_v38, %v2396_v60  ;;  %3344 = vmatpush3.bf16.msra.mxu1 %v3389_v55 }
 0x5f7   : > { %v3321_v62 = vpop.f32.mrf.mxu0  ;;  %3345 = vmatprep.subr.bf16.mxu1 %v3607_v48 }
 0x5f8   : > { %v2501_v15 = vadd.f32 %v3321_v62, %v3311_v9 }
 0x5f9   : > { %v2492_v30 = vpop.f32.mrf.mxu0 }
 0x5fa   : > { %v2493_v6 = vadd.f32 %v2492_v30, %v2409_v11 }
 0x5fb   : > { %v3322_v19 = vpop.f32.mrf.mxu0 }
 0x5fc   : > { %v2504_v35 = vadd.f32 %v3322_v19, %v3312_v23 }
 0x5fd   : > { %v2495_v52 = vpop.f32.mrf.mxu0 }
 0x5fe   : > { %v2496_v5 = vadd.f32 %v2495_v52, %v2412_v10 }
 0x5ff   : > { %v3327_v13 = vpop.f32.mrf.mxu0 }
 0x600   : > { %v2598_v21 = vadd.f32 %v3327_v13, %v2485_v7 }
 0x601   : > { %v2565_v56 = vpop.f32.mrf.mxu0 }
 0x602   : > { %v2596_v29 = vadd.f32 %v2565_v56, %v2477_v54 }
 0x603   : > { %v3328_v42 = vpop.f32.mrf.mxu0 }
 0x604   : > { %v2599_v18 = vadd.f32 %v3328_v42, %v2488_v31 }
 0x605   : > { %v2568_v47 = vpop.f32.mrf.mxu0 }
 0x606   : > { %v2597_v36 = vadd.f32 %v2568_v47, %v2480_v34 }
 0x607   : > { %v3331_v25 = vpop.f32.mrf.mxu0 }
 0x608   : > { %v2602_v8 = vadd.f32 %v3331_v25, %v2501_v15 }
 0x609   : > { %v2581_v43 = vpop.f32.mrf.mxu0 }
 0x60a   : > { %v2600_v57 = vadd.f32 %v2581_v43, %v2493_v6 }
 0x60b   : > { %v3332_v49 = vpop.f32.mrf.mxu0 }
 0x60c   : > { %v2603_v53 = vadd.f32 %v3332_v49, %v2504_v35 }
 0x60d   : > { %v2584_v20 = vpop.f32.mrf.mxu0 }
 0x60e   : > { %v2601_v58 = vadd.f32 %v2584_v20, %v2496_v5 }
 0x60f   : > { %v3337_v51 = vpop.f32.mrf.mxu0 }
 0x610   : > { %v2695_v39 = vadd.f32 %v3337_v51, %v2598_v21 }
 0x611   : > { %v2662_v45 = vpop.f32.mrf.mxu0 }
 0x612   : > { %v2708_v41 = vadd.f32 %v3094_v40, %v2695_v39  ;;  %v2693_v12 = vadd.f32 %v2662_v45, %v2596_v29 }
 0x613   : > { %v3338_v3 = vpop.f32.mrf.mxu0 }
 0x614   : > { %v2706_v14 = vadd.f32 %v3094_v40, %v2693_v12  ;;  %v2696_v33 = vadd.f32 %v3338_v3, %v2599_v18  ;;  %v2723_v37 = vsel %vm2716_vm3, %v2708_v41, 0.0 }
 0x615   : > { %2724 = vadd.xlane.f32.xlu0 %v2723_v37  ;;  %v2665_v63 = vpop.f32.mrf.mxu0 }
 0x616   : > { %v2709_v46 = vadd.f32 %v3094_v40, %v2696_v33  ;;  %v2694_v16 = vadd.f32 %v2665_v63, %v2597_v36  ;;  %v2717_v28 = vsel %vm2716_vm3, %v2706_v14, 0.0 }
 0x617   : > { %v3341_v50 = vpop.f32.mrf.mxu0 }
 0x618   : > { %v2707_v0 = vadd.f32 %v3094_v40, %v2694_v16  ;;  %v2726_v32 = vsel %vm2716_vm3, %v2709_v46, 0.0  ;;  %v2699_v26 = vadd.f32 %v3341_v50, %v2602_v8 }
 0x619   : > { %2727 = vadd.xlane.f32.xlu1 %v2726_v32  ;;  %2718 = vadd.xlane.f32.xlu0 %v2717_v28  ;;  %v2678_v27 = vpop.f32.mrf.mxu0  ;;  %v3390_v32 = vld [vmem:[%s5076_s1 + $0x60] sm:$0xff]  }
 0x61a   : > { %v2697_v59 = vadd.f32 %v2678_v27, %v2600_v57  ;;  %v2720_v2 = vsel %vm2716_vm3, %v2707_v0, 0.0  ;;  %v2712_v44 = vadd.f32 %v3094_v40, %v2699_v26  ;;  %3346 = vmatpush3.bf16.msra.mxu1 %v3390_v32 }
 0x61b   : > { %v3342_v24 = vpop.f32.mrf.mxu0 }
 0x61c   : > { %v2710_v22 = vadd.f32 %v3094_v40, %v2697_v59  ;;  %v2700_v61 = vadd.f32 %v3342_v24, %v2603_v53  ;;  %v2735_v23 = vsel %vm2716_vm3, %v2712_v44, 0.0 }
 0x61d   : > { %2721 = vadd.xlane.f32.xlu1 %v2720_v2  ;;  %v2681_v17 = vpop.f32.mrf.mxu0 }
 0x61e   : > { %v2698_v4 = vadd.f32 %v2681_v17, %v2601_v58  ;;  %v2729_v60 = vsel %vm2716_vm3, %v2710_v22, 0.0  ;;  %v2713_v11 = vadd.f32 %v3094_v40, %v2700_v61 }
 0x61f   : > { %2730 = vadd.xlane.f32.xlu0 %v2729_v60 }
 0x620   : > { %v2711_v9 = vadd.f32 %v3094_v40, %v2698_v4  ;;  %v2738_v1 = vsel %vm2716_vm3, %v2713_v11, 0.0 }
 0x622   : > { %v2732_v10 = vsel %vm2716_vm3, %v2711_v9, 0.0 }
 0x623   : > { %2736 = vadd.xlane.f32.xlu0 %v2735_v23  ;;  %2733 = vadd.xlane.f32.xlu1 %v2732_v10 }
 0x627   : > { %2739 = vadd.xlane.f32.xlu1 %v2738_v1 }
 0x69e   : > { %v2725_v38 = vpop.xlane.xlu0 %2724 }
 0x69f   : > { %v2744_v62 = vmul.f32 0.03125, %v2725_v38 }
 0x6a1   : > { %v5006_v30 = vsub.f32 %v2708_v41, %v2744_v62 }
 0x6a2   : > { %v2728_v19 = vpop.xlane.xlu1 %2727  ;;  %v2719_v52 = vpop.xlane.xlu0 %2718 }
 0x6a3   : > { %v2745_v13 = vmul.f32 0.03125, %v2728_v19  ;;  %v2742_v56 = vmul.f32 0.03125, %v2719_v52  ;;  %v2760_v42 = vmul.f32 %v5006_v30, %v5006_v30 }
 0x6a5   : > { %v5010_v47 = vsub.f32 %v2709_v46, %v2745_v13  ;;  %v5012_v25 = vsub.f32 %v2706_v14, %v2742_v56  ;;  %v2772_v43 = vsel %vm2716_vm3, %v2760_v42, 0.0 }
 0x6a6   : > { %v2722_v49 = vpop.xlane.xlu1 %2721  ;;  %2773 = vadd.xlane.f32.xlu0 %v2772_v43 }
 0x6a7   : > { %v2743_v7 = vmul.f32 0.03125, %v2722_v49  ;;  %v2758_v20 = vmul.f32 %v5012_v25, %v5012_v25  ;;  %v2761_v54 = vmul.f32 %v5010_v47, %v5010_v47 }
 0x6a8   : > { %v2731_v21 = vpop.xlane.xlu0 %2730 }
 0x6a9   : > { %v5019_v51 = vsub.f32 %v2707_v0, %v2743_v7  ;;  %v2746_v40 = vmul.f32 0.03125, %v2731_v21  ;;  %v2766_v31 = vsel %vm2716_vm3, %v2758_v20, 0.0  ;;  %v2775_v29 = vsel %vm2716_vm3, %v2761_v54, 0.0  ;;  %v3095_v7 = vld [vmem:[%s5077_s2 + $0x8] ss:$0 sm:$0xff] }
 0x6aa   : > { %2767 = vadd.xlane.f32.xlu0 %v2766_v31  ;;  %2776 = vadd.xlane.f32.xlu1 %v2775_v29 }
 0x6ab   : > { %v5023_v39 = vsub.f32 %v2710_v22, %v2746_v40  ;;  %v2759_v45 = vmul.f32 %v5019_v51, %v5019_v51 }
 0x6ac   : > { %v2737_v34 = vpop.xlane.xlu0 %2736  ;;  %v2734_v18 = vpop.xlane.xlu1 %2733 }
 0x6ad   : > { %v2748_v41 = vmul.f32 0.03125, %v2737_v34  ;;  %v2747_v12 = vmul.f32 0.03125, %v2734_v18  ;;  %v2769_v3 = vsel %vm2716_vm3, %v2759_v45, 0.0  ;;  %v2762_v36 = vmul.f32 %v5023_v39, %v5023_v39 }
 0x6ae   : > { %2770 = vadd.xlane.f32.xlu1 %v2769_v3 }
 0x6af   : > { %v5030_v14 = vsub.f32 %v2712_v44, %v2748_v41  ;;  %v5032_v33 = vsub.f32 %v2711_v9, %v2747_v12  ;;  %v2778_v37 = vsel %vm2716_vm3, %v2762_v36, 0.0 }
 0x6b0   : > { %2779 = vadd.xlane.f32.xlu0 %v2778_v37  ;;  %v2740_v15 = vpop.xlane.xlu1 %2739 }
 0x6b1   : > { %v2749_v63 = vmul.f32 0.03125, %v2740_v15  ;;  %v2764_v6 = vmul.f32 %v5030_v14, %v5030_v14  ;;  %v2763_v46 = vmul.f32 %v5032_v33, %v5032_v33 }
 0x6b3   : > { %v5039_v16 = vsub.f32 %v2713_v11, %v2749_v63  ;;  %v2784_v8 = vsel %vm2716_vm3, %v2764_v6, 0.0  ;;  %v2781_v50 = vsel %vm2716_vm3, %v2763_v46, 0.0 }
 0x6b4   : > { %2785 = vadd.xlane.f32.xlu0 %v2784_v8  ;;  %2782 = vadd.xlane.f32.xlu1 %v2781_v50 }
 0x6b5   : > { %v2765_v57 = vmul.f32 %v5039_v16, %v5039_v16 }
 0x6b7   : > { %v2787_v0 = vsel %vm2716_vm3, %v2765_v57, 0.0 }
 0x6b8   : > { %2788 = vadd.xlane.f32.xlu1 %v2787_v0 }
 0x72f   : > { %v2774_v28 = vpop.xlane.xlu0 %2773 }
 0x730   : > { %v2792_v27 = vmul.f32 0.03125, %v2774_v28 }
 0x732   : > { %v2800_v24 = vadd.f32 1e-05, %v2792_v27 }
 0x733   : > { %v2768_v35 = vpop.xlane.xlu0 %2767  ;;  %v2777_v5 = vpop.xlane.xlu1 %2776 }
 0x734   : > { %v2790_v26 = vmul.f32 0.03125, %v2768_v35  ;;  %v2793_v59 = vmul.f32 0.03125, %v2777_v5 }
 0x736   : > { %v2798_v53 = vadd.f32 1e-05, %v2790_v26  ;;  %v2801_v58 = vadd.f32 1e-05, %v2793_v59 }
 0x737   : > { %v2771_v22 = vpop.xlane.xlu1 %2770 }
 0x738   : > { %3583 = vrsqrt.f32 %v2798_v53  ;;  %v2791_v2 = vmul.f32 0.03125, %v2771_v22 }
 0x739   : > { %v2780_v17 = vpop.xlane.xlu0 %2779  ;;  %3585 = vrsqrt.f32 %v2800_v24 }
 0x73a   : > { %v2799_v44 = vadd.f32 1e-05, %v2791_v2  ;;  %v2794_v61 = vmul.f32 0.03125, %v2780_v17  ;;  %3587 = vrsqrt.f32 %v2801_v58 }
 0x73c   : > { %3589 = vrsqrt.f32 %v2799_v44  ;;  %v2802_v4 = vadd.f32 1e-05, %v2794_v61 }
 0x73d   : > { %v2786_v60 = vpop.xlane.xlu0 %2785  ;;  %v2783_v9 = vpop.xlane.xlu1 %2782 }
 0x73e   : > { %3591 = vrsqrt.f32 %v2802_v4  ;;  %v2796_v11 = vmul.f32 0.03125, %v2786_v60  ;;  %v2795_v23 = vmul.f32 0.03125, %v2783_v9 }
 0x740   : > { %v2804_v10 = vadd.f32 1e-05, %v2796_v11  ;;  %v2803_v1 = vadd.f32 1e-05, %v2795_v23 }
 0x741   : > { %v2789_v55 = vpop.xlane.xlu1 %2788 }
 0x742   : > { %3593 = vrsqrt.f32 %v2804_v10  ;;  %v2797_v48 = vmul.f32 0.03125, %v2789_v55 }
 0x743   : > { %3595 = vrsqrt.f32 %v2803_v1 }
 0x744   : > { %v2805_v38 = vadd.f32 1e-05, %v2797_v48 }
 0x745   : > { %v3584_v62 = vpop.eup %3583 }
 0x746   : > { %3597 = vrsqrt.f32 %v2805_v38  ;;  %v3586_v19 = vpop.eup %3585  ;;  %v2814_v13 = vmul.f32 %v3584_v62, %v5012_v25 }
 0x747   : > { %v3588_v52 = vpop.eup %3587  ;;  %v2816_v42 = vmul.f32 %v3586_v19, %v5006_v30  ;;  %v3096_v30 = vld [vmem:[%s5077_s2 + $0x9] ss:$0 sm:$0xff] }
 0x748   : > { %v2826_v20 = vmul.f32 %v3095_v7, %v2814_v13  ;;  %v2817_v54 = vmul.f32 %v3588_v52, %v5010_v47 }
 0x749   : > { %v3590_v56 = vpop.eup %3589  ;;  %v2828_v40 = vmul.f32 %v3095_v7, %v2816_v42 }
 0x74a   : > { %v2815_v43 = vmul.f32 %v3590_v56, %v5019_v51  ;;  %v2838_v51 = vadd.f32 %v3096_v30, %v2826_v20  ;;  %v2829_v34 = vmul.f32 %v3095_v7, %v2817_v54 }
 0x74b   : > { %v3592_v49 = vpop.eup %3591  ;;  %v2840_v12 = vadd.f32 %v3096_v30, %v2828_v40 }
 0x74c   : > { %v2818_v21 = vmul.f32 %v3592_v49, %v5023_v39  ;;  %v2827_v31 = vmul.f32 %v3095_v7, %v2815_v43  ;;  %v2841_v63 = vadd.f32 %v3096_v30, %v2829_v34 }
 0x74d   : > { %v2846_v15 = vadd.f32 %v2840_v12, %v2838_v51 }
 0x74e   : > { %v2830_v29 = vmul.f32 %v3095_v7, %v2818_v21  ;;  %v2839_v3 = vadd.f32 %v3096_v30, %v2827_v31 }
 0x74f   : > { %v3594_v45 = vpop.eup %3593 }
 0x750   : > { %v3596_v25 = vpop.eup %3595  ;;  %v2820_v18 = vmul.f32 %v3594_v45, %v5030_v14  ;;  %v2842_v47 = vadd.f32 %v3096_v30, %v2830_v29  ;;  %v2847_v50 = vadd.f32 %v2841_v63, %v2839_v3 }
 0x751   : > { %v2819_v41 = vmul.f32 %v3596_v25, %v5032_v33 }
 0x752   : > { %v2832_v36 = vmul.f32 %v3095_v7, %v2820_v18  ;;  %v2848_v57 = vadd.f32 %v2846_v15, %v2842_v47 }
 0x753   : > { %v3598_v39 = vpop.eup %3597  ;;  %v2831_v37 = vmul.f32 %v3095_v7, %v2819_v41 }
 0x754   : > { %v2844_v6 = vadd.f32 %v3096_v30, %v2832_v36  ;;  %v2821_v46 = vmul.f32 %v3598_v39, %v5039_v16  ;;  %v3097_v16 = vld [vmem:[%s5077_s2 + $0xa] ss:$0 sm:$0xff] }
 0x755   : > { %v2843_v8 = vadd.f32 %v3096_v30, %v2831_v37 }
 0x756   : > { %v2833_v0 = vmul.f32 %v3095_v7, %v2821_v46  ;;  %v2850_v28 = vadd.f32 %v2848_v57, %v2844_v6 }
 0x757   : > { %v2849_v32 = vadd.f32 %v2847_v50, %v2843_v8 }
 0x758   : > { %v2845_v14 = vadd.f32 %v3096_v30, %v2833_v0  ;;  %v2852_v27 = vmul.f32 0.25, %v2850_v28 }
 0x75a   : > { %v2851_v33 = vadd.f32 %v2849_v32, %v2845_v14 }
 0x75c   : > { %v2853_v35 = vmul.f32 0.25, %v2851_v33 }
 0x75e   : > { %v2858_v5 = vpack.c.bf16 %v2853_v35, %v2852_v27 }
 0x760   : > { %3348 = vmatmul.mubr.msk.bf16.vlgmr.msra.gmra.mxu1 %vm2716_vm3, %v2858_v5 }
 0x820   : > { %v2913_v26 = vpop.f32.mrf.mxu1 }
 0x821   : > { %v2914_v53 = vadd.f32 %v3097_v16, %v2913_v26 }
 0x822   : > { %v3349_v59 = vpop.f32.mrf.mxu1 }
 0x824   : > { %v2916_v24 = vpop.f32.mrf.mxu1 }
 0x825   : > { %v2917_v58 = vadd.f32 %v3097_v16, %v2916_v24 }
 0x826   : > { %v3350_v22 = vpop.f32.mrf.mxu1 }
 0x827   : > { %v3110_v2 = vpack.c.bf16 %v2917_v58, %v2914_v53 }
 0x829   : > { %3111 = vst [vmem:[%s172_s23] sm:$0xff] %v3110_v2  }
 0x82a PF: > { %s13_s12 = sadd.s32 1, %s3605_s12  }
 0x82b   : > { %p10_p5 = scmp.ge.s32.totalorder %s13_s12, 4  }
 0x82d   :  { %12 = sbr.rel (!%p10_p5) target bundleno = 1 (0x1), region = 62 }

</bundles_post_ra>
